<compile_context>
chip_gen: v7x
topology: tpu7x:2x2x1
jax: 0.10.0
libtpu: 0.0.40
codegen_flags: <defaults>
</compile_context>

<pallas_src>
import functools

import jax
import jax.numpy as jnp
from jax.experimental import pallas as pl
from jax.experimental.pallas import tpu as pltpu

_BN_EPS = 1e-5
_LN_EPS = 1e-5


# ------------------------------ fused ViT kernel -----------------------------

def _vit_kernel(patches_ref, pw_ref, pb_ref, cls_ref, pos_ref,
                bn1g_ref, bn1b_ref, qkvw_ref, outw_ref, outb_ref,
                bn2g_ref, bn2b_ref, w1_ref, b1_ref, w2_ref, b2_ref,
                lng_ref, lnb_ref, hw_ref, hb_ref,
                o_ref, *, batch, depth, heads, dim_head, scale):
    inner = heads * dim_head
    n_tokens = pos_ref.shape[0]
    n_patches = n_tokens - 1
    inv_rows = 1.0 / float(batch * n_tokens)

    # ---------------- patch embedding + cls token + positional add -----------
    # One matmul over the whole (b * n_patches, patch_dim) slab.
    emb_all = jnp.dot(patches_ref[...].astype(jnp.bfloat16), pw_ref[...],
                      preferred_element_type=jnp.float32) + pb_ref[...]
    pos = pos_ref[...]                                   # (n, dim) fp32
    row0 = cls_ref[...] + pos[0:1, :]                    # shared across batch
    pos_rest = pos[1:, :]

    # Per-batch (n, dim) fp32 activations kept as values (vreg-resident).
    xs = []
    for bb in range(batch):
        emb = emb_all[bb * n_patches:(bb + 1) * n_patches, :]
        xs.append(jnp.concatenate([row0, emb + pos_rest], axis=0))

    def bn_scale_shift(acts, gamma, beta):
        # BatchNorm1d training-mode batch stats over (batch, seq) per channel,
        # folded to a single fused scale/shift (biased variance, eps=1e-5).
        s = acts[0].sum(axis=0, keepdims=True)
        ss = (acts[0] * acts[0]).sum(axis=0, keepdims=True)
        for a in acts[1:]:
            s = s + a.sum(axis=0, keepdims=True)
            ss = ss + (a * a).sum(axis=0, keepdims=True)
        mean = s * inv_rows
        var = jnp.maximum(ss * inv_rows - mean * mean, 0.0)
        sc = jax.lax.rsqrt(var + _BN_EPS) * gamma
        sh = beta - mean * sc
        return sc, sh

    # ---------------- transformer layers (static unroll, depth is small) -----
    for l in range(depth):
        # ---- PreNorm(BatchNorm) -> Attention -> +residual ----
        qkv_w = qkvw_ref[l]                              # (dim, 3*inner) bf16
        out_w = outw_ref[l]                              # (inner, dim)   bf16
        out_b = outb_ref[l]                              # (1, dim)       fp32
        sc, sh = bn_scale_shift(xs, bn1g_ref[l], bn1b_ref[l])
        new_xs = []
        for bb in range(batch):
            x = xs[bb]
            hn = (x * sc + sh).astype(jnp.bfloat16)
            qkv = jnp.dot(hn, qkv_w, preferred_element_type=jnp.float32)
            qkv_b = qkv.astype(jnp.bfloat16)             # single bf16 cast
            ohs = []
            for h in range(heads):                       # static unroll
                lo = h * dim_head
                q = qkv_b[:, lo:lo + dim_head]
                k = qkv_b[:, inner + lo:inner + lo + dim_head]
                v = qkv_b[:, 2 * inner + lo:2 * inner + lo + dim_head]
                # scores = q @ k^T, no transpose materialized.
                s_ = jax.lax.dot_general(
                    q, k, (((1,), (1,)), ((), ())),
                    preferred_element_type=jnp.float32) * scale
                s_ = s_ - jnp.max(s_, axis=-1, keepdims=True)
                p = jnp.exp(s_)
                p = p * pl.reciprocal(jnp.sum(p, axis=-1, keepdims=True),
                                      approx=True)
                ohs.append(jnp.dot(p.astype(jnp.bfloat16), v,
                                   preferred_element_type=jnp.float32))
            # Lane-concat heads -> single (n, inner) @ (inner, dim) out-proj.
            o_cat = jnp.concatenate(ohs, axis=-1).astype(jnp.bfloat16)
            new_xs.append(jnp.dot(o_cat, out_w, preferred_element_type=jnp.float32)
                          + out_b + x)
        xs = new_xs

        # ---- PreNorm(BatchNorm) -> FeedForward -> +residual ----
        w1 = w1_ref[l]
        b1 = b1_ref[l]
        w2 = w2_ref[l]
        b2 = b2_ref[l]
        sc, sh = bn_scale_shift(xs, bn2g_ref[l], bn2b_ref[l])
        new_xs = []
        for bb in range(batch):
            x = xs[bb]
            hn = (x * sc + sh).astype(jnp.bfloat16)
            hmid = jnp.dot(hn, w1, preferred_element_type=jnp.float32) + b1
            hmid = jnp.maximum(hmid, 0.0).astype(jnp.bfloat16)   # ReLU
            new_xs.append(jnp.dot(hmid, w2, preferred_element_type=jnp.float32)
                          + b2 + x)
        xs = new_xs

    # ---------------- cls pool + LayerNorm + classification head -------------
    cls_mat = jnp.concatenate([x[0:1, :] for x in xs], axis=0)   # (b, dim)
    mean = jnp.mean(cls_mat, axis=-1, keepdims=True)
    var = jnp.mean(jnp.square(cls_mat - mean), axis=-1, keepdims=True)
    hn = (cls_mat - mean) * jax.lax.rsqrt(var + _LN_EPS) * lng_ref[...] + lnb_ref[...]
    o_ref[...] = jnp.dot(hn.astype(jnp.bfloat16), hw_ref[...],
                         preferred_element_type=jnp.float32) + hb_ref[...]


# -------------------------------- ViT forward --------------------------------

def vit_forward(params, img, *, patch_size, heads, dim_head):
    b, c, H, W = img.shape
    p = patch_size
    hp, wp = H // p, W // p
    n_patches = hp * wp
    patch_dim = c * p * p
    n = n_patches + 1
    depth = params["qkv_w"].shape[0]
    num_classes = params["head_w"].shape[1]

    # 'b c (h p1) (w p2) -> b (h w) (p1 p2 c)'  -- one-time layout shuffle in XLA,
    # flattened to (b*n_patches, patch_dim) so the kernel does a single matmul.
    patches = img.reshape(b, c, hp, p, wp, p).transpose(0, 2, 4, 3, 5, 1)
    patches = patches.reshape(b * n_patches, patch_dim)

    kern = functools.partial(_vit_kernel, batch=b, depth=depth, heads=heads,
                             dim_head=dim_head, scale=dim_head ** (-0.5))
    vspec = pl.BlockSpec(memory_space=pltpu.MemorySpace.VMEM)
    return pl.pallas_call(
        kern,
        out_shape=jax.ShapeDtypeStruct((b, num_classes), jnp.float32),
        in_specs=[vspec] * 20,
        out_specs=vspec,
        compiler_params=pltpu.CompilerParams(vmem_limit_bytes=32 * 1024 * 1024),
    )(patches,
      params["patch_w"], params["patch_b"], params["cls_token"],
      params["pos_embedding"][:n],
      params["bn1_g"], params["bn1_b"], params["qkv_w"], params["out_w"],
      params["out_b"], params["bn2_g"], params["bn2_b"],
      params["ff_w1"], params["ff_b1"], params["ff_w2"], params["ff_b2"],
      params["ln_g"], params["ln_b"], params["head_w"], params["head_b"])


# -------------------------------- param init ---------------------------------

def init_params(key, *, patch_dim, dim, depth, heads, dim_head, mlp_dim,
                num_patches, num_classes):
    inner = heads * dim_head
    n = num_patches + 1
    kit = iter(jax.random.split(key, 16))

    def randn(shape, std=0.02, dtype=jnp.float32):
        return (std * jax.random.normal(next(kit), shape)).astype(dtype)

    # Per-layer tensors are stacked along a leading `depth` axis so the kernel
    # takes one ref per weight type and indexes it with a static layer index.
    return {
        "patch_w": randn((patch_dim, dim), dtype=jnp.bfloat16),
        "patch_b": randn((1, dim)),
        "pos_embedding": randn((n, dim), std=1.0),
        "cls_token": randn((1, dim), std=1.0),
        "bn1_g": jnp.ones((depth, 1, dim), jnp.float32),
        "bn1_b": jnp.zeros((depth, 1, dim), jnp.float32),
        "qkv_w": randn((depth, dim, 3 * inner), dtype=jnp.bfloat16),
        "out_w": randn((depth, inner, dim), dtype=jnp.bfloat16),
        "out_b": randn((depth, 1, dim)),
        "bn2_g": jnp.ones((depth, 1, dim), jnp.float32),
        "bn2_b": jnp.zeros((depth, 1, dim), jnp.float32),
        "ff_w1": randn((depth, dim, mlp_dim), dtype=jnp.bfloat16),
        "ff_b1": randn((depth, 1, mlp_dim)),
        "ff_w2": randn((depth, mlp_dim, dim), dtype=jnp.bfloat16),
        "ff_b2": randn((depth, 1, dim)),
        "ln_g": jnp.ones((1, dim), jnp.float32),
        "ln_b": jnp.zeros((1, dim), jnp.float32),
        "head_w": randn((dim, num_classes), dtype=jnp.bfloat16),
        "head_b": randn((1, num_classes)),
    }


# ----------------------------------- main -------------------------------------

if __name__ == "__main__":
    image_size = 16
    patch_size = 4
    channels = 4
    dim = 32
    depth = 2
    heads = 4
    dim_head = 8
    mlp_dim = 64
    num_classes = 10
    batch = 2

    num_patches = (image_size // patch_size) ** 2           # 16
    patch_dim = channels * patch_size * patch_size          # 64

    key = jax.random.PRNGKey(0)
    pkey, xkey = jax.random.split(key)
    params = init_params(
        pkey, patch_dim=patch_dim, dim=dim, depth=depth, heads=heads,
        dim_head=dim_head, mlp_dim=mlp_dim, num_patches=num_patches,
        num_classes=num_classes,
    )

    img = jax.random.normal(xkey, (batch, channels, image_size, image_size),
                            dtype=jnp.float32)

    fwd = jax.jit(functools.partial(
        vit_forward, patch_size=patch_size, heads=heads, dim_head=dim_head))

    out = jax.block_until_ready(fwd(params, img))
    assert out.shape == (batch, num_classes), out.shape
    print("KERNEL_OK")
</pallas_src>

<mosaic_0001>
module attributes {stable_mosaic.version = 11 : i64} {
  func.func @_vit_kernel(%arg0: memref<32x64xf32, #tpu.memory_space<vmem>>, %arg1: memref<64x32xbf16, #tpu.memory_space<vmem>>, %arg2: memref<1x32xf32, #tpu.memory_space<vmem>>, %arg3: memref<1x32xf32, #tpu.memory_space<vmem>>, %arg4: memref<17x32xf32, #tpu.memory_space<vmem>>, %arg5: memref<2x1x32xf32, #tpu.memory_space<vmem>>, %arg6: memref<2x1x32xf32, #tpu.memory_space<vmem>>, %arg7: memref<2x32x96xbf16, #tpu.memory_space<vmem>>, %arg8: memref<2x32x32xbf16, #tpu.memory_space<vmem>>, %arg9: memref<2x1x32xf32, #tpu.memory_space<vmem>>, %arg10: memref<2x1x32xf32, #tpu.memory_space<vmem>>, %arg11: memref<2x1x32xf32, #tpu.memory_space<vmem>>, %arg12: memref<2x32x64xbf16, #tpu.memory_space<vmem>>, %arg13: memref<2x1x64xf32, #tpu.memory_space<vmem>>, %arg14: memref<2x64x32xbf16, #tpu.memory_space<vmem>>, %arg15: memref<2x1x32xf32, #tpu.memory_space<vmem>>, %arg16: memref<1x32xf32, #tpu.memory_space<vmem>>, %arg17: memref<1x32xf32, #tpu.memory_space<vmem>>, %arg18: memref<32x10xbf16, #tpu.memory_space<vmem>>, %arg19: memref<1x10xf32, #tpu.memory_space<vmem>>, %arg20: memref<2x10xf32, #tpu.memory_space<vmem>>) attributes {dimension_semantics = [], scalar_prefetch = 0 : i64, scratch_operands = 0 : i64, tpu.core_type = #tpu.core_type<tc>} {
    %c0 = arith.constant 0 : index
    %c0_0 = arith.constant 0 : index
    %0 = vector.load %arg0[%c0, %c0_0] : memref<32x64xf32, #tpu.memory_space<vmem>>, vector<32x64xf32>
    %1 = arith.truncf %0 : vector<32x64xf32> to vector<32x64xbf16>
    %c0_1 = arith.constant 0 : index
    %c0_2 = arith.constant 0 : index
    %2 = vector.load %arg1[%c0_1, %c0_2] : memref<64x32xbf16, #tpu.memory_space<vmem>>, vector<64x32xbf16>
    %cst = arith.constant dense<0.000000e+00> : vector<32x32xf32>
    %3 = tpu.matmul %1, %2, %cst {dimension_numbers = #tpu.dot_dimension_numbers<[1], [0], [0], [1], [0, 0, 1, 1], [], []>} : vector<32x64xbf16>, vector<64x32xbf16>, vector<32x32xf32> -> vector<32x32xf32>
    %c0_3 = arith.constant 0 : index
    %c0_4 = arith.constant 0 : index
    %4 = vector.load %arg2[%c0_3, %c0_4] : memref<1x32xf32, #tpu.memory_space<vmem>>, vector<1x32xf32>
    %5 = vector.broadcast %4 : vector<1x32xf32> to vector<32x32xf32>
    %6 = arith.addf %3, %5 : vector<32x32xf32>
    %c0_5 = arith.constant 0 : index
    %c0_6 = arith.constant 0 : index
    %7 = vector.load %arg4[%c0_5, %c0_6] : memref<17x32xf32, #tpu.memory_space<vmem>>, vector<17x32xf32>
    %c0_7 = arith.constant 0 : index
    %c0_8 = arith.constant 0 : index
    %8 = vector.load %arg3[%c0_7, %c0_8] : memref<1x32xf32, #tpu.memory_space<vmem>>, vector<1x32xf32>
    %9 = vector.extract_strided_slice %7 {offsets = [0, 0], sizes = [1, 32], strides = [1, 1]} : vector<17x32xf32> to vector<1x32xf32>
    %10 = arith.addf %8, %9 : vector<1x32xf32>
    %11 = vector.extract_strided_slice %7 {offsets = [1, 0], sizes = [16, 32], strides = [1, 1]} : vector<17x32xf32> to vector<16x32xf32>
    %12 = vector.extract_strided_slice %6 {offsets = [0, 0], sizes = [16, 32], strides = [1, 1]} : vector<32x32xf32> to vector<16x32xf32>
    %13 = arith.addf %12, %11 : vector<16x32xf32>
    %14 = tpu.concatenate %10, %13 in 0 : vector<1x32xf32>, vector<16x32xf32> -> vector<17x32xf32>
    %15 = vector.extract_strided_slice %6 {offsets = [16, 0], sizes = [16, 32], strides = [1, 1]} : vector<32x32xf32> to vector<16x32xf32>
    %16 = arith.addf %15, %11 : vector<16x32xf32>
    %17 = tpu.concatenate %10, %16 in 0 : vector<1x32xf32>, vector<16x32xf32> -> vector<17x32xf32>
    %c0_9 = arith.constant 0 : index
    %c0_10 = arith.constant 0 : index
    %c0_11 = arith.constant 0 : index
    %18 = vector.load %arg7[%c0_9, %c0_10, %c0_11] : memref<2x32x96xbf16, #tpu.memory_space<vmem>>, vector<1x32x96xbf16>
    %19 = vector.shape_cast %18 : vector<1x32x96xbf16> to vector<32x96xbf16>
    %c0_12 = arith.constant 0 : index
    %c0_13 = arith.constant 0 : index
    %c0_14 = arith.constant 0 : index
    %20 = vector.load %arg8[%c0_12, %c0_13, %c0_14] : memref<2x32x32xbf16, #tpu.memory_space<vmem>>, vector<1x32x32xbf16>
    %21 = vector.shape_cast %20 : vector<1x32x32xbf16> to vector<32x32xbf16>
    %c0_15 = arith.constant 0 : index
    %c0_16 = arith.constant 0 : index
    %c0_17 = arith.constant 0 : index
    %22 = vector.load %arg9[%c0_15, %c0_16, %c0_17] : memref<2x1x32xf32, #tpu.memory_space<vmem>>, vector<1x1x32xf32>
    %23 = vector.shape_cast %22 : vector<1x1x32xf32> to vector<1x32xf32>
    %c0_18 = arith.constant 0 : index
    %c0_19 = arith.constant 0 : index
    %c0_20 = arith.constant 0 : index
    %24 = vector.load %arg5[%c0_18, %c0_19, %c0_20] : memref<2x1x32xf32, #tpu.memory_space<vmem>>, vector<1x1x32xf32>
    %25 = vector.shape_cast %24 : vector<1x1x32xf32> to vector<1x32xf32>
    %c0_21 = arith.constant 0 : index
    %c0_22 = arith.constant 0 : index
    %c0_23 = arith.constant 0 : index
    %26 = vector.load %arg6[%c0_21, %c0_22, %c0_23] : memref<2x1x32xf32, #tpu.memory_space<vmem>>, vector<1x1x32xf32>
    %27 = vector.shape_cast %26 : vector<1x1x32xf32> to vector<1x32xf32>
    %cst_24 = arith.constant dense<0.000000e+00> : vector<32xf32>
    %28 = vector.multi_reduction <add>, %14, %cst_24 [0] : vector<17x32xf32> to vector<32xf32>
    %29 = vector.shape_cast %28 : vector<32xf32> to vector<1x32xf32>
    %30 = arith.mulf %14, %14 : vector<17x32xf32>
    %cst_25 = arith.constant dense<0.000000e+00> : vector<32xf32>
    %31 = vector.multi_reduction <add>, %30, %cst_25 [0] : vector<17x32xf32> to vector<32xf32>
    %32 = vector.shape_cast %31 : vector<32xf32> to vector<1x32xf32>
    %cst_26 = arith.constant dense<0.000000e+00> : vector<32xf32>
    %33 = vector.multi_reduction <add>, %17, %cst_26 [0] : vector<17x32xf32> to vector<32xf32>
    %34 = vector.shape_cast %33 : vector<32xf32> to vector<1x32xf32>
    %35 = arith.addf %29, %34 : vector<1x32xf32>
    %36 = arith.mulf %17, %17 : vector<17x32xf32>
    %cst_27 = arith.constant dense<0.000000e+00> : vector<32xf32>
    %37 = vector.multi_reduction <add>, %36, %cst_27 [0] : vector<17x32xf32> to vector<32xf32>
    %38 = vector.shape_cast %37 : vector<32xf32> to vector<1x32xf32>
    %39 = arith.addf %32, %38 : vector<1x32xf32>
    %cst_28 = arith.constant 0.0294117648 : f32
    %40 = vector.broadcast %cst_28 : f32 to vector<1x32xf32>
    %41 = arith.mulf %35, %40 : vector<1x32xf32>
    %cst_29 = arith.constant 0.0294117648 : f32
    %42 = vector.broadcast %cst_29 : f32 to vector<1x32xf32>
    %43 = arith.mulf %39, %42 : vector<1x32xf32>
    %44 = arith.mulf %41, %41 : vector<1x32xf32>
    %45 = arith.subf %43, %44 : vector<1x32xf32>
    %cst_30 = arith.constant 0.000000e+00 : f32
    %46 = vector.broadcast %cst_30 : f32 to vector<1x32xf32>
    %47 = arith.maximumf %45, %46 : vector<1x32xf32>
    %cst_31 = arith.constant 9.99999974E-6 : f32
    %48 = vector.broadcast %cst_31 : f32 to vector<1x32xf32>
    %49 = arith.addf %47, %48 : vector<1x32xf32>
    %50 = math.rsqrt %49 : vector<1x32xf32>
    %51 = arith.mulf %50, %25 : vector<1x32xf32>
    %52 = arith.mulf %41, %51 : vector<1x32xf32>
    %53 = arith.subf %27, %52 : vector<1x32xf32>
    %54 = vector.broadcast %51 : vector<1x32xf32> to vector<17x32xf32>
    %55 = arith.mulf %14, %54 : vector<17x32xf32>
    %56 = vector.broadcast %53 : vector<1x32xf32> to vector<17x32xf32>
    %57 = arith.addf %55, %56 : vector<17x32xf32>
    %58 = arith.truncf %57 : vector<17x32xf32> to vector<17x32xbf16>
    %cst_32 = arith.constant dense<0.000000e+00> : vector<17x96xf32>
    %59 = tpu.matmul %58, %19, %cst_32 {dimension_numbers = #tpu.dot_dimension_numbers<[1], [0], [0], [1], [0, 0, 1, 1], [], []>} : vector<17x32xbf16>, vector<32x96xbf16>, vector<17x96xf32> -> vector<17x96xf32>
    %60 = arith.truncf %59 : vector<17x96xf32> to vector<17x96xbf16>
    %61 = vector.extract_strided_slice %60 {offsets = [0, 0], sizes = [17, 8], strides = [1, 1]} : vector<17x96xbf16> to vector<17x8xbf16>
    %62 = vector.extract_strided_slice %60 {offsets = [0, 32], sizes = [17, 8], strides = [1, 1]} : vector<17x96xbf16> to vector<17x8xbf16>
    %63 = vector.extract_strided_slice %60 {offsets = [0, 64], sizes = [17, 8], strides = [1, 1]} : vector<17x96xbf16> to vector<17x8xbf16>
    %cst_33 = arith.constant dense<0.000000e+00> : vector<17x17xf32>
    %64 = tpu.matmul %61, %62, %cst_33 {dimension_numbers = #tpu.dot_dimension_numbers<[1], [1], [0], [0], [0, 0, 1, 0], [], []>} : vector<17x8xbf16>, vector<17x8xbf16>, vector<17x17xf32> -> vector<17x17xf32>
    %cst_34 = arith.constant 0.353553385 : f32
    %65 = vector.broadcast %cst_34 : f32 to vector<17x17xf32>
    %66 = arith.mulf %64, %65 : vector<17x17xf32>
    %cst_35 = arith.constant dense<0xFF800000> : vector<17xf32>
    %67 = vector.multi_reduction <maximumf>, %66, %cst_35 [1] : vector<17x17xf32> to vector<17xf32>
    %68 = vector.shape_cast %67 : vector<17xf32> to vector<17x1xf32>
    %69 = vector.broadcast %68 : vector<17x1xf32> to vector<17x17xf32>
    %70 = arith.subf %66, %69 : vector<17x17xf32>
    %71 = math.exp %70 : vector<17x17xf32>
    %cst_36 = arith.constant dense<0.000000e+00> : vector<17xf32>
    %72 = vector.multi_reduction <add>, %71, %cst_36 [1] : vector<17x17xf32> to vector<17xf32>
    %73 = vector.shape_cast %72 : vector<17xf32> to vector<17x1xf32>
    %74 = tpu.reciprocal %73 {approx = true} : vector<17x1xf32> -> vector<17x1xf32>
    %75 = vector.broadcast %74 : vector<17x1xf32> to vector<17x17xf32>
    %76 = arith.mulf %71, %75 : vector<17x17xf32>
    %77 = arith.truncf %76 : vector<17x17xf32> to vector<17x17xbf16>
    %cst_37 = arith.constant dense<0.000000e+00> : vector<17x8xf32>
    %78 = tpu.matmul %77, %63, %cst_37 {dimension_numbers = #tpu.dot_dimension_numbers<[1], [0], [0], [1], [0, 0, 1, 1], [], []>} : vector<17x17xbf16>, vector<17x8xbf16>, vector<17x8xf32> -> vector<17x8xf32>
    %79 = vector.extract_strided_slice %60 {offsets = [0, 8], sizes = [17, 8], strides = [1, 1]} : vector<17x96xbf16> to vector<17x8xbf16>
    %80 = vector.extract_strided_slice %60 {offsets = [0, 40], sizes = [17, 8], strides = [1, 1]} : vector<17x96xbf16> to vector<17x8xbf16>
    %81 = vector.extract_strided_slice %60 {offsets = [0, 72], sizes = [17, 8], strides = [1, 1]} : vector<17x96xbf16> to vector<17x8xbf16>
    %cst_38 = arith.constant dense<0.000000e+00> : vector<17x17xf32>
    %82 = tpu.matmul %79, %80, %cst_38 {dimension_numbers = #tpu.dot_dimension_numbers<[1], [1], [0], [0], [0, 0, 1, 0], [], []>} : vector<17x8xbf16>, vector<17x8xbf16>, vector<17x17xf32> -> vector<17x17xf32>
    %cst_39 = arith.constant 0.353553385 : f32
    %83 = vector.broadcast %cst_39 : f32 to vector<17x17xf32>
    %84 = arith.mulf %82, %83 : vector<17x17xf32>
    %cst_40 = arith.constant dense<0xFF800000> : vector<17xf32>
    %85 = vector.multi_reduction <maximumf>, %84, %cst_40 [1] : vector<17x17xf32> to vector<17xf32>
    %86 = vector.shape_cast %85 : vector<17xf32> to vector<17x1xf32>
    %87 = vector.broadcast %86 : vector<17x1xf32> to vector<17x17xf32>
    %88 = arith.subf %84, %87 : vector<17x17xf32>
    %89 = math.exp %88 : vector<17x17xf32>
    %cst_41 = arith.constant dense<0.000000e+00> : vector<17xf32>
    %90 = vector.multi_reduction <add>, %89, %cst_41 [1] : vector<17x17xf32> to vector<17xf32>
    %91 = vector.shape_cast %90 : vector<17xf32> to vector<17x1xf32>
    %92 = tpu.reciprocal %91 {approx = true} : vector<17x1xf32> -> vector<17x1xf32>
    %93 = vector.broadcast %92 : vector<17x1xf32> to vector<17x17xf32>
    %94 = arith.mulf %89, %93 : vector<17x17xf32>
    %95 = arith.truncf %94 : vector<17x17xf32> to vector<17x17xbf16>
    %cst_42 = arith.constant dense<0.000000e+00> : vector<17x8xf32>
    %96 = tpu.matmul %95, %81, %cst_42 {dimension_numbers = #tpu.dot_dimension_numbers<[1], [0], [0], [1], [0, 0, 1, 1], [], []>} : vector<17x17xbf16>, vector<17x8xbf16>, vector<17x8xf32> -> vector<17x8xf32>
    %97 = vector.extract_strided_slice %60 {offsets = [0, 16], sizes = [17, 8], strides = [1, 1]} : vector<17x96xbf16> to vector<17x8xbf16>
    %98 = vector.extract_strided_slice %60 {offsets = [0, 48], sizes = [17, 8], strides = [1, 1]} : vector<17x96xbf16> to vector<17x8xbf16>
    %99 = vector.extract_strided_slice %60 {offsets = [0, 80], sizes = [17, 8], strides = [1, 1]} : vector<17x96xbf16> to vector<17x8xbf16>
    %cst_43 = arith.constant dense<0.000000e+00> : vector<17x17xf32>
    %100 = tpu.matmul %97, %98, %cst_43 {dimension_numbers = #tpu.dot_dimension_numbers<[1], [1], [0], [0], [0, 0, 1, 0], [], []>} : vector<17x8xbf16>, vector<17x8xbf16>, vector<17x17xf32> -> vector<17x17xf32>
    %cst_44 = arith.constant 0.353553385 : f32
    %101 = vector.broadcast %cst_44 : f32 to vector<17x17xf32>
    %102 = arith.mulf %100, %101 : vector<17x17xf32>
    %cst_45 = arith.constant dense<0xFF800000> : vector<17xf32>
    %103 = vector.multi_reduction <maximumf>, %102, %cst_45 [1] : vector<17x17xf32> to vector<17xf32>
    %104 = vector.shape_cast %103 : vector<17xf32> to vector<17x1xf32>
    %105 = vector.broadcast %104 : vector<17x1xf32> to vector<17x17xf32>
    %106 = arith.subf %102, %105 : vector<17x17xf32>
    %107 = math.exp %106 : vector<17x17xf32>
    %cst_46 = arith.constant dense<0.000000e+00> : vector<17xf32>
    %108 = vector.multi_reduction <add>, %107, %cst_46 [1] : vector<17x17xf32> to vector<17xf32>
    %109 = vector.shape_cast %108 : vector<17xf32> to vector<17x1xf32>
    %110 = tpu.reciprocal %109 {approx = true} : vector<17x1xf32> -> vector<17x1xf32>
    %111 = vector.broadcast %110 : vector<17x1xf32> to vector<17x17xf32>
    %112 = arith.mulf %107, %111 : vector<17x17xf32>
    %113 = arith.truncf %112 : vector<17x17xf32> to vector<17x17xbf16>
    %cst_47 = arith.constant dense<0.000000e+00> : vector<17x8xf32>
    %114 = tpu.matmul %113, %99, %cst_47 {dimension_numbers = #tpu.dot_dimension_numbers<[1], [0], [0], [1], [0, 0, 1, 1], [], []>} : vector<17x17xbf16>, vector<17x8xbf16>, vector<17x8xf32> -> vector<17x8xf32>
    %115 = vector.extract_strided_slice %60 {offsets = [0, 24], sizes = [17, 8], strides = [1, 1]} : vector<17x96xbf16> to vector<17x8xbf16>
    %116 = vector.extract_strided_slice %60 {offsets = [0, 56], sizes = [17, 8], strides = [1, 1]} : vector<17x96xbf16> to vector<17x8xbf16>
    %117 = vector.extract_strided_slice %60 {offsets = [0, 88], sizes = [17, 8], strides = [1, 1]} : vector<17x96xbf16> to vector<17x8xbf16>
    %cst_48 = arith.constant dense<0.000000e+00> : vector<17x17xf32>
    %118 = tpu.matmul %115, %116, %cst_48 {dimension_numbers = #tpu.dot_dimension_numbers<[1], [1], [0], [0], [0, 0, 1, 0], [], []>} : vector<17x8xbf16>, vector<17x8xbf16>, vector<17x17xf32> -> vector<17x17xf32>
    %cst_49 = arith.constant 0.353553385 : f32
    %119 = vector.broadcast %cst_49 : f32 to vector<17x17xf32>
    %120 = arith.mulf %118, %119 : vector<17x17xf32>
    %cst_50 = arith.constant dense<0xFF800000> : vector<17xf32>
    %121 = vector.multi_reduction <maximumf>, %120, %cst_50 [1] : vector<17x17xf32> to vector<17xf32>
    %122 = vector.shape_cast %121 : vector<17xf32> to vector<17x1xf32>
    %123 = vector.broadcast %122 : vector<17x1xf32> to vector<17x17xf32>
    %124 = arith.subf %120, %123 : vector<17x17xf32>
    %125 = math.exp %124 : vector<17x17xf32>
    %cst_51 = arith.constant dense<0.000000e+00> : vector<17xf32>
    %126 = vector.multi_reduction <add>, %125, %cst_51 [1] : vector<17x17xf32> to vector<17xf32>
    %127 = vector.shape_cast %126 : vector<17xf32> to vector<17x1xf32>
    %128 = tpu.reciprocal %127 {approx = true} : vector<17x1xf32> -> vector<17x1xf32>
    %129 = vector.broadcast %128 : vector<17x1xf32> to vector<17x17xf32>
    %130 = arith.mulf %125, %129 : vector<17x17xf32>
    %131 = arith.truncf %130 : vector<17x17xf32> to vector<17x17xbf16>
    %cst_52 = arith.constant dense<0.000000e+00> : vector<17x8xf32>
    %132 = tpu.matmul %131, %117, %cst_52 {dimension_numbers = #tpu.dot_dimension_numbers<[1], [0], [0], [1], [0, 0, 1, 1], [], []>} : vector<17x17xbf16>, vector<17x8xbf16>, vector<17x8xf32> -> vector<17x8xf32>
    %133 = tpu.concatenate %78, %96, %114, %132 in 1 : vector<17x8xf32>, vector<17x8xf32>, vector<17x8xf32>, vector<17x8xf32> -> vector<17x32xf32>
    %134 = arith.truncf %133 : vector<17x32xf32> to vector<17x32xbf16>
    %cst_53 = arith.constant dense<0.000000e+00> : vector<17x32xf32>
    %135 = tpu.matmul %134, %21, %cst_53 {dimension_numbers = #tpu.dot_dimension_numbers<[1], [0], [0], [1], [0, 0, 1, 1], [], []>} : vector<17x32xbf16>, vector<32x32xbf16>, vector<17x32xf32> -> vector<17x32xf32>
    %136 = vector.broadcast %23 : vector<1x32xf32> to vector<17x32xf32>
    %137 = arith.addf %135, %136 : vector<17x32xf32>
    %138 = arith.addf %137, %14 : vector<17x32xf32>
    %139 = vector.broadcast %51 : vector<1x32xf32> to vector<17x32xf32>
    %140 = arith.mulf %17, %139 : vector<17x32xf32>
    %141 = vector.broadcast %53 : vector<1x32xf32> to vector<17x32xf32>
    %142 = arith.addf %140, %141 : vector<17x32xf32>
    %143 = arith.truncf %142 : vector<17x32xf32> to vector<17x32xbf16>
    %cst_54 = arith.constant dense<0.000000e+00> : vector<17x96xf32>
    %144 = tpu.matmul %143, %19, %cst_54 {dimension_numbers = #tpu.dot_dimension_numbers<[1], [0], [0], [1], [0, 0, 1, 1], [], []>} : vector<17x32xbf16>, vector<32x96xbf16>, vector<17x96xf32> -> vector<17x96xf32>
    %145 = arith.truncf %144 : vector<17x96xf32> to vector<17x96xbf16>
    %146 = vector.extract_strided_slice %145 {offsets = [0, 0], sizes = [17, 8], strides = [1, 1]} : vector<17x96xbf16> to vector<17x8xbf16>
    %147 = vector.extract_strided_slice %145 {offsets = [0, 32], sizes = [17, 8], strides = [1, 1]} : vector<17x96xbf16> to vector<17x8xbf16>
    %148 = vector.extract_strided_slice %145 {offsets = [0, 64], sizes = [17, 8], strides = [1, 1]} : vector<17x96xbf16> to vector<17x8xbf16>
    %cst_55 = arith.constant dense<0.000000e+00> : vector<17x17xf32>
    %149 = tpu.matmul %146, %147, %cst_55 {dimension_numbers = #tpu.dot_dimension_numbers<[1], [1], [0], [0], [0, 0, 1, 0], [], []>} : vector<17x8xbf16>, vector<17x8xbf16>, vector<17x17xf32> -> vector<17x17xf32>
    %cst_56 = arith.constant 0.353553385 : f32
    %150 = vector.broadcast %cst_56 : f32 to vector<17x17xf32>
    %151 = arith.mulf %149, %150 : vector<17x17xf32>
    %cst_57 = arith.constant dense<0xFF800000> : vector<17xf32>
    %152 = vector.multi_reduction <maximumf>, %151, %cst_57 [1] : vector<17x17xf32> to vector<17xf32>
    %153 = vector.shape_cast %152 : vector<17xf32> to vector<17x1xf32>
    %154 = vector.broadcast %153 : vector<17x1xf32> to vector<17x17xf32>
    %155 = arith.subf %151, %154 : vector<17x17xf32>
    %156 = math.exp %155 : vector<17x17xf32>
    %cst_58 = arith.constant dense<0.000000e+00> : vector<17xf32>
    %157 = vector.multi_reduction <add>, %156, %cst_58 [1] : vector<17x17xf32> to vector<17xf32>
    %158 = vector.shape_cast %157 : vector<17xf32> to vector<17x1xf32>
    %159 = tpu.reciprocal %158 {approx = true} : vector<17x1xf32> -> vector<17x1xf32>
    %160 = vector.broadcast %159 : vector<17x1xf32> to vector<17x17xf32>
    %161 = arith.mulf %156, %160 : vector<17x17xf32>
    %162 = arith.truncf %161 : vector<17x17xf32> to vector<17x17xbf16>
    %cst_59 = arith.constant dense<0.000000e+00> : vector<17x8xf32>
    %163 = tpu.matmul %162, %148, %cst_59 {dimension_numbers = #tpu.dot_dimension_numbers<[1], [0], [0], [1], [0, 0, 1, 1], [], []>} : vector<17x17xbf16>, vector<17x8xbf16>, vector<17x8xf32> -> vector<17x8xf32>
    %164 = vector.extract_strided_slice %145 {offsets = [0, 8], sizes = [17, 8], strides = [1, 1]} : vector<17x96xbf16> to vector<17x8xbf16>
    %165 = vector.extract_strided_slice %145 {offsets = [0, 40], sizes = [17, 8], strides = [1, 1]} : vector<17x96xbf16> to vector<17x8xbf16>
    %166 = vector.extract_strided_slice %145 {offsets = [0, 72], sizes = [17, 8], strides = [1, 1]} : vector<17x96xbf16> to vector<17x8xbf16>
    %cst_60 = arith.constant dense<0.000000e+00> : vector<17x17xf32>
    %167 = tpu.matmul %164, %165, %cst_60 {dimension_numbers = #tpu.dot_dimension_numbers<[1], [1], [0], [0], [0, 0, 1, 0], [], []>} : vector<17x8xbf16>, vector<17x8xbf16>, vector<17x17xf32> -> vector<17x17xf32>
    %cst_61 = arith.constant 0.353553385 : f32
    %168 = vector.broadcast %cst_61 : f32 to vector<17x17xf32>
    %169 = arith.mulf %167, %168 : vector<17x17xf32>
    %cst_62 = arith.constant dense<0xFF800000> : vector<17xf32>
    %170 = vector.multi_reduction <maximumf>, %169, %cst_62 [1] : vector<17x17xf32> to vector<17xf32>
    %171 = vector.shape_cast %170 : vector<17xf32> to vector<17x1xf32>
    %172 = vector.broadcast %171 : vector<17x1xf32> to vector<17x17xf32>
    %173 = arith.subf %169, %172 : vector<17x17xf32>
    %174 = math.exp %173 : vector<17x17xf32>
    %cst_63 = arith.constant dense<0.000000e+00> : vector<17xf32>
    %175 = vector.multi_reduction <add>, %174, %cst_63 [1] : vector<17x17xf32> to vector<17xf32>
    %176 = vector.shape_cast %175 : vector<17xf32> to vector<17x1xf32>
    %177 = tpu.reciprocal %176 {approx = true} : vector<17x1xf32> -> vector<17x1xf32>
    %178 = vector.broadcast %177 : vector<17x1xf32> to vector<17x17xf32>
    %179 = arith.mulf %174, %178 : vector<17x17xf32>
    %180 = arith.truncf %179 : vector<17x17xf32> to vector<17x17xbf16>
    %cst_64 = arith.constant dense<0.000000e+00> : vector<17x8xf32>
    %181 = tpu.matmul %180, %166, %cst_64 {dimension_numbers = #tpu.dot_dimension_numbers<[1], [0], [0], [1], [0, 0, 1, 1], [], []>} : vector<17x17xbf16>, vector<17x8xbf16>, vector<17x8xf32> -> vector<17x8xf32>
    %182 = vector.extract_strided_slice %145 {offsets = [0, 16], sizes = [17, 8], strides = [1, 1]} : vector<17x96xbf16> to vector<17x8xbf16>
    %183 = vector.extract_strided_slice %145 {offsets = [0, 48], sizes = [17, 8], strides = [1, 1]} : vector<17x96xbf16> to vector<17x8xbf16>
    %184 = vector.extract_strided_slice %145 {offsets = [0, 80], sizes = [17, 8], strides = [1, 1]} : vector<17x96xbf16> to vector<17x8xbf16>
    %cst_65 = arith.constant dense<0.000000e+00> : vector<17x17xf32>
    %185 = tpu.matmul %182, %183, %cst_65 {dimension_numbers = #tpu.dot_dimension_numbers<[1], [1], [0], [0], [0, 0, 1, 0], [], []>} : vector<17x8xbf16>, vector<17x8xbf16>, vector<17x17xf32> -> vector<17x17xf32>
    %cst_66 = arith.constant 0.353553385 : f32
    %186 = vector.broadcast %cst_66 : f32 to vector<17x17xf32>
    %187 = arith.mulf %185, %186 : vector<17x17xf32>
    %cst_67 = arith.constant dense<0xFF800000> : vector<17xf32>
    %188 = vector.multi_reduction <maximumf>, %187, %cst_67 [1] : vector<17x17xf32> to vector<17xf32>
    %189 = vector.shape_cast %188 : vector<17xf32> to vector<17x1xf32>
    %190 = vector.broadcast %189 : vector<17x1xf32> to vector<17x17xf32>
    %191 = arith.subf %187, %190 : vector<17x17xf32>
    %192 = math.exp %191 : vector<17x17xf32>
    %cst_68 = arith.constant dense<0.000000e+00> : vector<17xf32>
    %193 = vector.multi_reduction <add>, %192, %cst_68 [1] : vector<17x17xf32> to vector<17xf32>
    %194 = vector.shape_cast %193 : vector<17xf32> to vector<17x1xf32>
    %195 = tpu.reciprocal %194 {approx = true} : vector<17x1xf32> -> vector<17x1xf32>
    %196 = vector.broadcast %195 : vector<17x1xf32> to vector<17x17xf32>
    %197 = arith.mulf %192, %196 : vector<17x17xf32>
    %198 = arith.truncf %197 : vector<17x17xf32> to vector<17x17xbf16>
    %cst_69 = arith.constant dense<0.000000e+00> : vector<17x8xf32>
    %199 = tpu.matmul %198, %184, %cst_69 {dimension_numbers = #tpu.dot_dimension_numbers<[1], [0], [0], [1], [0, 0, 1, 1], [], []>} : vector<17x17xbf16>, vector<17x8xbf16>, vector<17x8xf32> -> vector<17x8xf32>
    %200 = vector.extract_strided_slice %145 {offsets = [0, 24], sizes = [17, 8], strides = [1, 1]} : vector<17x96xbf16> to vector<17x8xbf16>
    %201 = vector.extract_strided_slice %145 {offsets = [0, 56], sizes = [17, 8], strides = [1, 1]} : vector<17x96xbf16> to vector<17x8xbf16>
    %202 = vector.extract_strided_slice %145 {offsets = [0, 88], sizes = [17, 8], strides = [1, 1]} : vector<17x96xbf16> to vector<17x8xbf16>
    %cst_70 = arith.constant dense<0.000000e+00> : vector<17x17xf32>
    %203 = tpu.matmul %200, %201, %cst_70 {dimension_numbers = #tpu.dot_dimension_numbers<[1], [1], [0], [0], [0, 0, 1, 0], [], []>} : vector<17x8xbf16>, vector<17x8xbf16>, vector<17x17xf32> -> vector<17x17xf32>
    %cst_71 = arith.constant 0.353553385 : f32
    %204 = vector.broadcast %cst_71 : f32 to vector<17x17xf32>
    %205 = arith.mulf %203, %204 : vector<17x17xf32>
    %cst_72 = arith.constant dense<0xFF800000> : vector<17xf32>
    %206 = vector.multi_reduction <maximumf>, %205, %cst_72 [1] : vector<17x17xf32> to vector<17xf32>
    %207 = vector.shape_cast %206 : vector<17xf32> to vector<17x1xf32>
    %208 = vector.broadcast %207 : vector<17x1xf32> to vector<17x17xf32>
    %209 = arith.subf %205, %208 : vector<17x17xf32>
    %210 = math.exp %209 : vector<17x17xf32>
    %cst_73 = arith.constant dense<0.000000e+00> : vector<17xf32>
    %211 = vector.multi_reduction <add>, %210, %cst_73 [1] : vector<17x17xf32> to vector<17xf32>
    %212 = vector.shape_cast %211 : vector<17xf32> to vector<17x1xf32>
    %213 = tpu.reciprocal %212 {approx = true} : vector<17x1xf32> -> vector<17x1xf32>
    %214 = vector.broadcast %213 : vector<17x1xf32> to vector<17x17xf32>
    %215 = arith.mulf %210, %214 : vector<17x17xf32>
    %216 = arith.truncf %215 : vector<17x17xf32> to vector<17x17xbf16>
    %cst_74 = arith.constant dense<0.000000e+00> : vector<17x8xf32>
    %217 = tpu.matmul %216, %202, %cst_74 {dimension_numbers = #tpu.dot_dimension_numbers<[1], [0], [0], [1], [0, 0, 1, 1], [], []>} : vector<17x17xbf16>, vector<17x8xbf16>, vector<17x8xf32> -> vector<17x8xf32>
    %218 = tpu.concatenate %163, %181, %199, %217 in 1 : vector<17x8xf32>, vector<17x8xf32>, vector<17x8xf32>, vector<17x8xf32> -> vector<17x32xf32>
    %219 = arith.truncf %218 : vector<17x32xf32> to vector<17x32xbf16>
    %cst_75 = arith.constant dense<0.000000e+00> : vector<17x32xf32>
    %220 = tpu.matmul %219, %21, %cst_75 {dimension_numbers = #tpu.dot_dimension_numbers<[1], [0], [0], [1], [0, 0, 1, 1], [], []>} : vector<17x32xbf16>, vector<32x32xbf16>, vector<17x32xf32> -> vector<17x32xf32>
    %221 = vector.broadcast %23 : vector<1x32xf32> to vector<17x32xf32>
    %222 = arith.addf %220, %221 : vector<17x32xf32>
    %223 = arith.addf %222, %17 : vector<17x32xf32>
    %c0_76 = arith.constant 0 : index
    %c0_77 = arith.constant 0 : index
    %c0_78 = arith.constant 0 : index
    %224 = vector.load %arg12[%c0_76, %c0_77, %c0_78] : memref<2x32x64xbf16, #tpu.memory_space<vmem>>, vector<1x32x64xbf16>
    %225 = vector.shape_cast %224 : vector<1x32x64xbf16> to vector<32x64xbf16>
    %c0_79 = arith.constant 0 : index
    %c0_80 = arith.constant 0 : index
    %c0_81 = arith.constant 0 : index
    %226 = vector.load %arg13[%c0_79, %c0_80, %c0_81] : memref<2x1x64xf32, #tpu.memory_space<vmem>>, vector<1x1x64xf32>
    %227 = vector.shape_cast %226 : vector<1x1x64xf32> to vector<1x64xf32>
    %c0_82 = arith.constant 0 : index
    %c0_83 = arith.constant 0 : index
    %c0_84 = arith.constant 0 : index
    %228 = vector.load %arg14[%c0_82, %c0_83, %c0_84] : memref<2x64x32xbf16, #tpu.memory_space<vmem>>, vector<1x64x32xbf16>
    %229 = vector.shape_cast %228 : vector<1x64x32xbf16> to vector<64x32xbf16>
    %c0_85 = arith.constant 0 : index
    %c0_86 = arith.constant 0 : index
    %c0_87 = arith.constant 0 : index
    %230 = vector.load %arg15[%c0_85, %c0_86, %c0_87] : memref<2x1x32xf32, #tpu.memory_space<vmem>>, vector<1x1x32xf32>
    %231 = vector.shape_cast %230 : vector<1x1x32xf32> to vector<1x32xf32>
    %c0_88 = arith.constant 0 : index
    %c0_89 = arith.constant 0 : index
    %c0_90 = arith.constant 0 : index
    %232 = vector.load %arg10[%c0_88, %c0_89, %c0_90] : memref<2x1x32xf32, #tpu.memory_space<vmem>>, vector<1x1x32xf32>
    %233 = vector.shape_cast %232 : vector<1x1x32xf32> to vector<1x32xf32>
    %c0_91 = arith.constant 0 : index
    %c0_92 = arith.constant 0 : index
    %c0_93 = arith.constant 0 : index
    %234 = vector.load %arg11[%c0_91, %c0_92, %c0_93] : memref<2x1x32xf32, #tpu.memory_space<vmem>>, vector<1x1x32xf32>
    %235 = vector.shape_cast %234 : vector<1x1x32xf32> to vector<1x32xf32>
    %cst_94 = arith.constant dense<0.000000e+00> : vector<32xf32>
    %236 = vector.multi_reduction <add>, %138, %cst_94 [0] : vector<17x32xf32> to vector<32xf32>
    %237 = vector.shape_cast %236 : vector<32xf32> to vector<1x32xf32>
    %238 = arith.mulf %138, %138 : vector<17x32xf32>
    %cst_95 = arith.constant dense<0.000000e+00> : vector<32xf32>
    %239 = vector.multi_reduction <add>, %238, %cst_95 [0] : vector<17x32xf32> to vector<32xf32>
    %240 = vector.shape_cast %239 : vector<32xf32> to vector<1x32xf32>
    %cst_96 = arith.constant dense<0.000000e+00> : vector<32xf32>
    %241 = vector.multi_reduction <add>, %223, %cst_96 [0] : vector<17x32xf32> to vector<32xf32>
    %242 = vector.shape_cast %241 : vector<32xf32> to vector<1x32xf32>
    %243 = arith.addf %237, %242 : vector<1x32xf32>
    %244 = arith.mulf %223, %223 : vector<17x32xf32>
    %cst_97 = arith.constant dense<0.000000e+00> : vector<32xf32>
    %245 = vector.multi_reduction <add>, %244, %cst_97 [0] : vector<17x32xf32> to vector<32xf32>
    %246 = vector.shape_cast %245 : vector<32xf32> to vector<1x32xf32>
    %247 = arith.addf %240, %246 : vector<1x32xf32>
    %cst_98 = arith.constant 0.0294117648 : f32
    %248 = vector.broadcast %cst_98 : f32 to vector<1x32xf32>
    %249 = arith.mulf %243, %248 : vector<1x32xf32>
    %cst_99 = arith.constant 0.0294117648 : f32
    %250 = vector.broadcast %cst_99 : f32 to vector<1x32xf32>
    %251 = arith.mulf %247, %250 : vector<1x32xf32>
    %252 = arith.mulf %249, %249 : vector<1x32xf32>
    %253 = arith.subf %251, %252 : vector<1x32xf32>
    %cst_100 = arith.constant 0.000000e+00 : f32
    %254 = vector.broadcast %cst_100 : f32 to vector<1x32xf32>
    %255 = arith.maximumf %253, %254 : vector<1x32xf32>
    %cst_101 = arith.constant 9.99999974E-6 : f32
    %256 = vector.broadcast %cst_101 : f32 to vector<1x32xf32>
    %257 = arith.addf %255, %256 : vector<1x32xf32>
    %258 = math.rsqrt %257 : vector<1x32xf32>
    %259 = arith.mulf %258, %233 : vector<1x32xf32>
    %260 = arith.mulf %249, %259 : vector<1x32xf32>
    %261 = arith.subf %235, %260 : vector<1x32xf32>
    %262 = vector.broadcast %259 : vector<1x32xf32> to vector<17x32xf32>
    %263 = arith.mulf %138, %262 : vector<17x32xf32>
    %264 = vector.broadcast %261 : vector<1x32xf32> to vector<17x32xf32>
    %265 = arith.addf %263, %264 : vector<17x32xf32>
    %266 = arith.truncf %265 : vector<17x32xf32> to vector<17x32xbf16>
    %cst_102 = arith.constant dense<0.000000e+00> : vector<17x64xf32>
    %267 = tpu.matmul %266, %225, %cst_102 {dimension_numbers = #tpu.dot_dimension_numbers<[1], [0], [0], [1], [0, 0, 1, 1], [], []>} : vector<17x32xbf16>, vector<32x64xbf16>, vector<17x64xf32> -> vector<17x64xf32>
    %268 = vector.broadcast %227 : vector<1x64xf32> to vector<17x64xf32>
    %269 = arith.addf %267, %268 : vector<17x64xf32>
    %cst_103 = arith.constant 0.000000e+00 : f32
    %270 = vector.broadcast %cst_103 : f32 to vector<17x64xf32>
    %271 = arith.maximumf %269, %270 : vector<17x64xf32>
    %272 = arith.truncf %271 : vector<17x64xf32> to vector<17x64xbf16>
    %cst_104 = arith.constant dense<0.000000e+00> : vector<17x32xf32>
    %273 = tpu.matmul %272, %229, %cst_104 {dimension_numbers = #tpu.dot_dimension_numbers<[1], [0], [0], [1], [0, 0, 1, 1], [], []>} : vector<17x64xbf16>, vector<64x32xbf16>, vector<17x32xf32> -> vector<17x32xf32>
    %274 = vector.broadcast %231 : vector<1x32xf32> to vector<17x32xf32>
    %275 = arith.addf %273, %274 : vector<17x32xf32>
    %276 = arith.addf %275, %138 : vector<17x32xf32>
    %277 = vector.broadcast %259 : vector<1x32xf32> to vector<17x32xf32>
    %278 = arith.mulf %223, %277 : vector<17x32xf32>
    %279 = vector.broadcast %261 : vector<1x32xf32> to vector<17x32xf32>
    %280 = arith.addf %278, %279 : vector<17x32xf32>
    %281 = arith.truncf %280 : vector<17x32xf32> to vector<17x32xbf16>
    %cst_105 = arith.constant dense<0.000000e+00> : vector<17x64xf32>
    %282 = tpu.matmul %281, %225, %cst_105 {dimension_numbers = #tpu.dot_dimension_numbers<[1], [0], [0], [1], [0, 0, 1, 1], [], []>} : vector<17x32xbf16>, vector<32x64xbf16>, vector<17x64xf32> -> vector<17x64xf32>
    %283 = vector.broadcast %227 : vector<1x64xf32> to vector<17x64xf32>
    %284 = arith.addf %282, %283 : vector<17x64xf32>
    %cst_106 = arith.constant 0.000000e+00 : f32
    %285 = vector.broadcast %cst_106 : f32 to vector<17x64xf32>
    %286 = arith.maximumf %284, %285 : vector<17x64xf32>
    %287 = arith.truncf %286 : vector<17x64xf32> to vector<17x64xbf16>
    %cst_107 = arith.constant dense<0.000000e+00> : vector<17x32xf32>
    %288 = tpu.matmul %287, %229, %cst_107 {dimension_numbers = #tpu.dot_dimension_numbers<[1], [0], [0], [1], [0, 0, 1, 1], [], []>} : vector<17x64xbf16>, vector<64x32xbf16>, vector<17x32xf32> -> vector<17x32xf32>
    %289 = vector.broadcast %231 : vector<1x32xf32> to vector<17x32xf32>
    %290 = arith.addf %288, %289 : vector<17x32xf32>
    %291 = arith.addf %290, %223 : vector<17x32xf32>
    %c1 = arith.constant 1 : index
    %c0_108 = arith.constant 0 : index
    %c0_109 = arith.constant 0 : index
    %292 = vector.load %arg7[%c1, %c0_108, %c0_109] : memref<2x32x96xbf16, #tpu.memory_space<vmem>>, vector<1x32x96xbf16>
    %293 = vector.shape_cast %292 : vector<1x32x96xbf16> to vector<32x96xbf16>
    %c1_110 = arith.constant 1 : index
    %c0_111 = arith.constant 0 : index
    %c0_112 = arith.constant 0 : index
    %294 = vector.load %arg8[%c1_110, %c0_111, %c0_112] : memref<2x32x32xbf16, #tpu.memory_space<vmem>>, vector<1x32x32xbf16>
    %295 = vector.shape_cast %294 : vector<1x32x32xbf16> to vector<32x32xbf16>
    %c1_113 = arith.constant 1 : index
    %c0_114 = arith.constant 0 : index
    %c0_115 = arith.constant 0 : index
    %296 = vector.load %arg9[%c1_113, %c0_114, %c0_115] : memref<2x1x32xf32, #tpu.memory_space<vmem>>, vector<1x1x32xf32>
    %297 = vector.shape_cast %296 : vector<1x1x32xf32> to vector<1x32xf32>
    %c1_116 = arith.constant 1 : index
    %c0_117 = arith.constant 0 : index
    %c0_118 = arith.constant 0 : index
    %298 = vector.load %arg5[%c1_116, %c0_117, %c0_118] : memref<2x1x32xf32, #tpu.memory_space<vmem>>, vector<1x1x32xf32>
    %299 = vector.shape_cast %298 : vector<1x1x32xf32> to vector<1x32xf32>
    %c1_119 = arith.constant 1 : index
    %c0_120 = arith.constant 0 : index
    %c0_121 = arith.constant 0 : index
    %300 = vector.load %arg6[%c1_119, %c0_120, %c0_121] : memref<2x1x32xf32, #tpu.memory_space<vmem>>, vector<1x1x32xf32>
    %301 = vector.shape_cast %300 : vector<1x1x32xf32> to vector<1x32xf32>
    %cst_122 = arith.constant dense<0.000000e+00> : vector<32xf32>
    %302 = vector.multi_reduction <add>, %276, %cst_122 [0] : vector<17x32xf32> to vector<32xf32>
    %303 = vector.shape_cast %302 : vector<32xf32> to vector<1x32xf32>
    %304 = arith.mulf %276, %276 : vector<17x32xf32>
    %cst_123 = arith.constant dense<0.000000e+00> : vector<32xf32>
    %305 = vector.multi_reduction <add>, %304, %cst_123 [0] : vector<17x32xf32> to vector<32xf32>
    %306 = vector.shape_cast %305 : vector<32xf32> to vector<1x32xf32>
    %cst_124 = arith.constant dense<0.000000e+00> : vector<32xf32>
    %307 = vector.multi_reduction <add>, %291, %cst_124 [0] : vector<17x32xf32> to vector<32xf32>
    %308 = vector.shape_cast %307 : vector<32xf32> to vector<1x32xf32>
    %309 = arith.addf %303, %308 : vector<1x32xf32>
    %310 = arith.mulf %291, %291 : vector<17x32xf32>
    %cst_125 = arith.constant dense<0.000000e+00> : vector<32xf32>
    %311 = vector.multi_reduction <add>, %310, %cst_125 [0] : vector<17x32xf32> to vector<32xf32>
    %312 = vector.shape_cast %311 : vector<32xf32> to vector<1x32xf32>
    %313 = arith.addf %306, %312 : vector<1x32xf32>
    %cst_126 = arith.constant 0.0294117648 : f32
    %314 = vector.broadcast %cst_126 : f32 to vector<1x32xf32>
    %315 = arith.mulf %309, %314 : vector<1x32xf32>
    %cst_127 = arith.constant 0.0294117648 : f32
    %316 = vector.broadcast %cst_127 : f32 to vector<1x32xf32>
    %317 = arith.mulf %313, %316 : vector<1x32xf32>
    %318 = arith.mulf %315, %315 : vector<1x32xf32>
    %319 = arith.subf %317, %318 : vector<1x32xf32>
    %cst_128 = arith.constant 0.000000e+00 : f32
    %320 = vector.broadcast %cst_128 : f32 to vector<1x32xf32>
    %321 = arith.maximumf %319, %320 : vector<1x32xf32>
    %cst_129 = arith.constant 9.99999974E-6 : f32
    %322 = vector.broadcast %cst_129 : f32 to vector<1x32xf32>
    %323 = arith.addf %321, %322 : vector<1x32xf32>
    %324 = math.rsqrt %323 : vector<1x32xf32>
    %325 = arith.mulf %324, %299 : vector<1x32xf32>
    %326 = arith.mulf %315, %325 : vector<1x32xf32>
    %327 = arith.subf %301, %326 : vector<1x32xf32>
    %328 = vector.broadcast %325 : vector<1x32xf32> to vector<17x32xf32>
    %329 = arith.mulf %276, %328 : vector<17x32xf32>
    %330 = vector.broadcast %327 : vector<1x32xf32> to vector<17x32xf32>
    %331 = arith.addf %329, %330 : vector<17x32xf32>
    %332 = arith.truncf %331 : vector<17x32xf32> to vector<17x32xbf16>
    %cst_130 = arith.constant dense<0.000000e+00> : vector<17x96xf32>
    %333 = tpu.matmul %332, %293, %cst_130 {dimension_numbers = #tpu.dot_dimension_numbers<[1], [0], [0], [1], [0, 0, 1, 1], [], []>} : vector<17x32xbf16>, vector<32x96xbf16>, vector<17x96xf32> -> vector<17x96xf32>
    %334 = arith.truncf %333 : vector<17x96xf32> to vector<17x96xbf16>
    %335 = vector.extract_strided_slice %334 {offsets = [0, 0], sizes = [17, 8], strides = [1, 1]} : vector<17x96xbf16> to vector<17x8xbf16>
    %336 = vector.extract_strided_slice %334 {offsets = [0, 32], sizes = [17, 8], strides = [1, 1]} : vector<17x96xbf16> to vector<17x8xbf16>
    %337 = vector.extract_strided_slice %334 {offsets = [0, 64], sizes = [17, 8], strides = [1, 1]} : vector<17x96xbf16> to vector<17x8xbf16>
    %cst_131 = arith.constant dense<0.000000e+00> : vector<17x17xf32>
    %338 = tpu.matmul %335, %336, %cst_131 {dimension_numbers = #tpu.dot_dimension_numbers<[1], [1], [0], [0], [0, 0, 1, 0], [], []>} : vector<17x8xbf16>, vector<17x8xbf16>, vector<17x17xf32> -> vector<17x17xf32>
    %cst_132 = arith.constant 0.353553385 : f32
    %339 = vector.broadcast %cst_132 : f32 to vector<17x17xf32>
    %340 = arith.mulf %338, %339 : vector<17x17xf32>
    %cst_133 = arith.constant dense<0xFF800000> : vector<17xf32>
    %341 = vector.multi_reduction <maximumf>, %340, %cst_133 [1] : vector<17x17xf32> to vector<17xf32>
    %342 = vector.shape_cast %341 : vector<17xf32> to vector<17x1xf32>
    %343 = vector.broadcast %342 : vector<17x1xf32> to vector<17x17xf32>
    %344 = arith.subf %340, %343 : vector<17x17xf32>
    %345 = math.exp %344 : vector<17x17xf32>
    %cst_134 = arith.constant dense<0.000000e+00> : vector<17xf32>
    %346 = vector.multi_reduction <add>, %345, %cst_134 [1] : vector<17x17xf32> to vector<17xf32>
    %347 = vector.shape_cast %346 : vector<17xf32> to vector<17x1xf32>
    %348 = tpu.reciprocal %347 {approx = true} : vector<17x1xf32> -> vector<17x1xf32>
    %349 = vector.broadcast %348 : vector<17x1xf32> to vector<17x17xf32>
    %350 = arith.mulf %345, %349 : vector<17x17xf32>
    %351 = arith.truncf %350 : vector<17x17xf32> to vector<17x17xbf16>
    %cst_135 = arith.constant dense<0.000000e+00> : vector<17x8xf32>
    %352 = tpu.matmul %351, %337, %cst_135 {dimension_numbers = #tpu.dot_dimension_numbers<[1], [0], [0], [1], [0, 0, 1, 1], [], []>} : vector<17x17xbf16>, vector<17x8xbf16>, vector<17x8xf32> -> vector<17x8xf32>
    %353 = vector.extract_strided_slice %334 {offsets = [0, 8], sizes = [17, 8], strides = [1, 1]} : vector<17x96xbf16> to vector<17x8xbf16>
    %354 = vector.extract_strided_slice %334 {offsets = [0, 40], sizes = [17, 8], strides = [1, 1]} : vector<17x96xbf16> to vector<17x8xbf16>
    %355 = vector.extract_strided_slice %334 {offsets = [0, 72], sizes = [17, 8], strides = [1, 1]} : vector<17x96xbf16> to vector<17x8xbf16>
    %cst_136 = arith.constant dense<0.000000e+00> : vector<17x17xf32>
    %356 = tpu.matmul %353, %354, %cst_136 {dimension_numbers = #tpu.dot_dimension_numbers<[1], [1], [0], [0], [0, 0, 1, 0], [], []>} : vector<17x8xbf16>, vector<17x8xbf16>, vector<17x17xf32> -> vector<17x17xf32>
    %cst_137 = arith.constant 0.353553385 : f32
    %357 = vector.broadcast %cst_137 : f32 to vector<17x17xf32>
    %358 = arith.mulf %356, %357 : vector<17x17xf32>
    %cst_138 = arith.constant dense<0xFF800000> : vector<17xf32>
    %359 = vector.multi_reduction <maximumf>, %358, %cst_138 [1] : vector<17x17xf32> to vector<17xf32>
    %360 = vector.shape_cast %359 : vector<17xf32> to vector<17x1xf32>
    %361 = vector.broadcast %360 : vector<17x1xf32> to vector<17x17xf32>
    %362 = arith.subf %358, %361 : vector<17x17xf32>
    %363 = math.exp %362 : vector<17x17xf32>
    %cst_139 = arith.constant dense<0.000000e+00> : vector<17xf32>
    %364 = vector.multi_reduction <add>, %363, %cst_139 [1] : vector<17x17xf32> to vector<17xf32>
    %365 = vector.shape_cast %364 : vector<17xf32> to vector<17x1xf32>
    %366 = tpu.reciprocal %365 {approx = true} : vector<17x1xf32> -> vector<17x1xf32>
    %367 = vector.broadcast %366 : vector<17x1xf32> to vector<17x17xf32>
    %368 = arith.mulf %363, %367 : vector<17x17xf32>
    %369 = arith.truncf %368 : vector<17x17xf32> to vector<17x17xbf16>
    %cst_140 = arith.constant dense<0.000000e+00> : vector<17x8xf32>
    %370 = tpu.matmul %369, %355, %cst_140 {dimension_numbers = #tpu.dot_dimension_numbers<[1], [0], [0], [1], [0, 0, 1, 1], [], []>} : vector<17x17xbf16>, vector<17x8xbf16>, vector<17x8xf32> -> vector<17x8xf32>
    %371 = vector.extract_strided_slice %334 {offsets = [0, 16], sizes = [17, 8], strides = [1, 1]} : vector<17x96xbf16> to vector<17x8xbf16>
    %372 = vector.extract_strided_slice %334 {offsets = [0, 48], sizes = [17, 8], strides = [1, 1]} : vector<17x96xbf16> to vector<17x8xbf16>
    %373 = vector.extract_strided_slice %334 {offsets = [0, 80], sizes = [17, 8], strides = [1, 1]} : vector<17x96xbf16> to vector<17x8xbf16>
    %cst_141 = arith.constant dense<0.000000e+00> : vector<17x17xf32>
    %374 = tpu.matmul %371, %372, %cst_141 {dimension_numbers = #tpu.dot_dimension_numbers<[1], [1], [0], [0], [0, 0, 1, 0], [], []>} : vector<17x8xbf16>, vector<17x8xbf16>, vector<17x17xf32> -> vector<17x17xf32>
    %cst_142 = arith.constant 0.353553385 : f32
    %375 = vector.broadcast %cst_142 : f32 to vector<17x17xf32>
    %376 = arith.mulf %374, %375 : vector<17x17xf32>
    %cst_143 = arith.constant dense<0xFF800000> : vector<17xf32>
    %377 = vector.multi_reduction <maximumf>, %376, %cst_143 [1] : vector<17x17xf32> to vector<17xf32>
    %378 = vector.shape_cast %377 : vector<17xf32> to vector<17x1xf32>
    %379 = vector.broadcast %378 : vector<17x1xf32> to vector<17x17xf32>
    %380 = arith.subf %376, %379 : vector<17x17xf32>
    %381 = math.exp %380 : vector<17x17xf32>
    %cst_144 = arith.constant dense<0.000000e+00> : vector<17xf32>
    %382 = vector.multi_reduction <add>, %381, %cst_144 [1] : vector<17x17xf32> to vector<17xf32>
    %383 = vector.shape_cast %382 : vector<17xf32> to vector<17x1xf32>
    %384 = tpu.reciprocal %383 {approx = true} : vector<17x1xf32> -> vector<17x1xf32>
    %385 = vector.broadcast %384 : vector<17x1xf32> to vector<17x17xf32>
    %386 = arith.mulf %381, %385 : vector<17x17xf32>
    %387 = arith.truncf %386 : vector<17x17xf32> to vector<17x17xbf16>
    %cst_145 = arith.constant dense<0.000000e+00> : vector<17x8xf32>
    %388 = tpu.matmul %387, %373, %cst_145 {dimension_numbers = #tpu.dot_dimension_numbers<[1], [0], [0], [1], [0, 0, 1, 1], [], []>} : vector<17x17xbf16>, vector<17x8xbf16>, vector<17x8xf32> -> vector<17x8xf32>
    %389 = vector.extract_strided_slice %334 {offsets = [0, 24], sizes = [17, 8], strides = [1, 1]} : vector<17x96xbf16> to vector<17x8xbf16>
    %390 = vector.extract_strided_slice %334 {offsets = [0, 56], sizes = [17, 8], strides = [1, 1]} : vector<17x96xbf16> to vector<17x8xbf16>
    %391 = vector.extract_strided_slice %334 {offsets = [0, 88], sizes = [17, 8], strides = [1, 1]} : vector<17x96xbf16> to vector<17x8xbf16>
    %cst_146 = arith.constant dense<0.000000e+00> : vector<17x17xf32>
    %392 = tpu.matmul %389, %390, %cst_146 {dimension_numbers = #tpu.dot_dimension_numbers<[1], [1], [0], [0], [0, 0, 1, 0], [], []>} : vector<17x8xbf16>, vector<17x8xbf16>, vector<17x17xf32> -> vector<17x17xf32>
    %cst_147 = arith.constant 0.353553385 : f32
    %393 = vector.broadcast %cst_147 : f32 to vector<17x17xf32>
    %394 = arith.mulf %392, %393 : vector<17x17xf32>
    %cst_148 = arith.constant dense<0xFF800000> : vector<17xf32>
    %395 = vector.multi_reduction <maximumf>, %394, %cst_148 [1] : vector<17x17xf32> to vector<17xf32>
    %396 = vector.shape_cast %395 : vector<17xf32> to vector<17x1xf32>
    %397 = vector.broadcast %396 : vector<17x1xf32> to vector<17x17xf32>
    %398 = arith.subf %394, %397 : vector<17x17xf32>
    %399 = math.exp %398 : vector<17x17xf32>
    %cst_149 = arith.constant dense<0.000000e+00> : vector<17xf32>
    %400 = vector.multi_reduction <add>, %399, %cst_149 [1] : vector<17x17xf32> to vector<17xf32>
    %401 = vector.shape_cast %400 : vector<17xf32> to vector<17x1xf32>
    %402 = tpu.reciprocal %401 {approx = true} : vector<17x1xf32> -> vector<17x1xf32>
    %403 = vector.broadcast %402 : vector<17x1xf32> to vector<17x17xf32>
    %404 = arith.mulf %399, %403 : vector<17x17xf32>
    %405 = arith.truncf %404 : vector<17x17xf32> to vector<17x17xbf16>
    %cst_150 = arith.constant dense<0.000000e+00> : vector<17x8xf32>
    %406 = tpu.matmul %405, %391, %cst_150 {dimension_numbers = #tpu.dot_dimension_numbers<[1], [0], [0], [1], [0, 0, 1, 1], [], []>} : vector<17x17xbf16>, vector<17x8xbf16>, vector<17x8xf32> -> vector<17x8xf32>
    %407 = tpu.concatenate %352, %370, %388, %406 in 1 : vector<17x8xf32>, vector<17x8xf32>, vector<17x8xf32>, vector<17x8xf32> -> vector<17x32xf32>
    %408 = arith.truncf %407 : vector<17x32xf32> to vector<17x32xbf16>
    %cst_151 = arith.constant dense<0.000000e+00> : vector<17x32xf32>
    %409 = tpu.matmul %408, %295, %cst_151 {dimension_numbers = #tpu.dot_dimension_numbers<[1], [0], [0], [1], [0, 0, 1, 1], [], []>} : vector<17x32xbf16>, vector<32x32xbf16>, vector<17x32xf32> -> vector<17x32xf32>
    %410 = vector.broadcast %297 : vector<1x32xf32> to vector<17x32xf32>
    %411 = arith.addf %409, %410 : vector<17x32xf32>
    %412 = arith.addf %411, %276 : vector<17x32xf32>
    %413 = vector.broadcast %325 : vector<1x32xf32> to vector<17x32xf32>
    %414 = arith.mulf %291, %413 : vector<17x32xf32>
    %415 = vector.broadcast %327 : vector<1x32xf32> to vector<17x32xf32>
    %416 = arith.addf %414, %415 : vector<17x32xf32>
    %417 = arith.truncf %416 : vector<17x32xf32> to vector<17x32xbf16>
    %cst_152 = arith.constant dense<0.000000e+00> : vector<17x96xf32>
    %418 = tpu.matmul %417, %293, %cst_152 {dimension_numbers = #tpu.dot_dimension_numbers<[1], [0], [0], [1], [0, 0, 1, 1], [], []>} : vector<17x32xbf16>, vector<32x96xbf16>, vector<17x96xf32> -> vector<17x96xf32>
    %419 = arith.truncf %418 : vector<17x96xf32> to vector<17x96xbf16>
    %420 = vector.extract_strided_slice %419 {offsets = [0, 0], sizes = [17, 8], strides = [1, 1]} : vector<17x96xbf16> to vector<17x8xbf16>
    %421 = vector.extract_strided_slice %419 {offsets = [0, 32], sizes = [17, 8], strides = [1, 1]} : vector<17x96xbf16> to vector<17x8xbf16>
    %422 = vector.extract_strided_slice %419 {offsets = [0, 64], sizes = [17, 8], strides = [1, 1]} : vector<17x96xbf16> to vector<17x8xbf16>
    %cst_153 = arith.constant dense<0.000000e+00> : vector<17x17xf32>
    %423 = tpu.matmul %420, %421, %cst_153 {dimension_numbers = #tpu.dot_dimension_numbers<[1], [1], [0], [0], [0, 0, 1, 0], [], []>} : vector<17x8xbf16>, vector<17x8xbf16>, vector<17x17xf32> -> vector<17x17xf32>
    %cst_154 = arith.constant 0.353553385 : f32
    %424 = vector.broadcast %cst_154 : f32 to vector<17x17xf32>
    %425 = arith.mulf %423, %424 : vector<17x17xf32>
    %cst_155 = arith.constant dense<0xFF800000> : vector<17xf32>
    %426 = vector.multi_reduction <maximumf>, %425, %cst_155 [1] : vector<17x17xf32> to vector<17xf32>
    %427 = vector.shape_cast %426 : vector<17xf32> to vector<17x1xf32>
    %428 = vector.broadcast %427 : vector<17x1xf32> to vector<17x17xf32>
    %429 = arith.subf %425, %428 : vector<17x17xf32>
    %430 = math.exp %429 : vector<17x17xf32>
    %cst_156 = arith.constant dense<0.000000e+00> : vector<17xf32>
    %431 = vector.multi_reduction <add>, %430, %cst_156 [1] : vector<17x17xf32> to vector<17xf32>
    %432 = vector.shape_cast %431 : vector<17xf32> to vector<17x1xf32>
    %433 = tpu.reciprocal %432 {approx = true} : vector<17x1xf32> -> vector<17x1xf32>
    %434 = vector.broadcast %433 : vector<17x1xf32> to vector<17x17xf32>
    %435 = arith.mulf %430, %434 : vector<17x17xf32>
    %436 = arith.truncf %435 : vector<17x17xf32> to vector<17x17xbf16>
    %cst_157 = arith.constant dense<0.000000e+00> : vector<17x8xf32>
    %437 = tpu.matmul %436, %422, %cst_157 {dimension_numbers = #tpu.dot_dimension_numbers<[1], [0], [0], [1], [0, 0, 1, 1], [], []>} : vector<17x17xbf16>, vector<17x8xbf16>, vector<17x8xf32> -> vector<17x8xf32>
    %438 = vector.extract_strided_slice %419 {offsets = [0, 8], sizes = [17, 8], strides = [1, 1]} : vector<17x96xbf16> to vector<17x8xbf16>
    %439 = vector.extract_strided_slice %419 {offsets = [0, 40], sizes = [17, 8], strides = [1, 1]} : vector<17x96xbf16> to vector<17x8xbf16>
    %440 = vector.extract_strided_slice %419 {offsets = [0, 72], sizes = [17, 8], strides = [1, 1]} : vector<17x96xbf16> to vector<17x8xbf16>
    %cst_158 = arith.constant dense<0.000000e+00> : vector<17x17xf32>
    %441 = tpu.matmul %438, %439, %cst_158 {dimension_numbers = #tpu.dot_dimension_numbers<[1], [1], [0], [0], [0, 0, 1, 0], [], []>} : vector<17x8xbf16>, vector<17x8xbf16>, vector<17x17xf32> -> vector<17x17xf32>
    %cst_159 = arith.constant 0.353553385 : f32
    %442 = vector.broadcast %cst_159 : f32 to vector<17x17xf32>
    %443 = arith.mulf %441, %442 : vector<17x17xf32>
    %cst_160 = arith.constant dense<0xFF800000> : vector<17xf32>
    %444 = vector.multi_reduction <maximumf>, %443, %cst_160 [1] : vector<17x17xf32> to vector<17xf32>
    %445 = vector.shape_cast %444 : vector<17xf32> to vector<17x1xf32>
    %446 = vector.broadcast %445 : vector<17x1xf32> to vector<17x17xf32>
    %447 = arith.subf %443, %446 : vector<17x17xf32>
    %448 = math.exp %447 : vector<17x17xf32>
    %cst_161 = arith.constant dense<0.000000e+00> : vector<17xf32>
    %449 = vector.multi_reduction <add>, %448, %cst_161 [1] : vector<17x17xf32> to vector<17xf32>
    %450 = vector.shape_cast %449 : vector<17xf32> to vector<17x1xf32>
    %451 = tpu.reciprocal %450 {approx = true} : vector<17x1xf32> -> vector<17x1xf32>
    %452 = vector.broadcast %451 : vector<17x1xf32> to vector<17x17xf32>
    %453 = arith.mulf %448, %452 : vector<17x17xf32>
    %454 = arith.truncf %453 : vector<17x17xf32> to vector<17x17xbf16>
    %cst_162 = arith.constant dense<0.000000e+00> : vector<17x8xf32>
    %455 = tpu.matmul %454, %440, %cst_162 {dimension_numbers = #tpu.dot_dimension_numbers<[1], [0], [0], [1], [0, 0, 1, 1], [], []>} : vector<17x17xbf16>, vector<17x8xbf16>, vector<17x8xf32> -> vector<17x8xf32>
    %456 = vector.extract_strided_slice %419 {offsets = [0, 16], sizes = [17, 8], strides = [1, 1]} : vector<17x96xbf16> to vector<17x8xbf16>
    %457 = vector.extract_strided_slice %419 {offsets = [0, 48], sizes = [17, 8], strides = [1, 1]} : vector<17x96xbf16> to vector<17x8xbf16>
    %458 = vector.extract_strided_slice %419 {offsets = [0, 80], sizes = [17, 8], strides = [1, 1]} : vector<17x96xbf16> to vector<17x8xbf16>
    %cst_163 = arith.constant dense<0.000000e+00> : vector<17x17xf32>
    %459 = tpu.matmul %456, %457, %cst_163 {dimension_numbers = #tpu.dot_dimension_numbers<[1], [1], [0], [0], [0, 0, 1, 0], [], []>} : vector<17x8xbf16>, vector<17x8xbf16>, vector<17x17xf32> -> vector<17x17xf32>
    %cst_164 = arith.constant 0.353553385 : f32
    %460 = vector.broadcast %cst_164 : f32 to vector<17x17xf32>
    %461 = arith.mulf %459, %460 : vector<17x17xf32>
    %cst_165 = arith.constant dense<0xFF800000> : vector<17xf32>
    %462 = vector.multi_reduction <maximumf>, %461, %cst_165 [1] : vector<17x17xf32> to vector<17xf32>
    %463 = vector.shape_cast %462 : vector<17xf32> to vector<17x1xf32>
    %464 = vector.broadcast %463 : vector<17x1xf32> to vector<17x17xf32>
    %465 = arith.subf %461, %464 : vector<17x17xf32>
    %466 = math.exp %465 : vector<17x17xf32>
    %cst_166 = arith.constant dense<0.000000e+00> : vector<17xf32>
    %467 = vector.multi_reduction <add>, %466, %cst_166 [1] : vector<17x17xf32> to vector<17xf32>
    %468 = vector.shape_cast %467 : vector<17xf32> to vector<17x1xf32>
    %469 = tpu.reciprocal %468 {approx = true} : vector<17x1xf32> -> vector<17x1xf32>
    %470 = vector.broadcast %469 : vector<17x1xf32> to vector<17x17xf32>
    %471 = arith.mulf %466, %470 : vector<17x17xf32>
    %472 = arith.truncf %471 : vector<17x17xf32> to vector<17x17xbf16>
    %cst_167 = arith.constant dense<0.000000e+00> : vector<17x8xf32>
    %473 = tpu.matmul %472, %458, %cst_167 {dimension_numbers = #tpu.dot_dimension_numbers<[1], [0], [0], [1], [0, 0, 1, 1], [], []>} : vector<17x17xbf16>, vector<17x8xbf16>, vector<17x8xf32> -> vector<17x8xf32>
    %474 = vector.extract_strided_slice %419 {offsets = [0, 24], sizes = [17, 8], strides = [1, 1]} : vector<17x96xbf16> to vector<17x8xbf16>
    %475 = vector.extract_strided_slice %419 {offsets = [0, 56], sizes = [17, 8], strides = [1, 1]} : vector<17x96xbf16> to vector<17x8xbf16>
    %476 = vector.extract_strided_slice %419 {offsets = [0, 88], sizes = [17, 8], strides = [1, 1]} : vector<17x96xbf16> to vector<17x8xbf16>
    %cst_168 = arith.constant dense<0.000000e+00> : vector<17x17xf32>
    %477 = tpu.matmul %474, %475, %cst_168 {dimension_numbers = #tpu.dot_dimension_numbers<[1], [1], [0], [0], [0, 0, 1, 0], [], []>} : vector<17x8xbf16>, vector<17x8xbf16>, vector<17x17xf32> -> vector<17x17xf32>
    %cst_169 = arith.constant 0.353553385 : f32
    %478 = vector.broadcast %cst_169 : f32 to vector<17x17xf32>
    %479 = arith.mulf %477, %478 : vector<17x17xf32>
    %cst_170 = arith.constant dense<0xFF800000> : vector<17xf32>
    %480 = vector.multi_reduction <maximumf>, %479, %cst_170 [1] : vector<17x17xf32> to vector<17xf32>
    %481 = vector.shape_cast %480 : vector<17xf32> to vector<17x1xf32>
    %482 = vector.broadcast %481 : vector<17x1xf32> to vector<17x17xf32>
    %483 = arith.subf %479, %482 : vector<17x17xf32>
    %484 = math.exp %483 : vector<17x17xf32>
    %cst_171 = arith.constant dense<0.000000e+00> : vector<17xf32>
    %485 = vector.multi_reduction <add>, %484, %cst_171 [1] : vector<17x17xf32> to vector<17xf32>
    %486 = vector.shape_cast %485 : vector<17xf32> to vector<17x1xf32>
    %487 = tpu.reciprocal %486 {approx = true} : vector<17x1xf32> -> vector<17x1xf32>
    %488 = vector.broadcast %487 : vector<17x1xf32> to vector<17x17xf32>
    %489 = arith.mulf %484, %488 : vector<17x17xf32>
    %490 = arith.truncf %489 : vector<17x17xf32> to vector<17x17xbf16>
    %cst_172 = arith.constant dense<0.000000e+00> : vector<17x8xf32>
    %491 = tpu.matmul %490, %476, %cst_172 {dimension_numbers = #tpu.dot_dimension_numbers<[1], [0], [0], [1], [0, 0, 1, 1], [], []>} : vector<17x17xbf16>, vector<17x8xbf16>, vector<17x8xf32> -> vector<17x8xf32>
    %492 = tpu.concatenate %437, %455, %473, %491 in 1 : vector<17x8xf32>, vector<17x8xf32>, vector<17x8xf32>, vector<17x8xf32> -> vector<17x32xf32>
    %493 = arith.truncf %492 : vector<17x32xf32> to vector<17x32xbf16>
    %cst_173 = arith.constant dense<0.000000e+00> : vector<17x32xf32>
    %494 = tpu.matmul %493, %295, %cst_173 {dimension_numbers = #tpu.dot_dimension_numbers<[1], [0], [0], [1], [0, 0, 1, 1], [], []>} : vector<17x32xbf16>, vector<32x32xbf16>, vector<17x32xf32> -> vector<17x32xf32>
    %495 = vector.broadcast %297 : vector<1x32xf32> to vector<17x32xf32>
    %496 = arith.addf %494, %495 : vector<17x32xf32>
    %497 = arith.addf %496, %291 : vector<17x32xf32>
    %c1_174 = arith.constant 1 : index
    %c0_175 = arith.constant 0 : index
    %c0_176 = arith.constant 0 : index
    %498 = vector.load %arg12[%c1_174, %c0_175, %c0_176] : memref<2x32x64xbf16, #tpu.memory_space<vmem>>, vector<1x32x64xbf16>
    %499 = vector.shape_cast %498 : vector<1x32x64xbf16> to vector<32x64xbf16>
    %c1_177 = arith.constant 1 : index
    %c0_178 = arith.constant 0 : index
    %c0_179 = arith.constant 0 : index
    %500 = vector.load %arg13[%c1_177, %c0_178, %c0_179] : memref<2x1x64xf32, #tpu.memory_space<vmem>>, vector<1x1x64xf32>
    %501 = vector.shape_cast %500 : vector<1x1x64xf32> to vector<1x64xf32>
    %c1_180 = arith.constant 1 : index
    %c0_181 = arith.constant 0 : index
    %c0_182 = arith.constant 0 : index
    %502 = vector.load %arg14[%c1_180, %c0_181, %c0_182] : memref<2x64x32xbf16, #tpu.memory_space<vmem>>, vector<1x64x32xbf16>
    %503 = vector.shape_cast %502 : vector<1x64x32xbf16> to vector<64x32xbf16>
    %c1_183 = arith.constant 1 : index
    %c0_184 = arith.constant 0 : index
    %c0_185 = arith.constant 0 : index
    %504 = vector.load %arg15[%c1_183, %c0_184, %c0_185] : memref<2x1x32xf32, #tpu.memory_space<vmem>>, vector<1x1x32xf32>
    %505 = vector.shape_cast %504 : vector<1x1x32xf32> to vector<1x32xf32>
    %c1_186 = arith.constant 1 : index
    %c0_187 = arith.constant 0 : index
    %c0_188 = arith.constant 0 : index
    %506 = vector.load %arg10[%c1_186, %c0_187, %c0_188] : memref<2x1x32xf32, #tpu.memory_space<vmem>>, vector<1x1x32xf32>
    %507 = vector.shape_cast %506 : vector<1x1x32xf32> to vector<1x32xf32>
    %c1_189 = arith.constant 1 : index
    %c0_190 = arith.constant 0 : index
    %c0_191 = arith.constant 0 : index
    %508 = vector.load %arg11[%c1_189, %c0_190, %c0_191] : memref<2x1x32xf32, #tpu.memory_space<vmem>>, vector<1x1x32xf32>
    %509 = vector.shape_cast %508 : vector<1x1x32xf32> to vector<1x32xf32>
    %cst_192 = arith.constant dense<0.000000e+00> : vector<32xf32>
    %510 = vector.multi_reduction <add>, %412, %cst_192 [0] : vector<17x32xf32> to vector<32xf32>
    %511 = vector.shape_cast %510 : vector<32xf32> to vector<1x32xf32>
    %512 = arith.mulf %412, %412 : vector<17x32xf32>
    %cst_193 = arith.constant dense<0.000000e+00> : vector<32xf32>
    %513 = vector.multi_reduction <add>, %512, %cst_193 [0] : vector<17x32xf32> to vector<32xf32>
    %514 = vector.shape_cast %513 : vector<32xf32> to vector<1x32xf32>
    %cst_194 = arith.constant dense<0.000000e+00> : vector<32xf32>
    %515 = vector.multi_reduction <add>, %497, %cst_194 [0] : vector<17x32xf32> to vector<32xf32>
    %516 = vector.shape_cast %515 : vector<32xf32> to vector<1x32xf32>
    %517 = arith.addf %511, %516 : vector<1x32xf32>
    %518 = arith.mulf %497, %497 : vector<17x32xf32>
    %cst_195 = arith.constant dense<0.000000e+00> : vector<32xf32>
    %519 = vector.multi_reduction <add>, %518, %cst_195 [0] : vector<17x32xf32> to vector<32xf32>
    %520 = vector.shape_cast %519 : vector<32xf32> to vector<1x32xf32>
    %521 = arith.addf %514, %520 : vector<1x32xf32>
    %cst_196 = arith.constant 0.0294117648 : f32
    %522 = vector.broadcast %cst_196 : f32 to vector<1x32xf32>
    %523 = arith.mulf %517, %522 : vector<1x32xf32>
    %cst_197 = arith.constant 0.0294117648 : f32
    %524 = vector.broadcast %cst_197 : f32 to vector<1x32xf32>
    %525 = arith.mulf %521, %524 : vector<1x32xf32>
    %526 = arith.mulf %523, %523 : vector<1x32xf32>
    %527 = arith.subf %525, %526 : vector<1x32xf32>
    %cst_198 = arith.constant 0.000000e+00 : f32
    %528 = vector.broadcast %cst_198 : f32 to vector<1x32xf32>
    %529 = arith.maximumf %527, %528 : vector<1x32xf32>
    %cst_199 = arith.constant 9.99999974E-6 : f32
    %530 = vector.broadcast %cst_199 : f32 to vector<1x32xf32>
    %531 = arith.addf %529, %530 : vector<1x32xf32>
    %532 = math.rsqrt %531 : vector<1x32xf32>
    %533 = arith.mulf %532, %507 : vector<1x32xf32>
    %534 = arith.mulf %523, %533 : vector<1x32xf32>
    %535 = arith.subf %509, %534 : vector<1x32xf32>
    %536 = vector.broadcast %533 : vector<1x32xf32> to vector<17x32xf32>
    %537 = arith.mulf %412, %536 : vector<17x32xf32>
    %538 = vector.broadcast %535 : vector<1x32xf32> to vector<17x32xf32>
    %539 = arith.addf %537, %538 : vector<17x32xf32>
    %540 = arith.truncf %539 : vector<17x32xf32> to vector<17x32xbf16>
    %cst_200 = arith.constant dense<0.000000e+00> : vector<17x64xf32>
    %541 = tpu.matmul %540, %499, %cst_200 {dimension_numbers = #tpu.dot_dimension_numbers<[1], [0], [0], [1], [0, 0, 1, 1], [], []>} : vector<17x32xbf16>, vector<32x64xbf16>, vector<17x64xf32> -> vector<17x64xf32>
    %542 = vector.broadcast %501 : vector<1x64xf32> to vector<17x64xf32>
    %543 = arith.addf %541, %542 : vector<17x64xf32>
    %cst_201 = arith.constant 0.000000e+00 : f32
    %544 = vector.broadcast %cst_201 : f32 to vector<17x64xf32>
    %545 = arith.maximumf %543, %544 : vector<17x64xf32>
    %546 = arith.truncf %545 : vector<17x64xf32> to vector<17x64xbf16>
    %cst_202 = arith.constant dense<0.000000e+00> : vector<17x32xf32>
    %547 = tpu.matmul %546, %503, %cst_202 {dimension_numbers = #tpu.dot_dimension_numbers<[1], [0], [0], [1], [0, 0, 1, 1], [], []>} : vector<17x64xbf16>, vector<64x32xbf16>, vector<17x32xf32> -> vector<17x32xf32>
    %548 = vector.broadcast %505 : vector<1x32xf32> to vector<17x32xf32>
    %549 = arith.addf %547, %548 : vector<17x32xf32>
    %550 = arith.addf %549, %412 : vector<17x32xf32>
    %551 = vector.broadcast %533 : vector<1x32xf32> to vector<17x32xf32>
    %552 = arith.mulf %497, %551 : vector<17x32xf32>
    %553 = vector.broadcast %535 : vector<1x32xf32> to vector<17x32xf32>
    %554 = arith.addf %552, %553 : vector<17x32xf32>
    %555 = arith.truncf %554 : vector<17x32xf32> to vector<17x32xbf16>
    %cst_203 = arith.constant dense<0.000000e+00> : vector<17x64xf32>
    %556 = tpu.matmul %555, %499, %cst_203 {dimension_numbers = #tpu.dot_dimension_numbers<[1], [0], [0], [1], [0, 0, 1, 1], [], []>} : vector<17x32xbf16>, vector<32x64xbf16>, vector<17x64xf32> -> vector<17x64xf32>
    %557 = vector.broadcast %501 : vector<1x64xf32> to vector<17x64xf32>
    %558 = arith.addf %556, %557 : vector<17x64xf32>
    %cst_204 = arith.constant 0.000000e+00 : f32
    %559 = vector.broadcast %cst_204 : f32 to vector<17x64xf32>
    %560 = arith.maximumf %558, %559 : vector<17x64xf32>
    %561 = arith.truncf %560 : vector<17x64xf32> to vector<17x64xbf16>
    %cst_205 = arith.constant dense<0.000000e+00> : vector<17x32xf32>
    %562 = tpu.matmul %561, %503, %cst_205 {dimension_numbers = #tpu.dot_dimension_numbers<[1], [0], [0], [1], [0, 0, 1, 1], [], []>} : vector<17x64xbf16>, vector<64x32xbf16>, vector<17x32xf32> -> vector<17x32xf32>
    %563 = vector.broadcast %505 : vector<1x32xf32> to vector<17x32xf32>
    %564 = arith.addf %562, %563 : vector<17x32xf32>
    %565 = arith.addf %564, %497 : vector<17x32xf32>
    %566 = vector.extract_strided_slice %550 {offsets = [0, 0], sizes = [1, 32], strides = [1, 1]} : vector<17x32xf32> to vector<1x32xf32>
    %567 = vector.extract_strided_slice %565 {offsets = [0, 0], sizes = [1, 32], strides = [1, 1]} : vector<17x32xf32> to vector<1x32xf32>
    %568 = tpu.concatenate %566, %567 in 0 : vector<1x32xf32>, vector<1x32xf32> -> vector<2x32xf32>
    %cst_206 = arith.constant dense<0.000000e+00> : vector<2xf32>
    %569 = vector.multi_reduction <add>, %568, %cst_206 [1] : vector<2x32xf32> to vector<2xf32>
    %570 = vector.shape_cast %569 : vector<2xf32> to vector<2x1xf32>
    %cst_207 = arith.constant 3.200000e+01 : f32
    %571 = vector.broadcast %cst_207 : f32 to vector<2x1xf32>
    %572 = arith.divf %570, %571 : vector<2x1xf32>
    %573 = vector.broadcast %572 : vector<2x1xf32> to vector<2x32xf32>
    %574 = arith.subf %568, %573 : vector<2x32xf32>
    %575 = arith.mulf %574, %574 : vector<2x32xf32>
    %cst_208 = arith.constant dense<0.000000e+00> : vector<2xf32>
    %576 = vector.multi_reduction <add>, %575, %cst_208 [1] : vector<2x32xf32> to vector<2xf32>
    %577 = vector.shape_cast %576 : vector<2xf32> to vector<2x1xf32>
    %cst_209 = arith.constant 3.200000e+01 : f32
    %578 = vector.broadcast %cst_209 : f32 to vector<2x1xf32>
    %579 = arith.divf %577, %578 : vector<2x1xf32>
    %580 = vector.broadcast %572 : vector<2x1xf32> to vector<2x32xf32>
    %581 = arith.subf %568, %580 : vector<2x32xf32>
    %cst_210 = arith.constant 9.99999974E-6 : f32
    %582 = vector.broadcast %cst_210 : f32 to vector<2x1xf32>
    %583 = arith.addf %579, %582 : vector<2x1xf32>
    %584 = math.rsqrt %583 : vector<2x1xf32>
    %585 = vector.broadcast %584 : vector<2x1xf32> to vector<2x32xf32>
    %586 = arith.mulf %581, %585 : vector<2x32xf32>
    %c0_211 = arith.constant 0 : index
    %c0_212 = arith.constant 0 : index
    %587 = vector.load %arg16[%c0_211, %c0_212] : memref<1x32xf32, #tpu.memory_space<vmem>>, vector<1x32xf32>
    %588 = vector.broadcast %587 : vector<1x32xf32> to vector<2x32xf32>
    %589 = arith.mulf %586, %588 : vector<2x32xf32>
    %c0_213 = arith.constant 0 : index
    %c0_214 = arith.constant 0 : index
    %590 = vector.load %arg17[%c0_213, %c0_214] : memref<1x32xf32, #tpu.memory_space<vmem>>, vector<1x32xf32>
    %591 = vector.broadcast %590 : vector<1x32xf32> to vector<2x32xf32>
    %592 = arith.addf %589, %591 : vector<2x32xf32>
    %593 = arith.truncf %592 : vector<2x32xf32> to vector<2x32xbf16>
    %c0_215 = arith.constant 0 : index
    %c0_216 = arith.constant 0 : index
    %594 = vector.load %arg18[%c0_215, %c0_216] : memref<32x10xbf16, #tpu.memory_space<vmem>>, vector<32x10xbf16>
    %cst_217 = arith.constant dense<0.000000e+00> : vector<2x10xf32>
    %595 = tpu.matmul %593, %594, %cst_217 {dimension_numbers = #tpu.dot_dimension_numbers<[1], [0], [0], [1], [0, 0, 1, 1], [], []>} : vector<2x32xbf16>, vector<32x10xbf16>, vector<2x10xf32> -> vector<2x10xf32>
    %c0_218 = arith.constant 0 : index
    %c0_219 = arith.constant 0 : index
    %596 = vector.load %arg19[%c0_218, %c0_219] : memref<1x10xf32, #tpu.memory_space<vmem>>, vector<1x10xf32>
    %597 = vector.broadcast %596 : vector<1x10xf32> to vector<2x10xf32>
    %598 = arith.addf %595, %597 : vector<2x10xf32>
    %c0_220 = arith.constant 0 : index
    %c0_221 = arith.constant 0 : index
    %599 = vector.load %arg20[%c0_220, %c0_221] : memref<2x10xf32, #tpu.memory_space<vmem>>, vector<2x10xf32>
    tpu.vector_store %arg20[%c0_220, %c0_221], %598 {strides = array<i32>} : memref<2x10xf32, #tpu.memory_space<vmem>>, vector<2x10xf32>,
    return
  }
}

</mosaic_0001>

<bundles_post_ra>
// kernel: vit_forward.1
= control target key start
LH: loop header
LB: loop body
LE: loop exit
PB: predicated region body
PF: predicated region fallthrough
CT: control target
= control target key end

     0   :  { %s7121_s0 = inlined_call_operand.vmem [shape: f32[32,64], index: 0, kind: input, shape index: {}]   ;;  %s7122_s1 = inlined_call_operand.vmem [shape: bf16[64,32], index: 1, kind: input, shape index: {}]   ;;  %s7123_s2 = inlined_call_operand.vmem [shape: f32[1,32], index: 2, kind: input, shape index: {}]   ;;  %s7124_s3 = inlined_call_operand.vmem [shape: f32[1,32], index: 3, kind: input, shape index: {}]   ;;  %s7125_s4 = inlined_call_operand.vmem [shape: f32[17,32], index: 4, kind: input, shape index: {}]   ;;  %s7126_s5 = inlined_call_operand.vmem [shape: f32[2,1,32], index: 5, kind: input, shape index: {}]   ;;  %s7127_s6 = inlined_call_operand.vmem [shape: f32[2,1,32], index: 6, kind: input, shape index: {}]   ;;  %s7128_s7 = inlined_call_operand.vmem [shape: bf16[2,32,96], index: 7, kind: input, shape index: {}]   ;;  %s7129_s8 = inlined_call_operand.vmem [shape: bf16[2,32,32], index: 8, kind: input, shape index: {}]   ;;  %s7130_s9 = inlined_call_operand.vmem [shape: f32[2,1,32], index: 9, kind: input, shape index: {}]   ;;  %s7131_s10 = inlined_call_operand.vmem [shape: f32[2,1,32], index: 10, kind: input, shape index: {}]   ;;  %s7132_s11 = inlined_call_operand.vmem [shape: f32[2,1,32], index: 11, kind: input, shape index: {}]   ;;  %s7133_s12 = inlined_call_operand.vmem [shape: bf16[2,32,64], index: 12, kind: input, shape index: {}]   ;;  %s7134_s13 = inlined_call_operand.vmem [shape: f32[2,1,64], index: 13, kind: input, shape index: {}]   ;;  %s7135_s14 = inlined_call_operand.vmem [shape: bf16[2,64,32], index: 14, kind: input, shape index: {}]   ;;  %s7136_s15 = inlined_call_operand.vmem [shape: f32[2,1,32], index: 15, kind: input, shape index: {}]   ;;  %s7137_s16 = inlined_call_operand.vmem [shape: f32[1,32], index: 16, kind: input, shape index: {}]   ;;  %s7138_s17 = inlined_call_operand.vmem [shape: f32[1,32], index: 17, kind: input, shape index: {}]   ;;  %s7139_s18 = inlined_call_operand.vmem [shape: bf16[32,10], index: 18, kind: input, shape index: {}]   ;;  %s7140_s19 = inlined_call_operand.vmem [shape: f32[1,10], index: 19, kind: input, shape index: {}]   ;;  %s7141_s20 = inlined_call_operand.hbm [shape: f32[2,10], index: 20, kind: output, shape index: {}]  }
   0x1   :  { %7161 = sst [smem:[#allocation5_spill]] %s7121_s0 }
   0x2   :  { %7162 = sst [smem:[#allocation6_spill]] %s7122_s1 }
   0x3   :  { %7163 = sst [smem:[#allocation7_spill]] %s7123_s2 }
   0x4   :  { %7164 = sst [smem:[#allocation8_spill]] %s7124_s3 }
   0x5   :  { %7165 = sst [smem:[#allocation9_spill]] %s7125_s4 }
   0x6   :  { %s7166_s23 = sld [smem:[#allocation6_spill]]  ;;  %s7167_s28 = sld [smem:[#allocation5_spill]]  ;;  %vm112_vm0 = vcmask 523264  }
   0xc   :  { %v5584_v0 = vld [vmem:[%s7166_s23] sm:$0xff]   ;;  %v5585_v1 = vld [vmem:[%s7166_s23 + $0x8] sm:$0xff]   ;;  %v5586_v2 = vld [vmem:[%s7166_s23 + $0x10] sm:$0xff]  }
   0xd   :  { %5054 = vmatprep.subr.bf16.mxu0 %v5584_v0  ;;  %v67_v3 = vld [vmem:[%s7167_s28] sm:$0xff]  ;;  %v68_v4 = vld [vmem:[%s7167_s28 + $0x8] sm:$0xff]  ;;  %v5587_v6 = vld [vmem:[%s7166_s23 + $0x18] sm:$0xff]  }
   0xe   :  { %5055 = vmatpush3.bf16.msra.mxu0 %v5584_v0  ;;  %v71_v5 = vpack.c.bf16 %v68_v4, %v67_v3  ;;  %v69_v7 = vld [vmem:[%s7167_s28 + $0x10] sm:$0xff]  ;;  %v70_v8 = vld [vmem:[%s7167_s28 + $0x18] sm:$0xff] }
   0xf   :  { %5056 = vmatprep.subr.bf16.mxu0 %v5585_v1  ;;  %v72_v9 = vpack.c.bf16 %v70_v8, %v69_v7 }
  0x10   :  { %5062 = vmatprep.mubr.msk.bf16.mxu0 %vm112_vm0, %v71_v5 }
  0x12   :  { %5057 = vmatpush3.bf16.msra.mxu0 %v5585_v1 }
  0x13   :  { %5058 = vmatprep.subr.bf16.mxu0 %v5586_v2 }
  0x16   :  { %5059 = vmatpush3.bf16.msra.mxu0 %v5586_v2 }
  0x17   :  { %5060 = vmatprep.subr.bf16.mxu0 %v5587_v6 }
  0x1a   :  { %5061 = vmatpush3.bf16.msra.mxu0 %v5587_v6 }
  0x1d   :  { %5063 = vmatmul.mubr.msk.bf16.vlgmr.msra.gmra.mrb[0].mxu0 %vm112_vm0, %v72_v9 }
  0x1e   :  { %25 = vsyncpa [#allocation3], 0  ;;  %v5988_v10 = vld [vmem:[%s7128_s7] sm:$0xff]   ;;  %v5993_v11 = vld [vmem:[%s7128_s7 + $0x8] sm:$0xff]   ;;  %s7168_s28 = sld [smem:[#allocation9_spill]]  ;;  %vm176_vm1 = vcmask 1046528  }
  0x1f   :  { %5066 = vmatprep.subr.bf16.mxu1 %v5988_v10  ;;  %s7169_s22 = sld [smem:[#allocation7_spill]]  ;;  %s7170_s2 = sld [smem:[#allocation8_spill]]  ;;  %vm188_vm2 = vcmask 1040384   ;;  %vm218_vm3 = vcmask 261120   ;;  %vm222_vm4 = vcmask 253952   ;;  %vm374_vm5 = vcmask 64512  }
  0x20   :  { %5067 = vmatpush3.bf16.msra.mxu1 %v5988_v10  ;;  %vm445_vm6 = vcmask 131072   ;;  %vm438_vm7 = vcmask 138240   ;;  %s5837_s4 = smov 88   ;;  %s5838_s29 = smov 64   ;;  %vm1082_vm8 = vcmask 130048   ;;  %vm1086_vm9 = vcmask 195584  }
  0x21   :  { %5068 = vmatprep.subr.bf16.mxu1 %v5993_v11  ;;  %s5839_s30 = smov 120   ;;  %s5841_s0 = smov 56   ;;  %vm4569_vm10 = vcmask 254976   ;;  %vm5852_vm11 = vmmov 0   ;;  %vm4667_vm12 = vcmask 74752  }
  0x22   :  { %s5842_s21 = smov 80   ;;  %s7159_s1 = smov 112  }
  0x23   :  { %s7155_s24 = smov 72   ;;  %s7153_s23 = smov 104  }
  0x24   :  { %5069 = vmatpush3.bf16.msra.mxu1 %v5993_v11  ;;  %v168_v12 = vld [vmem:[%s7168_s28] sm:$0xff]  ;;  %v169_v13 = vld [vmem:[%s7168_s28 + $0x8] sm:$0xff]  ;;  %v170_v14 = vld [vmem:[%s7168_s28 + $0x10] sm:$0x1]  ;;  %s5836_s28 = smov 96   ;;  %s7147_s25 = smov 8  }
  0x25   :  { %v177_v15 = vrot.slane %v168_v12, 1  ;;  %v178_v16 = vrot.slane %v169_v13, 1  ;;  %v4683_v17 = vld [vmem:[%s7169_s22] ss:$0 sm:$0xff]  ;;  %v180_v18 = vrot.slane %v170_v14, 1  ;;  %s7157_s22 = smov 48  }
  0x26   :  { %v171_v20 = vld [vmem:[%s7170_s2] sm:$0x1]  ;;  %s7149_s2 = smov 40   ;;  %s7145_s3 = smov 16  }
  0x27   :  { %v179_v21 = vsel %vm176_vm1, %v177_v15, %v178_v16  ;;  %v181_v26 = vsel %vm176_vm1, %v178_v16, %v180_v18  ;;  %v172_v27 = vadd.f32 %v171_v20, %v168_v12  ;;  %s7173_s26 = smov 16  }
  0xf0   :  { %v5064_v19 = vpop.f32.mrb[0].mxu0 }
  0xf1   :  { %v162_v22 = vadd.f32 %v5064_v19, %v4683_v17  ;;  %v153_v23 = vpop.f32.mrb[1].mxu0 }
  0xf2   :  { %v154_v24 = vadd.f32 %v4683_v17, %v153_v23  ;;  %v5065_v25 = vpop.f32.mrb[2].mxu0 }
  0xf3   :  { %v196_v28 = vadd.f32 %v179_v21, %v162_v22  ;;  %v165_v29 = vadd.f32 %v5065_v25, %v4683_v17  ;;  %v156_v30 = vpop.f32.mrb[3].mxu0 }
  0xf4   :  { %v184_v31 = vadd.f32 %v179_v21, %v154_v24  ;;  %v157_v32 = vadd.f32 %v4683_v17, %v156_v30 }
  0xf5   :  { %v200_v33 = vrot.slane %v196_v28, 7  ;;  %v197_v34 = vadd.f32 %v181_v26, %v165_v29 }
  0xf6   :  { %v189_v35 = vrot.slane %v184_v31, 7  ;;  %v185_v36 = vadd.f32 %v181_v26, %v157_v32 }
  0xf7   :  { %v6015_v37 = vsel %vm188_vm2, %v172_v27, %v200_v33  ;;  %v6017_v38 = vrot.slane %v197_v34, 7 }
  0xf8   :  { %v257_v39 = vmul.f32 %v6015_v37, %v6015_v37  ;;  %v6022_v40 = vsel %vm188_vm2, %v172_v27, %v189_v35  ;;  %v6024_v41 = vrot.slane %v185_v36, 7  ;;  %v245_v43 = vsel %vm218_vm3, %v6015_v37, 0.0 }
  0xf9   :  { %v6028_v42 = vsel %vm188_vm2, %v200_v33, %v6017_v38  ;;  %v259_v46 = vmul.f32 %v6017_v38, %v6017_v38  ;;  %v231_v47 = vmul.f32 %v6022_v40, %v6022_v40  ;;  %v248_v50 = vsel %vm222_vm4, %v6017_v38, 0.0 }
  0xfa   :  { %v246_v44 = vsel %vm218_vm3, %v6028_v42, 0.0  ;;  %v258_v45 = vmul.f32 %v6028_v42, %v6028_v42  ;;  %v260_v49 = vsel %vm218_vm3, %v257_v39, 0.0  ;;  %v6046_v52 = vsel %vm188_vm2, %v189_v35, %v6024_v41 }
  0xfb   :  { %v247_v48 = vadd.f32 %v246_v44, %v245_v43  ;;  %v219_v53 = vsel %vm218_vm3, %v6022_v40, 0.0  ;;  %v220_v56 = vsel %vm218_vm3, %v6046_v52, 0.0  ;;  %v263_v57 = vsel %vm222_vm4, %v259_v46, 0.0  ;;  %v216_v46 = vld [vmem:[%s7126_s5] sm:$0x1] }
  0xfc   :  { %v261_v51 = vsel %vm218_vm3, %v258_v45, 0.0  ;;  %v233_v58 = vmul.f32 %v6024_v41, %v6024_v41  ;;  %v221_v59 = vadd.f32 %v220_v56, %v219_v53  ;;  %v232_v60 = vmul.f32 %v6046_v52, %v6046_v52 }
  0xfd   :  { %v249_v54 = vadd.f32 %v248_v50, %v247_v48  ;;  %v262_v55 = vadd.f32 %v261_v51, %v260_v49  ;;  %v223_v63 = vsel %vm222_vm4, %v6024_v41, 0.0  ;;  %v234_v0 = vsel %vm218_vm3, %v231_v47, 0.0  ;;  %v217_v50 = vld [vmem:[%s7127_s6] sm:$0x1] }
  0xfe   :  { %v224_v1 = vadd.f32 %v223_v63, %v221_v59  ;;  %v235_v2 = vsel %vm218_vm3, %v232_v60, 0.0  ;;  %v237_v6 = vsel %vm222_vm4, %v233_v58, 0.0  ;;  %v282_v44 = vlaneseq }
  0xff   :  { %v250_v61 = vrot.slane %v249_v54, 4  ;;  %v264_v62 = vadd.f32 %v263_v57, %v262_v55  ;;  %v236_v5 = vadd.f32 %v235_v2, %v234_v0 }
 0x100   :  { %v225_v7 = vrot.slane %v224_v1, 4  ;;  %v283_v45 = vshrl.u32 %v282_v44, 7 }
 0x101   :  { %v251_v3 = vadd.f32 %v250_v61, %v249_v54  ;;  %v265_v4 = vrot.slane %v264_v62, 4  ;;  %v238_v12 = vadd.f32 %v237_v6, %v236_v5 }
 0x102   :  { %v226_v13 = vadd.f32 %v225_v7, %v224_v1  ;;  %v6065_v47 = vsub.s32 0, %v283_v45 }
 0x103   :  { %v252_v8 = vrot.slane %v251_v3, 2  ;;  %v266_v9 = vadd.f32 %v265_v4, %v264_v62  ;;  %v239_v16 = vrot.slane %v238_v12, 4 }
 0x104   :  { %v227_v17 = vrot.slane %v226_v13, 2 }
 0x105   :  { %v253_v14 = vadd.f32 %v252_v8, %v251_v3  ;;  %v267_v15 = vrot.slane %v266_v9, 2  ;;  %v240_v20 = vadd.f32 %v239_v16, %v238_v12 }
 0x106   :  { %v228_v21 = vadd.f32 %v227_v17, %v226_v13 }
 0x107   :  { %v254_v18 = vrot.slane %v253_v14, 1  ;;  %v268_v19 = vadd.f32 %v267_v15, %v266_v9  ;;  %v241_v23 = vrot.slane %v240_v20, 2 }
 0x108   :  { %v229_v25 = vrot.slane %v228_v21, 1 }
 0x109   :  { %v269_v22 = vrot.slane %v268_v19, 1  ;;  %v255_v24 = vadd.f32 %v254_v18, %v253_v14  ;;  %v242_v26 = vadd.f32 %v241_v23, %v240_v20 }
 0x10a   :  { %v230_v27 = vadd.f32 %v229_v25, %v228_v21 }
 0x10b   :  { %v270_v28 = vadd.f32 %v269_v22, %v268_v19  ;;  %v243_v29 = vrot.slane %v242_v26, 1 }
 0x10c   :  { %v256_v30 = vadd.f32 %v255_v24, %v230_v27 }
 0x10d   :  { %v244_v31 = vadd.f32 %v243_v29, %v242_v26 }
 0x10e   :  { %v272_v32 = vmul.f32 0.029411765, %v256_v30 }
 0x10f   :  { %v271_v33 = vadd.f32 %v270_v28, %v244_v31 }
 0x110   :  { %v274_v34 = vmul.f32 %v272_v32, %v272_v32 }
 0x111   :  { %v273_v35 = vmul.f32 0.029411765, %v271_v33 }
 0x113   :  { %v275_v36 = vsub.f32 %v273_v35, %v274_v34 }
 0x115   :  { %v276_v39 = vmax.f32 %v275_v36, 0.0 }
 0x117   :  { %v277_v43 = vadd.f32 1e-05, %v276_v39 }
 0x119   :  { %5610 = vrsqrt.f32 %v277_v43 }
 0x123   :  { %v5611_v48 = vpop.eup %5610 }
 0x124   :  { %v279_v49 = vmul.f32 %v5611_v48, %v216_v46 }
 0x126   :  { %v280_v51 = vmul.f32 %v279_v49, %v272_v32  ;;  %v285_v53 = vrot.slane %v279_v49, %v6065_v47 }
 0x128   :  { %v281_v54 = vsub.f32 %v217_v50, %v280_v51  ;;  %v286_v55 = vmul.f32 %v285_v53, %v6022_v40  ;;  %v287_v56 = vmul.f32 %v285_v53, %v6046_v52  ;;  %v288_v58 = vmul.f32 %v285_v53, %v6024_v41 }
 0x129   :  { %v1167_v59 = vmul.f32 %v285_v53, %v6015_v37  ;;  %v1168_v60 = vmul.f32 %v285_v53, %v6028_v42  ;;  %v1169_v61 = vmul.f32 %v285_v53, %v6017_v38 }
 0x12a   :  { %v293_v57 = vrot.slane %v281_v54, %v6065_v47 }
 0x12c   :  { %v295_v62 = vadd.f32 %v293_v57, %v286_v55  ;;  %v296_v63 = vadd.f32 %v293_v57, %v287_v56  ;;  %v297_v0 = vadd.f32 %v293_v57, %v288_v58  ;;  %v6078_v1 = vadd.f32 %v1167_v59, %v293_v57 }
 0x12d   :  { %v6080_v2 = vadd.f32 %v1168_v60, %v293_v57  ;;  %v6082_v3 = vadd.f32 %v1169_v61, %v293_v57  ;;  %v5840_v55 = vmov 0  }
 0x12e   :  { %v298_v4 = vpack.c.bf16 %v296_v63, %v295_v62  ;;  %v299_v5 = vpack.c.bf16 %v297_v0, %v297_v0  ;;  %v6123_v56 = vsel %vm188_vm2, 65535, %v5840_v55 }
 0x12f   :  { %v1173_v6 = vpack.c.bf16 %v6080_v2, %v6078_v1 }
 0x130   :  { %5070 = vmatprep.mubr.msk.bf16.mxu1 %vm218_vm3, %v298_v4 }
 0x131   :  { %5071 = vmatmul.mubr.msk.bf16.vlgmr.msra.gmra.mrb[0].mxu1 %vm218_vm3, %v299_v5 }
 0x204   :  { %v5072_v7 = vpop.f32.mrb[0].mxu1 }
 0x205   :  { %v352_v8 = vpop.f32.mrb[1].mxu1  ;;  %v6094_v14 = vpack.c.bf16 %v5072_v7, %v5072_v7 }
 0x206   :  { %v5073_v9 = vpop.f32.mrb[2].mxu1 }
 0x207   :  { %v355_v12 = vpop.f32.mrb[3].mxu1 }
 0x208   :  { %v6088_v13 = vpack.c.bf16 %v355_v12, %v352_v8 }
 0x20a   :  { %370 = vrot.lane.b32.xlu0 %v6088_v13, %s5836_s28  ;;  %5078 = vmatprep.mubr.msk.bf16.mxu1 %vm374_vm5, %v6088_v13 }
 0x20e   :  { %372 = vrot.lane.b32.xlu0 %v6094_v14, %s5836_s28 }
 0x27c   :  { %v371_v15 = vpop.permute.xlu0 %370 }
 0x27d   :  { %5474 = vmatprep.subr.msk.bf16.mxu1 %vm374_vm5, %v371_v15  ;;  %v382_v16 = vsel %vm374_vm5, %v371_v15, 0 }
 0x27e   :  { %5075 = vmatpush3.bf16.xpose.msra.mxu1 %v382_v16 }
 0x280   :  { %v373_v17 = vpop.permute.xlu0 %372 }
 0x281   :  { %5475 = vmatprep.subr.msk.bf16.mxu1 %vm374_vm5, %v373_v17  ;;  %v385_v18 = vsel %vm374_vm5, %v373_v17, 0 }
 0x286   :  { %5077 = vmatpush3.bf16.xpose.msra.mxu1 %v385_v18 }
 0x28d   :  { %5079 = vmatmul.mubr.msk.bf16.vlgmr.msra.gmra.mrb[4].mxu1 %vm374_vm5, %v6094_v14 }
 0x360   :  { %v5080_v19 = vpop.f32.mrb[4].mxu1 }
 0x361   :  { %v437_v20 = vmul.f32 0.35355338, %v5080_v19  ;;  %v421_v21 = vpop.f32.mrb[5].mxu1 }
 0x362   :  { %v435_v22 = vmul.f32 0.35355338, %v421_v21  ;;  %v5081_v23 = vpop.f32.mrb[6].mxu1 }
 0x363   :  { %v424_v24 = vpop.f32.mrb[7].mxu1  ;;  %v446_v25 = vsel %vm445_vm6, %v437_v20, -inf }
 0x364   :  { %v436_v26 = vmul.f32 0.35355338, %v424_v24  ;;  %447 = vmax.xlane.f32.xlu0 %v446_v25  ;;  %v439_v27 = vsel %vm438_vm7, %v435_v22, -inf }
 0x365   :  { %440 = vmax.xlane.f32.xlu1 %v439_v27 }
 0x366   :  { %v442_v28 = vsel %vm438_vm7, %v436_v26, -inf }
 0x369   :  { %443 = vmax.xlane.f32.xlu1 %v442_v28 }
 0x37a   :  { %543 = vrot.lane.b32.xlu0 %v6088_v13, %s5837_s4  ;;  %475 = vrot.lane.b32.xlu1 %v6088_v13, %s5838_s29 }
 0x3f1   :  { %v448_v29 = vpop.xlane.xlu0 %447 }
 0x3f2   :  { %v451_v30 = vsub.f32 %v437_v20, %v448_v29  ;;  %v441_v31 = vpop.xlane.xlu1 %440 }
 0x3f3   :  { %v449_v32 = vsub.f32 %v435_v22, %v441_v31 }
 0x3f4   :  { %v456_v33 = vmul.f32 1.442695, %v451_v30 }
 0x3f5   :  { %v452_v34 = vmul.f32 1.442695, %v449_v32  ;;  %v544_v60 = vpop.permute.xlu0 %543 }
 0x3f6   :  { %5612 = vpow2.f32 %v456_v33  ;;  %v444_v35 = vpop.xlane.xlu1 %443  ;;  %v554_v12 = vsel %vm374_vm5, %v544_v60, 0 }
 0x3f7   :  { %v450_v36 = vsub.f32 %v436_v26, %v444_v35  ;;  %5614 = vpow2.f32 %v452_v34 }
 0x3f9   :  { %v454_v39 = vmul.f32 1.442695, %v450_v36 }
 0x3fa   :  { %v476_v43 = vpop.permute.xlu1 %475 }
 0x3fb   :  { %5082 = vmatprep.subr.bf16.mxu0 %v476_v43  ;;  %5616 = vpow2.f32 %v454_v39 }
 0x3fc   :  { %5083 = vmatpush3.bf16.msra.mxu0 %v476_v43 }
 0x400   :  { %v5613_v44 = vpop.eup %5612 }
 0x401   :  { %v464_v45 = vsel %vm445_vm6, %v5613_v44, 0.0  ;;  %v5615_v46 = vpop.eup %5614 }
 0x402   :  { %465 = vadd.xlane.f32.xlu1 %v464_v45  ;;  %v458_v48 = vsel %vm438_vm7, %v5615_v46, 0.0 }
 0x405   :  { %v5617_v49 = vpop.eup %5616 }
 0x406   :  { %459 = vadd.xlane.f32.xlu1 %v458_v48  ;;  %v461_v50 = vsel %vm438_vm7, %v5617_v49, 0.0 }
 0x40a   :  { %462 = vadd.xlane.f32.xlu1 %v461_v50 }
 0x41b   :  { %477 = vrot.lane.b32.xlu1 %v6094_v14, %s5838_s29 }
 0x41f   :  { %545 = vrot.lane.b32.xlu1 %v6094_v14, %s5837_s4 }
 0x423   :  { %539 = vrot.lane.b32.xlu1 %v6088_v13, %s5839_s30 }
 0x427   :  { %541 = vrot.lane.b32.xlu1 %v6094_v14, %s5839_s30 }
 0x48f   :  { %v466_v51 = vpop.xlane.xlu1 %465 }
 0x490   :  { %5618 = vrcp.f32 %v466_v51 }
 0x493   :  { %v460_v53 = vpop.xlane.xlu1 %459 }
 0x494   :  { %5620 = vrcp.f32 %v460_v53 }
 0x497   :  { %v463_v54 = vpop.xlane.xlu1 %462 }
 0x498   :  { %5622 = vrcp.f32 %v463_v54 }
 0x49a   :  { %v5619_v59 = vpop.eup %5618 }
 0x49b   :  { %v478_v57 = vpop.permute.xlu1 %477  ;;  %v472_v0 = vmul.f32 %v5619_v59, %v5613_v44 }
 0x49c   :  { %v489_v58 = vand.u32 %v6123_v56, %v478_v57 }
 0x49d   :  { %v474_v8 = vpack.c.bf16 %v472_v0, %v472_v0 }
 0x49e   :  { %5084 = vmatprep.subr.bf16.mxu0 %v489_v58  ;;  %v5621_v61 = vpop.eup %5620 }
 0x49f   :  { %5085 = vmatpush3.bf16.msra.mxu0 %v489_v58  ;;  %v546_v63 = vpop.permute.xlu1 %545  ;;  %v470_v4 = vmul.f32 %v5621_v61, %v5615_v46 }
 0x4a0   :  { %5476 = vmatprep.subr.msk.bf16.mxu0 %vm374_vm5, %v544_v60  ;;  %v557_v15 = vsel %vm374_vm5, %v546_v63, 0 }
 0x4a2   :  { %v5623_v62 = vpop.eup %5622 }
 0x4a3   :  { %v471_v5 = vmul.f32 %v5623_v62, %v5617_v49  ;;  %v540_v9 = vpop.permute.xlu1 %539 }
 0x4a5   :  { %v473_v7 = vpack.c.bf16 %v471_v5, %v470_v4 }
 0x4a7   :  { %5086 = vmatprep.mubr.msk.bf16.mxu0 %vm438_vm7, %v473_v7  ;;  %v542_v16 = vpop.permute.xlu1 %541 }
 0x4a8   :  { %5087 = vmatmul.mubr.msk.bf16.vlgmr.msra.gmra.mrb[4].mxu0 %vm438_vm7, %v474_v8 }
 0x4a9   :  { %5091 = vmatpush3.bf16.xpose.msra.mxu0 %v554_v12  ;;  %5094 = vmatprep.mubr.msk.bf16.mxu0 %vm374_vm5, %v540_v9 }
 0x4aa   :  { %5477 = vmatprep.subr.msk.bf16.mxu0 %vm374_vm5, %v546_v63 }
 0x4b1   :  { %5093 = vmatpush3.bf16.xpose.msra.mxu0 %v557_v15 }
 0x4b8   :  { %5095 = vmatmul.mubr.msk.bf16.vlgmr.msra.gmra.mrb[8].mxu0 %vm374_vm5, %v542_v16 }
 0x57b   :  { %v6134_v17 = vpop.f32.mrb[4].mxu0 }
 0x57c   :  { %v6136_v18 = vpop.f32.mrb[5].mxu0 }
 0x57d   :  { %v5089_v19 = vpop.f32.mrb[6].mxu0 }
 0x57e   :  { %v6138_v20 = vpop.f32.mrb[7].mxu0 }
 0x58b   :  { %v5096_v21 = vpop.f32.mrb[8].mxu0 }
 0x58c   :  { %v593_v22 = vpop.f32.mrb[9].mxu0  ;;  %v609_v26 = vmul.f32 0.35355338, %v5096_v21 }
 0x58d   :  { %v607_v23 = vmul.f32 0.35355338, %v593_v22  ;;  %v5097_v24 = vpop.f32.mrb[10].mxu0 }
 0x58e   :  { %v596_v25 = vpop.f32.mrb[11].mxu0  ;;  %v616_v30 = vsel %vm445_vm6, %v609_v26, -inf }
 0x58f   :  { %v608_v27 = vmul.f32 0.35355338, %v596_v25  ;;  %v610_v28 = vsel %vm438_vm7, %v607_v23, -inf }
 0x590   :  { %611 = vmax.xlane.f32.xlu1 %v610_v28 }
 0x591   :  { %v613_v29 = vsel %vm438_vm7, %v608_v27, -inf }
 0x592   :  { %614 = vmax.xlane.f32.xlu0 %v613_v29 }
 0x594   :  { %617 = vmax.xlane.f32.xlu1 %v616_v30 }
 0x5a5   :  { %645 = vrot.lane.b32.xlu1 %v6088_v13, %s5841_s0 }
 0x61d   :  { %v612_v31 = vpop.xlane.xlu1 %611 }
 0x61e   :  { %v619_v33 = vsub.f32 %v607_v23, %v612_v31 }
 0x61f   :  { %v615_v32 = vpop.xlane.xlu0 %614 }
 0x620   :  { %v620_v34 = vsub.f32 %v608_v27, %v615_v32  ;;  %v622_v43 = vmul.f32 1.442695, %v619_v33 }
 0x621   :  { %v618_v35 = vpop.xlane.xlu1 %617 }
 0x622   :  { %v624_v36 = vmul.f32 1.442695, %v620_v34  ;;  %v621_v39 = vsub.f32 %v609_v26, %v618_v35 }
 0x624   :  { %5624 = vpow2.f32 %v624_v36  ;;  %v626_v44 = vmul.f32 1.442695, %v621_v39 }
 0x625   :  { %v646_v45 = vpop.permute.xlu1 %645 }
 0x626   :  { %5626 = vpow2.f32 %v626_v44  ;;  %5098 = vmatprep.subr.bf16.mxu1 %v646_v45 }
 0x627   :  { %5099 = vmatpush3.bf16.msra.mxu1 %v646_v45  ;;  %5628 = vpow2.f32 %v622_v43 }
 0x62e   :  { %v5625_v46 = vpop.eup %5624 }
 0x62f   :  { %v631_v48 = vsel %vm438_vm7, %v5625_v46, 0.0 }
 0x630   :  { %v5627_v49 = vpop.eup %5626  ;;  %632 = vadd.xlane.f32.xlu1 %v631_v48 }
 0x631   :  { %v634_v50 = vsel %vm445_vm6, %v5627_v49, 0.0  ;;  %v5629_v51 = vpop.eup %5628 }
 0x632   :  { %635 = vadd.xlane.f32.xlu0 %v634_v50  ;;  %v628_v53 = vsel %vm438_vm7, %v5629_v51, 0.0 }
 0x636   :  { %629 = vadd.xlane.f32.xlu0 %v628_v53 }
 0x641   :  { %711 = vrot.lane.b32.xlu1 %v6088_v13, %s5842_s21 }
 0x645   :  { %713 = vrot.lane.b32.xlu1 %v6094_v14, %s5842_s21 }
 0x649   :  { %709 = vrot.lane.b32.xlu1 %v6094_v14, %s7159_s1 }
 0x64c   :  { %647 = vrot.lane.b32.xlu0 %v6094_v14, %s5841_s0 }
 0x650   :  { %707 = vrot.lane.b32.xlu0 %v6088_v13, %s7159_s1 }
 0x6bd   :  { %v633_v54 = vpop.xlane.xlu1 %632 }
 0x6bf   :  { %v636_v55 = vpop.xlane.xlu0 %635 }
 0x6c0   :  { %5630 = vrcp.f32 %v636_v55 }
 0x6c1   :  { %5632 = vrcp.f32 %v633_v54  ;;  %v712_v61 = vpop.permute.xlu1 %711 }
 0x6c2   :  { %v722_v12 = vsel %vm374_vm5, %v712_v61, 0 }
 0x6c3   :  { %v630_v57 = vpop.xlane.xlu0 %629 }
 0x6c4   :  { %5634 = vrcp.f32 %v630_v57 }
 0x6c5   :  { %v714_v15 = vpop.permute.xlu1 %713 }
 0x6c6   :  { %v725_v16 = vsel %vm374_vm5, %v714_v15, 0 }
 0x6c7   :  { %v648_v58 = vpop.permute.xlu0 %647 }
 0x6c8   :  { %v657_v59 = vand.u32 %v648_v58, %v6123_v56 }
 0x6c9   :  { %v710_v19 = vpop.permute.xlu1 %709 }
 0x6ca   :  { %5100 = vmatprep.subr.bf16.mxu1 %v657_v59  ;;  %v5631_v60 = vpop.eup %5630 }
 0x6cb   :  { %5101 = vmatpush3.bf16.msra.mxu1 %v657_v59  ;;  %v5633_v62 = vpop.eup %5632  ;;  %v642_v0 = vmul.f32 %v5631_v60, %v5627_v49  ;;  %v708_v9 = vpop.permute.xlu0 %707 }
 0x6cc   :  { %5478 = vmatprep.subr.msk.bf16.mxu1 %vm374_vm5, %v712_v61  ;;  %v641_v5 = vmul.f32 %v5633_v62, %v5625_v46 }
 0x6cd   :  { %v644_v8 = vpack.c.bf16 %v642_v0, %v642_v0 }
 0x6ce   :  { %v5635_v63 = vpop.eup %5634 }
 0x6cf   :  { %v640_v4 = vmul.f32 %v5635_v63, %v5629_v51 }
 0x6d1   :  { %v643_v7 = vpack.c.bf16 %v641_v5, %v640_v4 }
 0x6d3   :  { %5102 = vmatprep.mubr.msk.bf16.mxu1 %vm438_vm7, %v643_v7 }
 0x6d4   :  { %5103 = vmatmul.mubr.msk.bf16.vlgmr.msra.gmra.mrb[8].mxu1 %vm438_vm7, %v644_v8 }
 0x6d5   :  { %5107 = vmatpush3.bf16.xpose.msra.mxu1 %v722_v12  ;;  %5110 = vmatprep.mubr.msk.bf16.mxu1 %vm374_vm5, %v708_v9 }
 0x6d6   :  { %5479 = vmatprep.subr.msk.bf16.mxu1 %vm374_vm5, %v714_v15 }
 0x6dd   :  { %5109 = vmatpush3.bf16.xpose.msra.mxu1 %v725_v16 }
 0x6e4   :  { %5111 = vmatmul.mubr.msk.bf16.vlgmr.msra.gmra.mrb[12].mxu1 %vm374_vm5, %v710_v19 }
 0x7a7   :  { %v6167_v21 = vpop.f32.mrb[8].mxu1 }
 0x7a8   :  { %v6169_v22 = vpop.f32.mrb[9].mxu1 }
 0x7a9   :  { %v5105_v23 = vpop.f32.mrb[10].mxu1 }
 0x7aa   :  { %v6171_v24 = vpop.f32.mrb[11].mxu1 }
 0x7ab   :  { %v5524_v25 = vpack.i.bf16 %v6171_v24, %v6169_v22 }
 0x7b7   :  { %v5112_v26 = vpop.f32.mrb[12].mxu1 }
 0x7b8   :  { %v761_v27 = vpop.f32.mrb[13].mxu1  ;;  %v777_v31 = vmul.f32 0.35355338, %v5112_v26 }
 0x7b9   :  { %v775_v28 = vmul.f32 0.35355338, %v761_v27  ;;  %v5113_v29 = vpop.f32.mrb[14].mxu1 }
 0x7ba   :  { %v764_v30 = vpop.f32.mrb[15].mxu1  ;;  %v784_v35 = vsel %vm445_vm6, %v777_v31, -inf }
 0x7bb   :  { %v776_v32 = vmul.f32 0.35355338, %v764_v30  ;;  %v778_v33 = vsel %vm438_vm7, %v775_v28, -inf  ;;  %v1174_v30 = vpack.c.bf16 %v6082_v3, %v6082_v3 }
 0x7bc   :  { %779 = vmax.xlane.f32.xlu0 %v778_v33 }
 0x7bd   :  { %v781_v34 = vsel %vm438_vm7, %v776_v32, -inf }
 0x7be   :  { %782 = vmax.xlane.f32.xlu1 %v781_v34 }
 0x7c0   :  { %785 = vmax.xlane.f32.xlu0 %v784_v35 }
 0x7cf   :  { %813 = vrot.lane.b32.xlu1 %v6088_v13, %s7157_s22 }
 0x849   :  { %v780_v36 = vpop.xlane.xlu0 %779 }
 0x84a   :  { %v787_v43 = vsub.f32 %v775_v28, %v780_v36 }
 0x84b   :  { %v783_v39 = vpop.xlane.xlu1 %782 }
 0x84c   :  { %v788_v44 = vsub.f32 %v776_v32, %v783_v39  ;;  %v790_v50 = vmul.f32 1.442695, %v787_v43 }
 0x84d   :  { %v786_v45 = vpop.xlane.xlu0 %785 }
 0x84e   :  { %v792_v46 = vmul.f32 1.442695, %v788_v44  ;;  %v789_v48 = vsub.f32 %v777_v31, %v786_v45 }
 0x84f   :  { %v814_v49 = vpop.permute.xlu1 %813 }
 0x850   :  { %5636 = vpow2.f32 %v792_v46  ;;  %v794_v51 = vmul.f32 1.442695, %v789_v48  ;;  %5114 = vmatprep.subr.bf16.mxu0 %v814_v49 }
 0x851   :  { %5115 = vmatpush3.bf16.msra.mxu0 %v814_v49 }
 0x852   :  { %5638 = vpow2.f32 %v794_v51 }
 0x853   :  { %5640 = vpow2.f32 %v790_v50 }
 0x85a   :  { %v5637_v53 = vpop.eup %5636 }
 0x85b   :  { %v799_v54 = vsel %vm438_vm7, %v5637_v53, 0.0 }
 0x85c   :  { %v5639_v55 = vpop.eup %5638  ;;  %800 = vadd.xlane.f32.xlu1 %v799_v54 }
 0x85d   :  { %v802_v57 = vsel %vm445_vm6, %v5639_v55, 0.0  ;;  %v5641_v58 = vpop.eup %5640 }
 0x85e   :  { %803 = vadd.xlane.f32.xlu0 %v802_v57  ;;  %v796_v59 = vsel %vm438_vm7, %v5641_v58, 0.0 }
 0x862   :  { %797 = vadd.xlane.f32.xlu0 %v796_v59 }
 0x86d   :  { %879 = vrot.lane.b32.xlu1 %v6088_v13, %s7155_s24 }
 0x871   :  { %881 = vrot.lane.b32.xlu1 %v6094_v14, %s7155_s24 }
 0x875   :  { %877 = vrot.lane.b32.xlu1 %v6094_v14, %s7153_s23 }
 0x878   :  { %815 = vrot.lane.b32.xlu0 %v6094_v14, %s7157_s22 }
 0x87c   :  { %875 = vrot.lane.b32.xlu0 %v6088_v13, %s7153_s23 }
 0x8e9   :  { %v801_v60 = vpop.xlane.xlu1 %800 }
 0x8eb   :  { %v804_v61 = vpop.xlane.xlu0 %803 }
 0x8ec   :  { %5642 = vrcp.f32 %v804_v61 }
 0x8ed   :  { %5644 = vrcp.f32 %v801_v60  ;;  %v880_v5 = vpop.permute.xlu1 %879 }
 0x8ee   :  { %v890_v26 = vsel %vm374_vm5, %v880_v5, 0 }
 0x8ef   :  { %v798_v62 = vpop.xlane.xlu0 %797 }
 0x8f0   :  { %5646 = vrcp.f32 %v798_v62 }
 0x8f1   :  { %v882_v27 = vpop.permute.xlu1 %881 }
 0x8f2   :  { %v893_v28 = vsel %vm374_vm5, %v882_v27, 0 }
 0x8f3   :  { %v816_v63 = vpop.permute.xlu0 %815 }
 0x8f4   :  { %v825_v0 = vand.u32 %v816_v63, %v6123_v56 }
 0x8f5   :  { %v878_v29 = vpop.permute.xlu1 %877 }
 0x8f6   :  { %5116 = vmatprep.subr.bf16.mxu0 %v825_v0  ;;  %v5643_v4 = vpop.eup %5642 }
 0x8f7   :  { %5117 = vmatpush3.bf16.msra.mxu0 %v825_v0  ;;  %v5645_v7 = vpop.eup %5644  ;;  %v810_v9 = vmul.f32 %v5643_v4, %v5639_v55  ;;  %v876_v23 = vpop.permute.xlu0 %875 }
 0x8f8   :  { %5480 = vmatprep.subr.msk.bf16.mxu0 %vm374_vm5, %v880_v5  ;;  %v809_v15 = vmul.f32 %v5645_v7, %v5637_v53 }
 0x8f9   :  { %v812_v19 = vpack.c.bf16 %v810_v9, %v810_v9 }
 0x8fa   :  { %v5647_v8 = vpop.eup %5646 }
 0x8fb   :  { %v808_v12 = vmul.f32 %v5647_v8, %v5641_v58 }
 0x8fd   :  { %v811_v16 = vpack.c.bf16 %v809_v15, %v808_v12 }
 0x8ff   :  { %5118 = vmatprep.mubr.msk.bf16.mxu0 %vm438_vm7, %v811_v16 }
 0x900   :  { %5119 = vmatmul.mubr.msk.bf16.vlgmr.msra.gmra.mrb[12].mxu0 %vm438_vm7, %v812_v19 }
 0x901   :  { %5123 = vmatpush3.bf16.xpose.msra.mxu0 %v890_v26  ;;  %5126 = vmatprep.mubr.msk.bf16.mxu0 %vm374_vm5, %v876_v23 }
 0x902   :  { %5481 = vmatprep.subr.msk.bf16.mxu0 %vm374_vm5, %v882_v27  ;;  %v6241_v27 = vld [vmem:[%s7129_s8] sm:$0xff]  }
 0x909   :  { %5125 = vmatpush3.bf16.xpose.msra.mxu0 %v893_v28  ;;  %v6248_v28 = vld [vmem:[%s7129_s8 + $0x8] sm:$0xff]  }
 0x90a   :  { %5146 = vmatprep.subr.bf16.mxu0 %v5988_v10 }
 0x910   :  { %5127 = vmatmul.mubr.msk.bf16.vlgmr.msra.gmra.mrb[16].mxu0 %vm374_vm5, %v878_v29 }
 0x911   :  { %5147 = vmatpush3.bf16.msra.mxu0 %v5988_v10  ;;  %5150 = vmatprep.mubr.msk.bf16.mxu0 %vm218_vm3, %v1173_v6 }
 0x912   :  { %5148 = vmatprep.subr.bf16.mxu0 %v5993_v11 }
 0x915   :  { %5149 = vmatpush3.bf16.msra.mxu0 %v5993_v11 }
 0x918   :  { %5151 = vmatmul.mubr.msk.bf16.vlgmr.msra.gmra.mrb[20].mxu0 %vm218_vm3, %v1174_v30 }
 0x9d3   :  { %v5120_v31 = vpop.f32.mrb[12].mxu0 }
 0x9d4   :  { %v861_v32 = vpop.f32.mrb[13].mxu0 }
 0x9d5   :  { %v5121_v33 = vpop.f32.mrb[14].mxu0 }
 0x9d6   :  { %v864_v34 = vpop.f32.mrb[15].mxu0 }
 0x9d7   :  { %v5529_v35 = vpack.i.bf16 %v864_v34, %v861_v32 }
 0x9e3   :  { %v5128_v10 = vpop.f32.mrb[16].mxu0 }
 0x9e4   :  { %v929_v36 = vpop.f32.mrb[17].mxu0  ;;  %v945_v6 = vmul.f32 0.35355338, %v5128_v10 }
 0x9e5   :  { %v943_v39 = vmul.f32 0.35355338, %v929_v36  ;;  %v5129_v1 = vpop.f32.mrb[18].mxu0 }
 0x9e6   :  { %v932_v2 = vpop.f32.mrb[19].mxu0  ;;  %v952_v45 = vsel %vm445_vm6, %v945_v6, -inf }
 0x9e7   :  { %v944_v43 = vmul.f32 0.35355338, %v932_v2  ;;  %v946_v44 = vsel %vm438_vm7, %v943_v39, -inf }
 0x9e8   :  { %947 = vmax.xlane.f32.xlu0 %v946_v44 }
 0x9e9   :  { %v949_v11 = vsel %vm438_vm7, %v944_v43, -inf }
 0x9ea   :  { %950 = vmax.xlane.f32.xlu1 %v949_v11 }
 0x9eb   :  { %v6215_v3 = vpop.f32.mrb[20].mxu0 }
 0x9ec   :  { %953 = vmax.xlane.f32.xlu0 %v952_v45  ;;  %v1215_v46 = vpop.f32.mrb[21].mxu0  ;;  %v6255_v32 = vpack.c.bf16 %v6215_v3, %v6215_v3 }
 0x9ed   :  { %v5153_v48 = vpop.f32.mrb[22].mxu0 }
 0x9ee   :  { %v1218_v49 = vpop.f32.mrb[23].mxu0 }
 0x9ef   :  { %v6218_v50 = vpack.c.bf16 %v1218_v49, %v1215_v46 }
 0xa75   :  { %v948_v51 = vpop.xlane.xlu0 %947 }
 0xa76   :  { %v955_v54 = vsub.f32 %v943_v39, %v948_v51 }
 0xa77   :  { %v951_v53 = vpop.xlane.xlu1 %950 }
 0xa78   :  { %v956_v55 = vsub.f32 %v944_v43, %v951_v53  ;;  %v958_v60 = vmul.f32 1.442695, %v955_v54 }
 0xa79   :  { %v954_v57 = vpop.xlane.xlu0 %953 }
 0xa7a   :  { %v960_v58 = vmul.f32 1.442695, %v956_v55  ;;  %v957_v59 = vsub.f32 %v945_v6, %v954_v57 }
 0xa7c   :  { %5648 = vpow2.f32 %v960_v58  ;;  %v962_v61 = vmul.f32 1.442695, %v957_v59 }
 0xa7e   :  { %5650 = vpow2.f32 %v962_v61 }
 0xa7f   :  { %5652 = vpow2.f32 %v958_v60 }
 0xa86   :  { %v5649_v62 = vpop.eup %5648 }
 0xa87   :  { %v967_v63 = vsel %vm438_vm7, %v5649_v62, 0.0 }
 0xa88   :  { %v5651_v0 = vpop.eup %5650  ;;  %968 = vadd.xlane.f32.xlu1 %v967_v63 }
 0xa89   :  { %v970_v4 = vsel %vm445_vm6, %v5651_v0, 0.0  ;;  %v5653_v5 = vpop.eup %5652 }
 0xa8a   :  { %971 = vadd.xlane.f32.xlu0 %v970_v4  ;;  %v964_v7 = vsel %vm438_vm7, %v5653_v5, 0.0 }
 0xa8e   :  { %965 = vadd.xlane.f32.xlu0 %v964_v7 }
 0xa99   :  { %981 = vrot.lane.b32.xlu1 %v6088_v13, %s7149_s2 }
 0xa9d   :  { %5525 = vrot.lane.b32.xlu1 %v5524_v25, %s7147_s25 }
 0xaa1   :  { %1050 = vrot.lane.b32.xlu1 %v6167_v21, %s7147_s25  ;;  %s7171_s25 = smov 40  }
 0xaa4   :  { %983 = vrot.lane.b32.xlu0 %v6094_v14, %s7149_s2  ;;  %s7151_s2 = smov 24  }
 0xaa5   :  { %1062 = vrot.lane.b32.xlu1 %v5120_v31, %s7145_s3 }
 0xaa8   :  { %5530 = vrot.lane.b32.xlu0 %v5529_v35, %s7145_s3  ;;  %s7172_s3 = smov 8  }
 0xb15   :  { %v969_v8 = vpop.xlane.xlu1 %968 }
 0xb17   :  { %v972_v9 = vpop.xlane.xlu0 %971 }
 0xb18   :  { %5654 = vrcp.f32 %v972_v9 }
 0xb19   :  { %v982_v13 = vpop.permute.xlu1 %981  ;;  %5656 = vrcp.f32 %v969_v8 }
 0xb1a   :  { %5130 = vmatprep.subr.bf16.mxu1 %v982_v13 }
 0xb1b   :  { %v966_v12 = vpop.xlane.xlu0 %965  ;;  %5131 = vmatpush3.bf16.msra.mxu1 %v982_v13 }
 0xb1c   :  { %5658 = vrcp.f32 %v966_v12 }
 0xb1d   :  { %v5526_v35 = vpop.permute.xlu1 %5525 }
 0xb1e   :  { %v5528_v1 = vunpack.i.h.bf16 %v5526_v35  ;;  %v5527_v2 = vunpack.i.l.bf16 %v5526_v35 }
 0xb1f   :  { %v984_v22 = vpop.permute.xlu0 %983 }
 0xb20   :  { %v993_v21 = vand.u32 %v984_v22, %v6123_v56  ;;  %v1080_v11 = vsel %vm374_vm5, %v6138_v20, %v5528_v1  ;;  %v1079_v46 = vsel %vm374_vm5, %v6136_v18, %v5527_v2 }
 0xb21   :  { %v1051_v10 = vpop.permute.xlu1 %1050 }
 0xb22   :  { %5132 = vmatprep.subr.bf16.mxu1 %v993_v21  ;;  %v5655_v24 = vpop.eup %5654  ;;  %v1081_v3 = vsel %vm374_vm5, %v6134_v17, %v1051_v10 }
 0xb23   :  { %5133 = vmatpush3.bf16.msra.mxu1 %v993_v21  ;;  %v5657_v14 = vpop.eup %5656  ;;  %v978_v15 = vmul.f32 %v5655_v24, %v5651_v0  ;;  %v5531_v36 = vpop.permute.xlu0 %5530 }
 0xb24   :  { %v977_v19 = vmul.f32 %v5657_v14, %v5649_v62  ;;  %5138 = vmatprep.subr.bf16.mxu1 %v6241_v27  ;;  %v5533_v6 = vunpack.i.h.bf16 %v5531_v36  ;;  %v5532_v43 = vunpack.i.l.bf16 %v5531_v36 }
 0xb25   :  { %v980_v26 = vpack.c.bf16 %v978_v15, %v978_v15  ;;  %v1063_v39 = vpop.permute.xlu1 %1062 }
 0xb26   :  { %v5659_v25 = vpop.eup %5658  ;;  %v1085_v48 = vsel %vm1082_vm8, %v1081_v3, %v1063_v39  ;;  %v1083_v53 = vsel %vm1082_vm8, %v1079_v46, %v5532_v43  ;;  %v1084_v54 = vsel %vm1082_vm8, %v1080_v11, %v5533_v6 }
 0xb27   :  { %v976_v16 = vmul.f32 %v5659_v25, %v5653_v5 }
 0xb29   :  { %v979_v23 = vpack.c.bf16 %v977_v19, %v976_v16 }
 0xb2b   :  { %5134 = vmatprep.mubr.msk.bf16.mxu1 %vm438_vm7, %v979_v23 }
 0xb2c   :  { %5135 = vmatmul.mubr.msk.bf16.vlgmr.msra.gmra.mrb[16].mxu1 %vm438_vm7, %v980_v26 }
 0xb2d   :  { %5139 = vmatpush3.bf16.msra.mxu1 %v6241_v27 }
 0xb2e   :  { %5140 = vmatprep.subr.bf16.mxu1 %v6248_v28 }
 0xb31   :  { %5141 = vmatpush3.bf16.msra.mxu1 %v6248_v28 }
 0xbff   :  { %v5136_v29 = vpop.f32.mrb[16].mxu1 }
 0xc00   :  { %1074 = vrot.lane.b32.xlu1 %v5136_v29, %s7151_s2  ;;  %v1029_v30 = vpop.f32.mrb[17].mxu1 }
 0xc01   :  { %v5137_v31 = vpop.f32.mrb[18].mxu1 }
 0xc02   :  { %v1032_v33 = vpop.f32.mrb[19].mxu1 }
 0xc03   :  { %v5534_v34 = vpack.i.bf16 %v1032_v33, %v1029_v30 }
 0xc04   :  { %1235 = vrot.lane.b32.xlu1 %v6255_v32, %s5836_s28 }
 0xc05   :  { %5535 = vrot.lane.b32.xlu0 %v5534_v34, %s7151_s2 }
 0xc09   :  { %1233 = vrot.lane.b32.xlu0 %v6218_v50, %s5836_s28 }
 0xc72   :  { %v1075_v44 = vpop.permute.xlu1 %1074 }
 0xc73   :  { %v1089_v55 = vsel %vm1086_vm9, %v1085_v48, %v1075_v44 }
 0xc74   :  { %v1091_v59 = vpack.c.bf16 %v1089_v55, %v1089_v55 }
 0xc76   :  { %v1236_v60 = vpop.permute.xlu1 %1235 }
 0xc77   :  { %v5536_v45 = vpop.permute.xlu0 %5535  ;;  %v1247_v61 = vsel %vm374_vm5, %v1236_v60, 0 }
 0xc78   :  { %v5538_v49 = vunpack.i.h.bf16 %v5536_v45  ;;  %v5537_v51 = vunpack.i.l.bf16 %v5536_v45 }
 0xc7a   :  { %v1087_v57 = vsel %vm1086_vm9, %v1083_v53, %v5537_v51  ;;  %v1088_v20 = vsel %vm1086_vm9, %v1084_v54, %v5538_v49 }
 0xc7b   :  { %v1234_v58 = vpop.permute.xlu0 %1233  ;;  %v1090_v17 = vpack.c.bf16 %v1088_v20, %v1087_v57 }
 0xc7c   :  { %5482 = vmatprep.subr.msk.bf16.mxu1 %vm374_vm5, %v1234_v58  ;;  %v1244_v18 = vsel %vm374_vm5, %v1234_v58, 0 }
 0xc7d   :  { %5142 = vmatprep.mubr.msk.bf16.mxu1 %vm218_vm3, %v1090_v17 }
 0xc7e   :  { %5143 = vmatmul.mubr.msk.bf16.vlgmr.msra.gmra.mrb[20].mxu1 %vm218_vm3, %v1091_v59 }
 0xc7f   :  { %5155 = vmatpush3.bf16.xpose.msra.mxu1 %v1244_v18  ;;  %5158 = vmatprep.mubr.msk.bf16.mxu1 %vm374_vm5, %v6218_v50 }
 0xc80   :  { %5483 = vmatprep.subr.msk.bf16.mxu1 %vm374_vm5, %v1236_v60 }
 0xc87   :  { %5157 = vmatpush3.bf16.xpose.msra.mxu1 %v1247_v61 }
 0xc8e   :  { %5159 = vmatmul.mubr.msk.bf16.vlgmr.msra.gmra.mrb[24].mxu1 %vm374_vm5, %v6255_v32 }
 0xd51   :  { %v6284_v62 = vpop.f32.mrb[20].mxu1 }
 0xd52   :  { %v6286_v63 = vpop.f32.mrb[21].mxu1 }
 0xd53   :  { %v5145_v0 = vpop.f32.mrb[22].mxu1 }
 0xd54   :  { %v6288_v4 = vpop.f32.mrb[23].mxu1 }
 0xd61   :  { %v5160_v5 = vpop.f32.mrb[24].mxu1 }
 0xd62   :  { %v1283_v7 = vpop.f32.mrb[25].mxu1  ;;  %v1299_v12 = vmul.f32 0.35355338, %v5160_v5 }
 0xd63   :  { %v1297_v8 = vmul.f32 0.35355338, %v1283_v7  ;;  %v5161_v9 = vpop.f32.mrb[26].mxu1 }
 0xd64   :  { %v1286_v13 = vpop.f32.mrb[27].mxu1  ;;  %v1306_v14 = vsel %vm445_vm6, %v1299_v12, -inf }
 0xd65   :  { %v1298_v22 = vmul.f32 0.35355338, %v1286_v13  ;;  %v1300_v21 = vsel %vm438_vm7, %v1297_v8, -inf }
 0xd66   :  { %1301 = vmax.xlane.f32.xlu0 %v1300_v21 }
 0xd67   :  { %v1303_v24 = vsel %vm438_vm7, %v1298_v22, -inf }
 0xd68   :  { %1304 = vmax.xlane.f32.xlu1 %v1303_v24 }
 0xd6a   :  { %1307 = vmax.xlane.f32.xlu0 %v1306_v14 }
 0xd79   :  { %1335 = vrot.lane.b32.xlu1 %v6218_v50, %s5838_s29 }
 0xdf3   :  { %v1302_v25 = vpop.xlane.xlu0 %1301 }
 0xdf4   :  { %v1309_v16 = vsub.f32 %v1297_v8, %v1302_v25 }
 0xdf5   :  { %v1305_v15 = vpop.xlane.xlu1 %1304 }
 0xdf6   :  { %v1310_v19 = vsub.f32 %v1298_v22, %v1305_v15  ;;  %v1312_v31 = vmul.f32 1.442695, %v1309_v16 }
 0xdf7   :  { %v1308_v23 = vpop.xlane.xlu0 %1307 }
 0xdf8   :  { %v1314_v26 = vmul.f32 1.442695, %v1310_v19  ;;  %v1311_v29 = vsub.f32 %v1299_v12, %v1308_v23 }
 0xdf9   :  { %v1336_v30 = vpop.permute.xlu1 %1335 }
 0xdfa   :  { %5660 = vpow2.f32 %v1314_v26  ;;  %v1316_v33 = vmul.f32 1.442695, %v1311_v29  ;;  %5162 = vmatprep.subr.bf16.mxu0 %v1336_v30 }
 0xdfb   :  { %5163 = vmatpush3.bf16.msra.mxu0 %v1336_v30 }
 0xdfc   :  { %5662 = vpow2.f32 %v1316_v33 }
 0xdfd   :  { %5664 = vpow2.f32 %v1312_v31 }
 0xe04   :  { %v5661_v34 = vpop.eup %5660 }
 0xe05   :  { %v1321_v35 = vsel %vm438_vm7, %v5661_v34, 0.0 }
 0xe06   :  { %v5663_v10 = vpop.eup %5662  ;;  %1322 = vadd.xlane.f32.xlu1 %v1321_v35 }
 0xe07   :  { %v1324_v36 = vsel %vm445_vm6, %v5663_v10, 0.0  ;;  %v5665_v39 = vpop.eup %5664 }
 0xe08   :  { %1325 = vadd.xlane.f32.xlu0 %v1324_v36  ;;  %v1318_v1 = vsel %vm438_vm7, %v5665_v39, 0.0 }
 0xe0c   :  { %1319 = vadd.xlane.f32.xlu0 %v1318_v1 }
 0xe17   :  { %1401 = vrot.lane.b32.xlu1 %v6218_v50, %s5837_s4 }
 0xe1b   :  { %1403 = vrot.lane.b32.xlu1 %v6255_v32, %s5837_s4 }
 0xe1f   :  { %1399 = vrot.lane.b32.xlu1 %v6255_v32, %s5839_s30 }
 0xe22   :  { %1337 = vrot.lane.b32.xlu0 %v6255_v32, %s5838_s29 }
 0xe26   :  { %1397 = vrot.lane.b32.xlu0 %v6218_v50, %s5839_s30 }
 0xe93   :  { %v1323_v2 = vpop.xlane.xlu1 %1322 }
 0xe95   :  { %v1326_v6 = vpop.xlane.xlu0 %1325 }
 0xe96   :  { %5666 = vrcp.f32 %v1326_v6 }
 0xe97   :  { %5668 = vrcp.f32 %v1323_v2  ;;  %v1402_v45 = vpop.permute.xlu1 %1401 }
 0xe98   :  { %v1412_v20 = vsel %vm374_vm5, %v1402_v45, 0 }
 0xe99   :  { %v1320_v43 = vpop.xlane.xlu0 %1319 }
 0xe9a   :  { %5670 = vrcp.f32 %v1320_v43 }
 0xe9b   :  { %v1404_v58 = vpop.permute.xlu1 %1403 }
 0xe9c   :  { %v1415_v17 = vsel %vm374_vm5, %v1404_v58, 0 }
 0xe9d   :  { %v1338_v44 = vpop.permute.xlu0 %1337 }
 0xe9e   :  { %v1347_v11 = vand.u32 %v1338_v44, %v6123_v56 }
 0xe9f   :  { %v1400_v59 = vpop.permute.xlu1 %1399 }
 0xea0   :  { %5164 = vmatprep.subr.bf16.mxu0 %v1347_v11  ;;  %v5667_v3 = vpop.eup %5666 }
 0xea1   :  { %5165 = vmatpush3.bf16.msra.mxu0 %v1347_v11  ;;  %v5669_v46 = vpop.eup %5668  ;;  %v1332_v49 = vmul.f32 %v5667_v3, %v5663_v10  ;;  %v1398_v57 = vpop.permute.xlu0 %1397 }
 0xea2   :  { %5484 = vmatprep.subr.msk.bf16.mxu0 %vm374_vm5, %v1402_v45  ;;  %v1331_v53 = vmul.f32 %v5669_v46, %v5661_v34 }
 0xea3   :  { %v1334_v55 = vpack.c.bf16 %v1332_v49, %v1332_v49 }
 0xea4   :  { %v5671_v48 = vpop.eup %5670 }
 0xea5   :  { %v1330_v51 = vmul.f32 %v5671_v48, %v5665_v39 }
 0xea7   :  { %v1333_v54 = vpack.c.bf16 %v1331_v53, %v1330_v51 }
 0xea9   :  { %5166 = vmatprep.mubr.msk.bf16.mxu0 %vm438_vm7, %v1333_v54 }
 0xeaa   :  { %5167 = vmatmul.mubr.msk.bf16.vlgmr.msra.gmra.mrb[24].mxu0 %vm438_vm7, %v1334_v55 }
 0xeab   :  { %5171 = vmatpush3.bf16.xpose.msra.mxu0 %v1412_v20  ;;  %5174 = vmatprep.mubr.msk.bf16.mxu0 %vm374_vm5, %v1398_v57 }
 0xeac   :  { %5485 = vmatprep.subr.msk.bf16.mxu0 %vm374_vm5, %v1404_v58 }
 0xeb3   :  { %5173 = vmatpush3.bf16.xpose.msra.mxu0 %v1415_v17 }
 0xeba   :  { %5175 = vmatmul.mubr.msk.bf16.vlgmr.msra.gmra.mrb[28].mxu0 %vm374_vm5, %v1400_v59 }
 0xf7d   :  { %v6317_v18 = vpop.f32.mrb[24].mxu0 }
 0xf7e   :  { %v6319_v60 = vpop.f32.mrb[25].mxu0 }
 0xf7f   :  { %v5169_v61 = vpop.f32.mrb[26].mxu0 }
 0xf80   :  { %v6321_v0 = vpop.f32.mrb[27].mxu0 }
 0xf8d   :  { %v5176_v5 = vpop.f32.mrb[28].mxu0 }
 0xf8e   :  { %v1451_v7 = vpop.f32.mrb[29].mxu0  ;;  %v1467_v12 = vmul.f32 0.35355338, %v5176_v5 }
 0xf8f   :  { %v1465_v8 = vmul.f32 0.35355338, %v1451_v7  ;;  %v5177_v9 = vpop.f32.mrb[30].mxu0 }
 0xf90   :  { %v1454_v13 = vpop.f32.mrb[31].mxu0  ;;  %v1474_v14 = vsel %vm445_vm6, %v1467_v12, -inf }
 0xf91   :  { %v1466_v22 = vmul.f32 0.35355338, %v1454_v13  ;;  %v1468_v21 = vsel %vm438_vm7, %v1465_v8, -inf }
 0xf92   :  { %1469 = vmax.xlane.f32.xlu0 %v1468_v21 }
 0xf93   :  { %v1471_v24 = vsel %vm438_vm7, %v1466_v22, -inf }
 0xf94   :  { %1472 = vmax.xlane.f32.xlu1 %v1471_v24 }
 0xf96   :  { %1475 = vmax.xlane.f32.xlu0 %v1474_v14 }
 0xfa5   :  { %1503 = vrot.lane.b32.xlu1 %v6218_v50, %s5841_s0 }
0x101f   :  { %v1470_v25 = vpop.xlane.xlu0 %1469 }
0x1020   :  { %v1477_v16 = vsub.f32 %v1465_v8, %v1470_v25 }
0x1021   :  { %v1473_v15 = vpop.xlane.xlu1 %1472 }
0x1022   :  { %v1478_v19 = vsub.f32 %v1466_v22, %v1473_v15  ;;  %v1480_v31 = vmul.f32 1.442695, %v1477_v16 }
0x1023   :  { %v1476_v23 = vpop.xlane.xlu0 %1475 }
0x1024   :  { %v1482_v26 = vmul.f32 1.442695, %v1478_v19  ;;  %v1479_v29 = vsub.f32 %v1467_v12, %v1476_v23 }
0x1025   :  { %v1504_v30 = vpop.permute.xlu1 %1503 }
0x1026   :  { %5672 = vpow2.f32 %v1482_v26  ;;  %v1484_v33 = vmul.f32 1.442695, %v1479_v29  ;;  %5178 = vmatprep.subr.bf16.mxu1 %v1504_v30 }
0x1027   :  { %5179 = vmatpush3.bf16.msra.mxu1 %v1504_v30 }
0x1028   :  { %5674 = vpow2.f32 %v1484_v33 }
0x1029   :  { %5676 = vpow2.f32 %v1480_v31 }
0x1030   :  { %v5673_v34 = vpop.eup %5672 }
0x1031   :  { %v1489_v35 = vsel %vm438_vm7, %v5673_v34, 0.0 }
0x1032   :  { %v5675_v10 = vpop.eup %5674  ;;  %1490 = vadd.xlane.f32.xlu1 %v1489_v35 }
0x1033   :  { %v1492_v36 = vsel %vm445_vm6, %v5675_v10, 0.0  ;;  %v5677_v39 = vpop.eup %5676 }
0x1034   :  { %1493 = vadd.xlane.f32.xlu0 %v1492_v36  ;;  %v1486_v1 = vsel %vm438_vm7, %v5677_v39, 0.0 }
0x1038   :  { %1487 = vadd.xlane.f32.xlu0 %v1486_v1 }
0x1043   :  { %1569 = vrot.lane.b32.xlu1 %v6218_v50, %s5842_s21 }
0x1047   :  { %1571 = vrot.lane.b32.xlu1 %v6255_v32, %s5842_s21 }
0x104b   :  { %1567 = vrot.lane.b32.xlu1 %v6255_v32, %s7159_s1 }
0x104e   :  { %1505 = vrot.lane.b32.xlu0 %v6255_v32, %s5841_s0 }
0x1052   :  { %1565 = vrot.lane.b32.xlu0 %v6218_v50, %s7159_s1  ;;  %s7178_s1 = smov 24  }
0x10bf   :  { %v1491_v2 = vpop.xlane.xlu1 %1490 }
0x10c1   :  { %v1494_v6 = vpop.xlane.xlu0 %1493 }
0x10c2   :  { %5678 = vrcp.f32 %v1494_v6 }
0x10c3   :  { %5680 = vrcp.f32 %v1491_v2  ;;  %v1570_v45 = vpop.permute.xlu1 %1569 }
0x10c4   :  { %v1580_v20 = vsel %vm374_vm5, %v1570_v45, 0 }
0x10c5   :  { %v1488_v43 = vpop.xlane.xlu0 %1487 }
0x10c6   :  { %5682 = vrcp.f32 %v1488_v43 }
0x10c7   :  { %v1572_v58 = vpop.permute.xlu1 %1571 }
0x10c8   :  { %v1583_v17 = vsel %vm374_vm5, %v1572_v58, 0 }
0x10c9   :  { %v1506_v44 = vpop.permute.xlu0 %1505 }
0x10ca   :  { %v1515_v11 = vand.u32 %v1506_v44, %v6123_v56 }
0x10cb   :  { %v1568_v59 = vpop.permute.xlu1 %1567 }
0x10cc   :  { %5180 = vmatprep.subr.bf16.mxu1 %v1515_v11  ;;  %v5679_v3 = vpop.eup %5678 }
0x10cd   :  { %5181 = vmatpush3.bf16.msra.mxu1 %v1515_v11  ;;  %v5681_v46 = vpop.eup %5680  ;;  %v1500_v49 = vmul.f32 %v5679_v3, %v5675_v10  ;;  %v1566_v57 = vpop.permute.xlu0 %1565 }
0x10ce   :  { %5486 = vmatprep.subr.msk.bf16.mxu1 %vm374_vm5, %v1570_v45  ;;  %v1499_v53 = vmul.f32 %v5681_v46, %v5673_v34 }
0x10cf   :  { %v1502_v55 = vpack.c.bf16 %v1500_v49, %v1500_v49 }
0x10d0   :  { %v5683_v48 = vpop.eup %5682 }
0x10d1   :  { %v1498_v51 = vmul.f32 %v5683_v48, %v5677_v39 }
0x10d3   :  { %v1501_v54 = vpack.c.bf16 %v1499_v53, %v1498_v51 }
0x10d5   :  { %5182 = vmatprep.mubr.msk.bf16.mxu1 %vm438_vm7, %v1501_v54 }
0x10d6   :  { %5183 = vmatmul.mubr.msk.bf16.vlgmr.msra.gmra.mrb[28].mxu1 %vm438_vm7, %v1502_v55 }
0x10d7   :  { %5187 = vmatpush3.bf16.xpose.msra.mxu1 %v1580_v20  ;;  %5190 = vmatprep.mubr.msk.bf16.mxu1 %vm374_vm5, %v1566_v57 }
0x10d8   :  { %5487 = vmatprep.subr.msk.bf16.mxu1 %vm374_vm5, %v1572_v58 }
0x10df   :  { %5189 = vmatpush3.bf16.xpose.msra.mxu1 %v1583_v17 }
0x10e6   :  { %5191 = vmatmul.mubr.msk.bf16.vlgmr.msra.gmra.mrb[32].mxu1 %vm374_vm5, %v1568_v59 }
0x11a9   :  { %v6350_v61 = vpop.f32.mrb[28].mxu1 }
0x11aa   :  { %v6352_v5 = vpop.f32.mrb[29].mxu1 }
0x11ab   :  { %v5185_v7 = vpop.f32.mrb[30].mxu1 }
0x11ac   :  { %v6354_v8 = vpop.f32.mrb[31].mxu1 }
0x11ad   :  { %v5539_v9 = vpack.i.bf16 %v6354_v8, %v6352_v5 }
0x11b9   :  { %v5192_v13 = vpop.f32.mrb[32].mxu1 }
0x11ba   :  { %v1619_v12 = vpop.f32.mrb[33].mxu1  ;;  %v1635_v14 = vmul.f32 0.35355338, %v5192_v13 }
0x11bb   :  { %v1633_v22 = vmul.f32 0.35355338, %v1619_v12  ;;  %v5193_v21 = vpop.f32.mrb[34].mxu1 }
0x11bc   :  { %v1622_v24 = vpop.f32.mrb[35].mxu1  ;;  %v1642_v19 = vsel %vm445_vm6, %v1635_v14, -inf }
0x11bd   :  { %v1634_v25 = vmul.f32 0.35355338, %v1622_v24  ;;  %v1636_v15 = vsel %vm438_vm7, %v1633_v22, -inf }
0x11be   :  { %1637 = vmax.xlane.f32.xlu0 %v1636_v15 }
0x11bf   :  { %v1639_v16 = vsel %vm438_vm7, %v1634_v25, -inf }
0x11c0   :  { %1640 = vmax.xlane.f32.xlu1 %v1639_v16 }
0x11c2   :  { %1643 = vmax.xlane.f32.xlu0 %v1642_v19 }
0x11d1   :  { %1671 = vrot.lane.b32.xlu1 %v6218_v50, %s7157_s22 }
0x124b   :  { %v1638_v23 = vpop.xlane.xlu0 %1637 }
0x124c   :  { %v1645_v29 = vsub.f32 %v1633_v22, %v1638_v23 }
0x124d   :  { %v1641_v26 = vpop.xlane.xlu1 %1640 }
0x124e   :  { %v1646_v30 = vsub.f32 %v1634_v25, %v1641_v26  ;;  %v1648_v10 = vmul.f32 1.442695, %v1645_v29 }
0x124f   :  { %v1644_v31 = vpop.xlane.xlu0 %1643 }
0x1250   :  { %v1650_v33 = vmul.f32 1.442695, %v1646_v30  ;;  %v1647_v34 = vsub.f32 %v1635_v14, %v1644_v31 }
0x1251   :  { %v1672_v35 = vpop.permute.xlu1 %1671 }
0x1252   :  { %5684 = vpow2.f32 %v1650_v33  ;;  %v1652_v36 = vmul.f32 1.442695, %v1647_v34  ;;  %5194 = vmatprep.subr.bf16.mxu0 %v1672_v35 }
0x1253   :  { %5195 = vmatpush3.bf16.msra.mxu0 %v1672_v35 }
0x1254   :  { %5686 = vpow2.f32 %v1652_v36 }
0x1255   :  { %5688 = vpow2.f32 %v1648_v10 }
0x125c   :  { %v5685_v39 = vpop.eup %5684 }
0x125d   :  { %v1657_v1 = vsel %vm438_vm7, %v5685_v39, 0.0 }
0x125e   :  { %v5687_v2 = vpop.eup %5686  ;;  %1658 = vadd.xlane.f32.xlu1 %v1657_v1 }
0x125f   :  { %v1660_v6 = vsel %vm445_vm6, %v5687_v2, 0.0  ;;  %v5689_v43 = vpop.eup %5688 }
0x1260   :  { %1661 = vadd.xlane.f32.xlu0 %v1660_v6  ;;  %v1654_v44 = vsel %vm438_vm7, %v5689_v43, 0.0 }
0x1264   :  { %1655 = vadd.xlane.f32.xlu0 %v1654_v44 }
0x126f   :  { %1737 = vrot.lane.b32.xlu1 %v6218_v50, %s7155_s24 }
0x1273   :  { %1739 = vrot.lane.b32.xlu1 %v6255_v32, %s7155_s24 }
0x1277   :  { %1735 = vrot.lane.b32.xlu1 %v6255_v32, %s7153_s23 }
0x127a   :  { %1673 = vrot.lane.b32.xlu0 %v6255_v32, %s7157_s22  ;;  %s7176_s22 = smov 72  }
0x127e   :  { %1733 = vrot.lane.b32.xlu0 %v6218_v50, %s7153_s23 }
0x12eb   :  { %v1659_v11 = vpop.xlane.xlu1 %1658 }
0x12ed   :  { %v1662_v3 = vpop.xlane.xlu0 %1661 }
0x12ee   :  { %5690 = vrcp.f32 %v1662_v3 }
0x12ef   :  { %5692 = vrcp.f32 %v1659_v11  ;;  %v1738_v51 = vpop.permute.xlu1 %1737 }
0x12f0   :  { %v1748_v7 = vsel %vm374_vm5, %v1738_v51, 0 }
0x12f1   :  { %v1656_v45 = vpop.xlane.xlu0 %1655 }
0x12f2   :  { %5694 = vrcp.f32 %v1656_v45 }
0x12f3   :  { %v1740_v13 = vpop.permute.xlu1 %1739 }
0x12f4   :  { %v1751_v12 = vsel %vm374_vm5, %v1740_v13, 0 }
0x12f5   :  { %v1674_v46 = vpop.permute.xlu0 %1673 }
0x12f6   :  { %v1683_v48 = vand.u32 %v1674_v46, %v6123_v56 }
0x12f7   :  { %v1736_v22 = vpop.permute.xlu1 %1735 }
0x12f8   :  { %5196 = vmatprep.subr.bf16.mxu0 %v1683_v48  ;;  %v5691_v49 = vpop.eup %5690 }
0x12f9   :  { %5197 = vmatpush3.bf16.msra.mxu0 %v1683_v48  ;;  %v5693_v53 = vpop.eup %5692  ;;  %v1668_v55 = vmul.f32 %v5691_v49, %v5687_v2  ;;  %v1734_v59 = vpop.permute.xlu0 %1733 }
0x12fa   :  { %5488 = vmatprep.subr.msk.bf16.mxu0 %vm374_vm5, %v1738_v51  ;;  %v1667_v20 = vmul.f32 %v5693_v53, %v5685_v39 }
0x12fb   :  { %v1670_v17 = vpack.c.bf16 %v1668_v55, %v1668_v55 }
0x12fc   :  { %v5695_v54 = vpop.eup %5694 }
0x12fd   :  { %v1666_v57 = vmul.f32 %v5695_v54, %v5689_v43 }
0x12ff   :  { %v1669_v58 = vpack.c.bf16 %v1667_v20, %v1666_v57 }
0x1301   :  { %5198 = vmatprep.mubr.msk.bf16.mxu0 %vm438_vm7, %v1669_v58 }
0x1302   :  { %5199 = vmatmul.mubr.msk.bf16.vlgmr.msra.gmra.mrb[32].mxu0 %vm438_vm7, %v1670_v17 }
0x1303   :  { %5203 = vmatpush3.bf16.xpose.msra.mxu0 %v1748_v7  ;;  %5206 = vmatprep.mubr.msk.bf16.mxu0 %vm374_vm5, %v1734_v59 }
0x1304   :  { %5489 = vmatprep.subr.msk.bf16.mxu0 %vm374_vm5, %v1740_v13 }
0x130b   :  { %5205 = vmatpush3.bf16.xpose.msra.mxu0 %v1751_v12 }
0x1312   :  { %5207 = vmatmul.mubr.msk.bf16.vlgmr.msra.gmra.mrb[36].mxu0 %vm374_vm5, %v1736_v22 }
0x13d5   :  { %v5200_v21 = vpop.f32.mrb[32].mxu0 }
0x13d6   :  { %v1719_v24 = vpop.f32.mrb[33].mxu0 }
0x13d7   :  { %v5201_v14 = vpop.f32.mrb[34].mxu0 }
0x13d8   :  { %v1722_v25 = vpop.f32.mrb[35].mxu0 }
0x13d9   :  { %v5544_v15 = vpack.i.bf16 %v1722_v25, %v1719_v24 }
0x13e5   :  { %v5208_v16 = vpop.f32.mrb[36].mxu0 }
0x13e6   :  { %v1787_v19 = vpop.f32.mrb[37].mxu0  ;;  %v1803_v30 = vmul.f32 0.35355338, %v5208_v16 }
0x13e7   :  { %v1801_v23 = vmul.f32 0.35355338, %v1787_v19  ;;  %v5209_v26 = vpop.f32.mrb[38].mxu0 }
0x13e8   :  { %v1790_v29 = vpop.f32.mrb[39].mxu0  ;;  %v1810_v35 = vsel %vm445_vm6, %v1803_v30, -inf }
0x13e9   :  { %v1802_v31 = vmul.f32 0.35355338, %v1790_v29  ;;  %v1804_v33 = vsel %vm438_vm7, %v1801_v23, -inf }
0x13ea   :  { %1805 = vmax.xlane.f32.xlu0 %v1804_v33 }
0x13eb   :  { %v1807_v34 = vsel %vm438_vm7, %v1802_v31, -inf }
0x13ec   :  { %1808 = vmax.xlane.f32.xlu1 %v1807_v34 }
0x13ee   :  { %1811 = vmax.xlane.f32.xlu0 %v1810_v35 }
0x1477   :  { %v1806_v10 = vpop.xlane.xlu0 %1805 }
0x1478   :  { %v1813_v39 = vsub.f32 %v1801_v23, %v1806_v10 }
0x1479   :  { %v1809_v36 = vpop.xlane.xlu1 %1808 }
0x147a   :  { %v1814_v1 = vsub.f32 %v1802_v31, %v1809_v36  ;;  %v1816_v44 = vmul.f32 1.442695, %v1813_v39 }
0x147b   :  { %v1812_v2 = vpop.xlane.xlu0 %1811 }
0x147c   :  { %v1818_v6 = vmul.f32 1.442695, %v1814_v1  ;;  %v1815_v43 = vsub.f32 %v1803_v30, %v1812_v2 }
0x147e   :  { %5696 = vpow2.f32 %v1818_v6  ;;  %v1820_v11 = vmul.f32 1.442695, %v1815_v43  ;;  %v6434_v6 = vld [vmem:[%s7133_s12 + $0x8] sm:$0xff]   ;;  %v6444_v43 = vld [vmem:[%s7135_s14] sm:$0xff]  }
0x1480   :  { %5698 = vpow2.f32 %v1820_v11  ;;  %v4710_v11 = vld [vmem:[%s7130_s9] ss:$0 sm:$0xff] }
0x1481   :  { %5700 = vpow2.f32 %v1816_v44  ;;  %v6449_v44 = vld [vmem:[%s7135_s14 + $0x8] sm:$0xff]  }
0x1488   :  { %v5697_v3 = vpop.eup %5696 }
0x1489   :  { %v1825_v45 = vsel %vm438_vm7, %v5697_v3, 0.0 }
0x148a   :  { %v5699_v46 = vpop.eup %5698  ;;  %1826 = vadd.xlane.f32.xlu1 %v1825_v45  ;;  %v1151_v45 = vadd.f32 %v4710_v11, %v6286_v63 }
0x148b   :  { %v1828_v48 = vsel %vm445_vm6, %v5699_v46, 0.0  ;;  %v5701_v49 = vpop.eup %5700 }
0x148c   :  { %1829 = vadd.xlane.f32.xlu0 %v1828_v48  ;;  %v1822_v51 = vsel %vm438_vm7, %v5701_v49, 0.0  ;;  %v1159_v48 = vadd.f32 %v6284_v62, %v4710_v11 }
0x1490   :  { %1823 = vadd.xlane.f32.xlu0 %v1822_v51 }
0x149b   :  { %1839 = vrot.lane.b32.xlu1 %v6218_v50, %s7171_s25 }
0x149f   :  { %5540 = vrot.lane.b32.xlu1 %v5539_v9, %s7172_s3 }
0x14a3   :  { %1908 = vrot.lane.b32.xlu1 %v6350_v61, %s7172_s3 }
0x14a6   :  { %1841 = vrot.lane.b32.xlu0 %v6255_v32, %s7171_s25 }
0x14a7   :  { %1920 = vrot.lane.b32.xlu1 %v5200_v21, %s7173_s26 }
0x14aa   :  { %5545 = vrot.lane.b32.xlu0 %v5544_v15, %s7173_s26 }
0x1517   :  { %v1827_v53 = vpop.xlane.xlu1 %1826 }
0x1519   :  { %v1830_v54 = vpop.xlane.xlu0 %1829 }
0x151a   :  { %5702 = vrcp.f32 %v1830_v54 }
0x151b   :  { %v1840_v55 = vpop.permute.xlu1 %1839  ;;  %5704 = vrcp.f32 %v1827_v53  ;;  %v6470_v53 = vadd.f32 %v1159_v48, %v6024_v41 }
0x151c   :  { %5210 = vmatprep.subr.bf16.mxu1 %v1840_v55 }
0x151d   :  { %v1824_v50 = vpop.xlane.xlu0 %1823  ;;  %5211 = vmatpush3.bf16.msra.mxu1 %v1840_v55  ;;  %v2024_v41 = vsel %vm222_vm4, %v6470_v53, 0.0 }
0x151e   :  { %5706 = vrcp.f32 %v1824_v50 }
0x151f   :  { %v5541_v24 = vpop.permute.xlu1 %5540 }
0x1520   :  { %v5543_v16 = vunpack.i.h.bf16 %v5541_v24  ;;  %v5542_v19 = vunpack.i.l.bf16 %v5541_v24 }
0x1521   :  { %v1842_v5 = vpop.permute.xlu0 %1841 }
0x1522   :  { %v1851_v8 = vand.u32 %v1842_v5, %v6123_v56  ;;  %v1937_v31 = vsel %vm374_vm5, %v6319_v60, %v5542_v19  ;;  %v6429_v60 = vld [vmem:[%s7133_s12] sm:$0xff]  }
0x1523   :  { %v1909_v14 = vpop.permute.xlu1 %1908  ;;  %5226 = vmatprep.subr.bf16.mxu0 %v6429_v60 }
0x1524   :  { %5212 = vmatprep.subr.bf16.mxu1 %v1851_v8  ;;  %v5703_v61 = vpop.eup %5702  ;;  %v1939_v29 = vsel %vm374_vm5, %v6317_v18, %v1909_v14  ;;  %5227 = vmatpush3.bf16.msra.mxu0 %v6429_v60 }
0x1525   :  { %5213 = vmatpush3.bf16.msra.mxu1 %v1851_v8  ;;  %v5705_v32 = vpop.eup %5704  ;;  %v1836_v57 = vmul.f32 %v5703_v61, %v5699_v46  ;;  %v5546_v25 = vpop.permute.xlu0 %5545  ;;  %5228 = vmatprep.subr.bf16.mxu0 %v6434_v6 }
0x1526   :  { %5218 = vmatprep.subr.bf16.mxu1 %v6241_v27  ;;  %v1835_v58 = vmul.f32 %v5705_v32, %v5697_v3  ;;  %v5547_v23 = vunpack.i.l.bf16 %v5546_v25  ;;  %v1154_v3 = vadd.f32 %v4710_v11, %v6288_v4 }
0x1527   :  { %v1838_v59 = vpack.c.bf16 %v1836_v57, %v1836_v57  ;;  %v1921_v15 = vpop.permute.xlu1 %1920 }
0x1528   :  { %v5707_v9 = vpop.eup %5706  ;;  %v1942_v33 = vsel %vm1082_vm8, %v1939_v29, %v1921_v15  ;;  %v1940_v10 = vsel %vm1082_vm8, %v1937_v31, %v5547_v23  ;;  %5229 = vmatpush3.bf16.msra.mxu0 %v6434_v6  ;;  %v6461_v46 = vadd.f32 %v1154_v3, %v6046_v52 }
0x1529   :  { %v1834_v20 = vmul.f32 %v5707_v9, %v5701_v49  ;;  %5246 = vmatprep.subr.bf16.mxu0 %v6429_v60  ;;  %v6465_v49 = vadd.f32 %v1151_v45, %v6022_v40  ;;  %v2034_v40 = vmul.f32 %v6470_v53, %v6470_v53 }
0x152a   :  { %v2033_v51 = vmul.f32 %v6461_v46, %v6461_v46  ;;  %v2022_v63 = vsel %vm218_vm3, %v6461_v46, 0.0 }
0x152b   :  { %v1837_v17 = vpack.c.bf16 %v1835_v58, %v1834_v20  ;;  %v2032_v54 = vmul.f32 %v6465_v49, %v6465_v49  ;;  %v2021_v52 = vsel %vm218_vm3, %v6465_v49, 0.0  ;;  %v2038_v8 = vsel %vm222_vm4, %v2034_v40, 0.0 }
0x152c   :  { %v2036_v62 = vsel %vm218_vm3, %v2033_v51, 0.0  ;;  %v2023_v4 = vadd.f32 %v2022_v63, %v2021_v52 }
0x152d   :  { %5214 = vmatprep.mubr.msk.bf16.mxu1 %vm438_vm7, %v1837_v17  ;;  %v2035_v55 = vsel %vm218_vm3, %v2032_v54, 0.0 }
0x152e   :  { %5215 = vmatmul.mubr.msk.bf16.vlgmr.msra.gmra.mrb[36].mxu1 %vm438_vm7, %v1838_v59  ;;  %v2037_v50 = vadd.f32 %v2036_v62, %v2035_v55  ;;  %v2025_v5 = vadd.f32 %v2024_v41, %v2023_v4 }
0x152f   :  { %5219 = vmatpush3.bf16.msra.mxu1 %v6241_v27  ;;  %v5548_v27 = vunpack.i.h.bf16 %v5546_v25 }
0x1530   :  { %5220 = vmatprep.subr.bf16.mxu1 %v6248_v28  ;;  %v2039_v32 = vadd.f32 %v2038_v8, %v2037_v50  ;;  %v2026_v17 = vrot.slane %v2025_v5, 4 }
0x1532   :  { %v2027_v14 = vadd.f32 %v2026_v17, %v2025_v5 }
0x1533   :  { %5221 = vmatpush3.bf16.msra.mxu1 %v6248_v28  ;;  %v1938_v28 = vsel %vm374_vm5, %v6321_v0, %v5543_v16 }
0x1534   :  { %v1941_v36 = vsel %vm1082_vm8, %v1938_v28, %v5548_v27  ;;  %5234 = vmatprep.subr.bf16.mxu1 %v6444_v43 }
0x1601   :  { %v5216_v7 = vpop.f32.mrb[36].mxu1 }
0x1602   :  { %1932 = vrot.lane.b32.xlu1 %v5216_v7, %s7151_s2  ;;  %v1887_v13 = vpop.f32.mrb[37].mxu1 }
0x1603   :  { %v5217_v12 = vpop.f32.mrb[38].mxu1 }
0x1604   :  { %v1890_v22 = vpop.f32.mrb[39].mxu1 }
0x1605   :  { %v5549_v21 = vpack.i.bf16 %v1890_v22, %v1887_v13  ;;  %v2040_v22 = vrot.slane %v2039_v32, 4 }
0x1607   :  { %5550 = vrot.lane.b32.xlu0 %v5549_v21, %s7151_s2  ;;  %v2041_v16 = vadd.f32 %v2040_v22, %v2039_v32  ;;  %v2019_v32 = vld [vmem:[%s7131_s10] sm:$0x1]  ;;  %s7177_s2 = smov 104  }
0x1609   :  { %v2042_v31 = vrot.slane %v2041_v16, 2 }
0x1674   :  { %v1933_v26 = vpop.permute.xlu1 %1932 }
0x1675   :  { %v1945_v39 = vsel %vm1086_vm9, %v1942_v33, %v1933_v26  ;;  %v2028_v26 = vrot.slane %v2027_v14, 2 }
0x1676   :  { %v1947_v18 = vpack.c.bf16 %v1945_v39, %v1945_v39  ;;  %v2043_v39 = vadd.f32 %v2042_v31, %v2041_v16 }
0x1678   :  { %v2044_v3 = vrot.slane %v2043_v39, 1 }
0x1679   :  { %v5551_v30 = vpop.permute.xlu0 %5550 }
0x167a   :  { %v5553_v34 = vunpack.i.h.bf16 %v5551_v30  ;;  %v5552_v35 = vunpack.i.l.bf16 %v5551_v30  ;;  %v2045_v52 = vadd.f32 %v2044_v3, %v2043_v39 }
0x167c   :  { %v1943_v1 = vsel %vm1086_vm9, %v1940_v10, %v5552_v35  ;;  %v1944_v0 = vsel %vm1086_vm9, %v1941_v36, %v5553_v34  ;;  %v2029_v35 = vadd.f32 %v2028_v26, %v2027_v14 }
0x167d   :  { %v1946_v2 = vpack.c.bf16 %v1944_v0, %v1943_v1 }
0x167f   :  { %5222 = vmatprep.mubr.msk.bf16.mxu1 %vm218_vm3, %v1946_v2  ;;  %v2030_v2 = vrot.slane %v2029_v35, 1 }
0x1680   :  { %5223 = vmatmul.mubr.msk.bf16.vlgmr.msra.gmra.mrb[40].mxu1 %vm218_vm3, %v1947_v18 }
0x1681   :  { %5235 = vmatpush3.bf16.msra.mxu1 %v6444_v43  ;;  %v2031_v51 = vadd.f32 %v2030_v2, %v2029_v35 }
0x1682   :  { %5236 = vmatprep.subr.bf16.mxu1 %v6449_v44 }
0x1685   :  { %5237 = vmatpush3.bf16.msra.mxu1 %v6449_v44 }
0x1753   :  { %v5224_v61 = vpop.f32.mrb[40].mxu1 }
0x1754   :  { %v1997_v9 = vadd.f32 %v5224_v61, %v4710_v11  ;;  %v1988_v57 = vpop.f32.mrb[41].mxu1 }
0x1755   :  { %v1989_v20 = vadd.f32 %v4710_v11, %v1988_v57  ;;  %v5225_v58 = vpop.f32.mrb[42].mxu1 }
0x1756   :  { %v1991_v59 = vpop.f32.mrb[43].mxu1  ;;  %v6486_v7 = vadd.f32 %v1997_v9, %v6017_v38 }
0x1757   :  { %v6489_v13 = vadd.f32 %v1989_v20, %v6015_v37  ;;  %v1992_v12 = vadd.f32 %v4710_v11, %v1991_v59  ;;  %v2020_v20 = vld [vmem:[%s7132_s11] sm:$0x1] }
0x1758   :  { %v2060_v25 = vmul.f32 %v6486_v7, %v6486_v7  ;;  %v2049_v27 = vsel %vm222_vm4, %v6486_v7, 0.0 }
0x1759   :  { %v2058_v21 = vmul.f32 %v6489_v13, %v6489_v13  ;;  %v6494_v24 = vadd.f32 %v1992_v12, %v6028_v42  ;;  %v2046_v15 = vsel %vm218_vm3, %v6489_v13, 0.0 }
0x175a   :  { %v2064_v30 = vsel %vm222_vm4, %v2060_v25, 0.0 }
0x175b   :  { %v2047_v38 = vsel %vm218_vm3, %v6494_v24, 0.0  ;;  %v2059_v37 = vmul.f32 %v6494_v24, %v6494_v24  ;;  %v2061_v42 = vsel %vm218_vm3, %v2058_v21, 0.0 }
0x175c   :  { %v2048_v19 = vadd.f32 %v2047_v38, %v2046_v15 }
0x175d   :  { %v2062_v23 = vsel %vm218_vm3, %v2059_v37, 0.0 }
0x175e   :  { %v2050_v28 = vadd.f32 %v2049_v27, %v2048_v19  ;;  %v2063_v29 = vadd.f32 %v2062_v23, %v2061_v42 }
0x1760   :  { %v2051_v33 = vrot.slane %v2050_v28, 4  ;;  %v2065_v34 = vadd.f32 %v2064_v30, %v2063_v29 }
0x1762   :  { %v2052_v10 = vadd.f32 %v2051_v33, %v2050_v28  ;;  %v2066_v36 = vrot.slane %v2065_v34, 4 }
0x1764   :  { %v2053_v1 = vrot.slane %v2052_v10, 2  ;;  %v2067_v0 = vadd.f32 %v2066_v36, %v2065_v34 }
0x1766   :  { %v2054_v18 = vadd.f32 %v2053_v1, %v2052_v10  ;;  %v2068_v11 = vrot.slane %v2067_v0, 2 }
0x1768   :  { %v2055_v45 = vrot.slane %v2054_v18, 1  ;;  %v2069_v48 = vadd.f32 %v2068_v11, %v2067_v0 }
0x176a   :  { %v2056_v54 = vadd.f32 %v2055_v45, %v2054_v18  ;;  %v2070_v63 = vrot.slane %v2069_v48, 1 }
0x176c   :  { %v2057_v62 = vadd.f32 %v2056_v54, %v2031_v51  ;;  %v2071_v4 = vadd.f32 %v2070_v63, %v2069_v48 }
0x176e   :  { %v2072_v40 = vadd.f32 %v2071_v4, %v2045_v52  ;;  %v2073_v55 = vmul.f32 0.029411765, %v2057_v62 }
0x1770   :  { %v2074_v50 = vmul.f32 0.029411765, %v2072_v40  ;;  %v2075_v41 = vmul.f32 %v2073_v55, %v2073_v55 }
0x1772   :  { %v2076_v5 = vsub.f32 %v2074_v50, %v2075_v41  ;;  %v6550_v50 = vld [vmem:[%s7128_s7 + $0x10] sm:$0xff]   ;;  %v6555_v41 = vld [vmem:[%s7128_s7 + $0x18] sm:$0xff]  }
0x1774   :  { %v2077_v8 = vmax.f32 %v2076_v5, 0.0  ;;  %v4740_v5 = vld [vmem:[%s7136_s15] ss:$0 sm:$0xff] }
0x1776   :  { %v2078_v61 = vadd.f32 1e-05, %v2077_v8 }
0x1778   :  { %5708 = vrsqrt.f32 %v2078_v61 }
0x1782   :  { %v5709_v9 = vpop.eup %5708 }
0x1783   :  { %v2080_v57 = vmul.f32 %v5709_v9, %v2019_v32 }
0x1785   :  { %v2081_v58 = vmul.f32 %v2080_v57, %v2073_v55  ;;  %v2086_v17 = vrot.slane %v2080_v57, %v6065_v47 }
0x1787   :  { %v2082_v59 = vsub.f32 %v2020_v20, %v2081_v58  ;;  %v2087_v12 = vmul.f32 %v2086_v17, %v6465_v49  ;;  %v2088_v22 = vmul.f32 %v2086_v17, %v6461_v46  ;;  %v2089_v14 = vmul.f32 %v2086_v17, %v6470_v53 }
0x1788   :  { %v2265_v25 = vmul.f32 %v2086_v17, %v6489_v13  ;;  %v2266_v15 = vmul.f32 %v2086_v17, %v6494_v24  ;;  %v2267_v28 = vmul.f32 %v2086_v17, %v6486_v7 }
0x1789   :  { %v2094_v21 = vrot.slane %v2082_v59, %v6065_v47 }
0x178b   :  { %v2096_v38 = vadd.f32 %v2094_v21, %v2087_v12  ;;  %v2097_v37 = vadd.f32 %v2094_v21, %v2088_v22  ;;  %v2098_v16 = vadd.f32 %v2094_v21, %v2089_v14  ;;  %v2268_v19 = vadd.f32 %v2265_v25, %v2094_v21 }
0x178c   :  { %v2269_v27 = vadd.f32 %v2266_v15, %v2094_v21  ;;  %v2270_v29 = vadd.f32 %v2267_v28, %v2094_v21 }
0x178d   :  { %v2099_v42 = vpack.c.bf16 %v2097_v37, %v2096_v38  ;;  %v2100_v23 = vpack.c.bf16 %v2098_v16, %v2098_v16 }
0x178e   :  { %v2271_v26 = vpack.c.bf16 %v2269_v27, %v2268_v19  ;;  %v2272_v30 = vpack.c.bf16 %v2270_v29, %v2270_v29 }
0x178f   :  { %5230 = vmatprep.mubr.msk.bf16.mxu0 %vm218_vm3, %v2099_v42 }
0x1790   :  { %5231 = vmatmul.mubr.msk.bf16.vlgmr.msra.gmra.mrb[40].mxu0 %vm218_vm3, %v2100_v23 }
0x1791   :  { %5247 = vmatpush3.bf16.msra.mxu0 %v6429_v60  ;;  %5250 = vmatprep.mubr.msk.bf16.mxu0 %vm218_vm3, %v2271_v26  ;;  %v5596_v60 = vld [vmem:[%s7135_s14 + $0x10] sm:$0xff]  }
0x1792   :  { %5248 = vmatprep.subr.bf16.mxu0 %v6434_v6  ;;  %5238 = vmatprep.subr.bf16.mxu1 %v5596_v60 }
0x1793   :  { %5239 = vmatpush3.bf16.msra.mxu1 %v5596_v60 }
0x1795   :  { %5249 = vmatpush3.bf16.msra.mxu0 %v6434_v6  ;;  %v5597_v6 = vld [vmem:[%s7135_s14 + $0x18] sm:$0xff]  }
0x1796   :  { %5254 = vmatprep.subr.bf16.mxu0 %v6444_v43  ;;  %5240 = vmatprep.subr.bf16.mxu1 %v5597_v6 }
0x1797   :  { %5241 = vmatpush3.bf16.msra.mxu1 %v5597_v6 }
0x1798   :  { %5251 = vmatmul.mubr.msk.bf16.vlgmr.msra.gmra.mrb[44].mxu0 %vm218_vm3, %v2272_v30  ;;  %5266 = vmatprep.subr.bf16.mxu1 %v6550_v50 }
0x1799   :  { %5255 = vmatpush3.bf16.msra.mxu0 %v6444_v43  ;;  %v4735_v43 = vld [vmem:[%s7134_s13] ss:$0 sm:$0xff] }
0x179a   :  { %5256 = vmatprep.subr.bf16.mxu0 %v6449_v44 }
0x179d   :  { %5257 = vmatpush3.bf16.msra.mxu0 %v6449_v44 }
0x179e   :  { %5258 = vmatprep.subr.bf16.mxu0 %v5596_v60 }
0x17a1   :  { %5259 = vmatpush3.bf16.msra.mxu0 %v5596_v60 }
0x17a2   :  { %5260 = vmatprep.subr.bf16.mxu0 %v5597_v6 }
0x17a5   :  { %5261 = vmatpush3.bf16.msra.mxu0 %v5597_v6 }
0x1863   :  { %v5232_v44 = vpop.f32.mrb[40].mxu0 }
0x1864   :  { %v2168_v31 = vadd.f32 %v5232_v44, %v4735_v43  ;;  %v2159_v33 = vpop.f32.mrb[41].mxu0 }
0x1865   :  { %v2160_v34 = vadd.f32 %v4735_v43, %v2159_v33  ;;  %v5233_v35 = vpop.f32.mrb[42].mxu0 }
0x1866   :  { %v2162_v10 = vpop.f32.mrb[43].mxu0  ;;  %v2175_v39 = vmax.f32 %v2168_v31, 0.0 }
0x1867   :  { %v2163_v36 = vadd.f32 %v4735_v43, %v2162_v10  ;;  %v2173_v1 = vmax.f32 %v2160_v34, 0.0 }
0x1868   :  { %v2177_v11 = vpack.c.bf16 %v2175_v39, %v2175_v39 }
0x1869   :  { %v2174_v0 = vmax.f32 %v2163_v36, 0.0 }
0x186b   :  { %v2176_v2 = vpack.c.bf16 %v2174_v0, %v2173_v1  ;;  %v5252_v18 = vpop.f32.mrb[44].mxu0 }
0x186c   :  { %v2322_v3 = vadd.f32 %v5252_v18, %v4735_v43  ;;  %v2313_v45 = vpop.f32.mrb[45].mxu0 }
0x186d   :  { %v2314_v48 = vadd.f32 %v4735_v43, %v2313_v45  ;;  %5242 = vmatprep.mubr.msk.bf16.mxu1 %vm112_vm0, %v2176_v2  ;;  %v5253_v51 = vpop.f32.mrb[46].mxu0 }
0x186e   :  { %5243 = vmatmul.mubr.msk.bf16.vlgmr.msra.gmra.mrb[44].mxu1 %vm112_vm0, %v2177_v11  ;;  %v2316_v54 = vpop.f32.mrb[47].mxu0  ;;  %v2329_v52 = vmax.f32 %v2322_v3, 0.0 }
0x186f   :  { %v2317_v63 = vadd.f32 %v4735_v43, %v2316_v54  ;;  %v2327_v62 = vmax.f32 %v2314_v48, 0.0  ;;  %5267 = vmatpush3.bf16.msra.mxu1 %v6550_v50 }
0x1870   :  { %v2331_v55 = vpack.c.bf16 %v2329_v52, %v2329_v52  ;;  %5268 = vmatprep.subr.bf16.mxu1 %v6555_v41 }
0x1871   :  { %v2328_v4 = vmax.f32 %v2317_v63, 0.0 }
0x1873   :  { %v2330_v40 = vpack.c.bf16 %v2328_v4, %v2327_v62  ;;  %5269 = vmatpush3.bf16.msra.mxu1 %v6555_v41 }
0x1875   :  { %5262 = vmatprep.mubr.msk.bf16.mxu0 %vm112_vm0, %v2330_v40 }
0x1876   :  { %5263 = vmatmul.mubr.msk.bf16.vlgmr.msra.gmra.mrb[48].mxu0 %vm112_vm0, %v2331_v55 }
0x1941   :  { %v5244_v8 = vpop.f32.mrb[44].mxu1 }
0x1942   :  { %v2257_v61 = vadd.f32 %v5244_v8, %v4740_v5  ;;  %v2248_v32 = vpop.f32.mrb[45].mxu1 }
0x1943   :  { %v2249_v9 = vadd.f32 %v4740_v5, %v2248_v32  ;;  %v5245_v57 = vpop.f32.mrb[46].mxu1 }
0x1944   :  { %v2251_v20 = vpop.f32.mrb[47].mxu1  ;;  %v6565_v58 = vadd.f32 %v2257_v61, %v6470_v53 }
0x1945   :  { %v6568_v17 = vadd.f32 %v2249_v9, %v6465_v49  ;;  %v2252_v59 = vadd.f32 %v4740_v5, %v2251_v20 }
0x1946   :  { %v2418_v21 = vmul.f32 %v6565_v58, %v6565_v58 }
0x1947   :  { %v2416_v12 = vmul.f32 %v6568_v17, %v6568_v17  ;;  %v6573_v22 = vadd.f32 %v2252_v59, %v6461_v46  ;;  %v2405_v14 = vsel %vm218_vm3, %v6568_v17, 0.0  ;;  %v2408_v46 = vsel %vm222_vm4, %v6565_v58, 0.0 }
0x1948   :  { %v2422_v29 = vsel %vm222_vm4, %v2418_v21, 0.0 }
0x1949   :  { %v2406_v53 = vsel %vm218_vm3, %v6573_v22, 0.0  ;;  %v2417_v49 = vmul.f32 %v6573_v22, %v6573_v22  ;;  %v5264_v25 = vpop.f32.mrb[48].mxu0  ;;  %v2419_v16 = vsel %vm218_vm3, %v2416_v12, 0.0 }
0x194a   :  { %v2407_v15 = vadd.f32 %v2406_v53, %v2405_v14  ;;  %v2381_v38 = vadd.f32 %v5264_v25, %v4740_v5  ;;  %v2372_v37 = vpop.f32.mrb[49].mxu0 }
0x194b   :  { %v2420_v19 = vsel %vm218_vm3, %v2417_v49, 0.0  ;;  %v2373_v27 = vadd.f32 %v4740_v5, %v2372_v37  ;;  %v5265_v42 = vpop.f32.mrb[50].mxu0 }
0x194c   :  { %v2409_v23 = vadd.f32 %v2408_v46, %v2407_v15  ;;  %v2421_v26 = vadd.f32 %v2420_v19, %v2419_v16  ;;  %v2375_v28 = vpop.f32.mrb[51].mxu0  ;;  %v6589_v30 = vadd.f32 %v2381_v38, %v6486_v7  ;;  %v4760_v19 = vld [vmem:[%s7126_s5 + $0x1] sm:$0x1]  ;;  %s7174_s5 = smov 112  }
0x194d   :  { %v6592_v60 = vadd.f32 %v2373_v27, %v6489_v13  ;;  %v2376_v6 = vadd.f32 %v4740_v5, %v2375_v28 }
0x194e   :  { %v2410_v43 = vrot.slane %v2409_v23, 4  ;;  %v2423_v44 = vadd.f32 %v2422_v29, %v2421_v26  ;;  %v2444_v10 = vmul.f32 %v6589_v30, %v6589_v30 }
0x194f   :  { %v2442_v31 = vmul.f32 %v6592_v60, %v6592_v60  ;;  %v6597_v33 = vadd.f32 %v2376_v6, %v6494_v24  ;;  %v2430_v7 = vsel %vm218_vm3, %v6592_v60, 0.0  ;;  %v2433_v24 = vsel %vm222_vm4, %v6589_v30, 0.0 }
0x1950   :  { %v2411_v34 = vadd.f32 %v2410_v43, %v2409_v23  ;;  %v2424_v35 = vrot.slane %v2423_v44, 4  ;;  %v2448_v45 = vsel %vm222_vm4, %v2444_v10, 0.0  ;;  %v4761_v23 = vld [vmem:[%s7127_s6 + $0x1] sm:$0x1]  ;;  %s7175_s6 = smov 48  }
0x1951   :  { %v2431_v13 = vsel %vm218_vm3, %v6597_v33, 0.0  ;;  %v2443_v36 = vmul.f32 %v6597_v33, %v6597_v33  ;;  %v2445_v0 = vsel %vm218_vm3, %v2442_v31, 0.0 }
0x1952   :  { %v2425_v39 = vadd.f32 %v2424_v35, %v2423_v44  ;;  %v2432_v1 = vadd.f32 %v2431_v13, %v2430_v7  ;;  %v2412_v18 = vrot.slane %v2411_v34, 2 }
0x1953   :  { %v2446_v2 = vsel %vm218_vm3, %v2443_v36, 0.0 }
0x1954   :  { %v2434_v11 = vadd.f32 %v2433_v24, %v2432_v1  ;;  %v2447_v3 = vadd.f32 %v2446_v2, %v2445_v0  ;;  %v2426_v48 = vrot.slane %v2425_v39, 2  ;;  %v2413_v63 = vadd.f32 %v2412_v18, %v2411_v34 }
0x1956   :  { %v2435_v51 = vrot.slane %v2434_v11, 4  ;;  %v2449_v54 = vadd.f32 %v2448_v45, %v2447_v3  ;;  %v2427_v4 = vadd.f32 %v2426_v48, %v2425_v39  ;;  %v2414_v5 = vrot.slane %v2413_v63, 1 }
0x1958   :  { %v2436_v52 = vadd.f32 %v2435_v51, %v2434_v11  ;;  %v2450_v62 = vrot.slane %v2449_v54, 4  ;;  %v2428_v32 = vrot.slane %v2427_v4, 1  ;;  %v2415_v20 = vadd.f32 %v2414_v5, %v2413_v63 }
0x195a   :  { %v2437_v40 = vrot.slane %v2436_v52, 2  ;;  %v2451_v55 = vadd.f32 %v2450_v62, %v2449_v54  ;;  %v2429_v21 = vadd.f32 %v2428_v32, %v2427_v4 }
0x195c   :  { %v2438_v8 = vadd.f32 %v2437_v40, %v2436_v52  ;;  %v2452_v61 = vrot.slane %v2451_v55, 2 }
0x195e   :  { %v2439_v9 = vrot.slane %v2438_v8, 1  ;;  %v2453_v57 = vadd.f32 %v2452_v61, %v2451_v55 }
0x1960   :  { %v2440_v59 = vadd.f32 %v2439_v9, %v2438_v8  ;;  %v2454_v12 = vrot.slane %v2453_v57, 1 }
0x1962   :  { %v2441_v14 = vadd.f32 %v2440_v59, %v2415_v20  ;;  %v2455_v53 = vadd.f32 %v2454_v12, %v2453_v57 }
0x1964   :  { %v2456_v49 = vadd.f32 %v2455_v53, %v2429_v21  ;;  %v2457_v25 = vmul.f32 0.029411765, %v2441_v14 }
0x1966   :  { %v2458_v15 = vmul.f32 0.029411765, %v2456_v49  ;;  %v2459_v38 = vmul.f32 %v2457_v25, %v2457_v25 }
0x1968   :  { %v2460_v37 = vsub.f32 %v2458_v15, %v2459_v38 }
0x196a   :  { %v2461_v46 = vmax.f32 %v2460_v37, 0.0 }
0x196c   :  { %v2462_v16 = vadd.f32 1e-05, %v2461_v46 }
0x196e   :  { %5710 = vrsqrt.f32 %v2462_v16 }
0x1978   :  { %v5711_v27 = vpop.eup %5710 }
0x1979   :  { %v2464_v42 = vmul.f32 %v5711_v27, %v4760_v19 }
0x197b   :  { %v2465_v26 = vmul.f32 %v2464_v42, %v2457_v25  ;;  %v2470_v28 = vrot.slane %v2464_v42, %v6065_v47 }
0x197d   :  { %v2466_v29 = vsub.f32 %v4761_v23, %v2465_v26  ;;  %v2471_v6 = vmul.f32 %v2470_v28, %v6568_v17  ;;  %v2472_v43 = vmul.f32 %v2470_v28, %v6573_v22  ;;  %v2473_v31 = vmul.f32 %v2470_v28, %v6565_v58 }
0x197e   :  { %v3345_v34 = vmul.f32 %v2470_v28, %v6592_v60  ;;  %v3346_v35 = vmul.f32 %v2470_v28, %v6597_v33  ;;  %v3347_v10 = vmul.f32 %v2470_v28, %v6589_v30 }
0x197f   :  { %v2478_v44 = vrot.slane %v2466_v29, %v6065_v47 }
0x1981   :  { %v2480_v7 = vadd.f32 %v2478_v44, %v2471_v6  ;;  %v2481_v13 = vadd.f32 %v2478_v44, %v2472_v43  ;;  %v2482_v36 = vadd.f32 %v2478_v44, %v2473_v31  ;;  %v6626_v39 = vadd.f32 %v3345_v34, %v2478_v44 }
0x1982   :  { %v6628_v1 = vadd.f32 %v3346_v35, %v2478_v44  ;;  %v6630_v24 = vadd.f32 %v3347_v10, %v2478_v44 }
0x1983   :  { %v2483_v0 = vpack.c.bf16 %v2481_v13, %v2480_v7  ;;  %v2484_v2 = vpack.c.bf16 %v2482_v36, %v2482_v36 }
0x1984   :  { %v3351_v18 = vpack.c.bf16 %v6628_v1, %v6626_v39 }
0x1985   :  { %5270 = vmatprep.mubr.msk.bf16.mxu1 %vm218_vm3, %v2483_v0 }
0x1986   :  { %5271 = vmatmul.mubr.msk.bf16.vlgmr.msra.gmra.mrb[48].mxu1 %vm218_vm3, %v2484_v2 }
0x1a59   :  { %v5272_v11 = vpop.f32.mrb[48].mxu1 }
0x1a5a   :  { %v6636_v3 = vpack.c.bf16 %v5272_v11, %v5272_v11  ;;  %v2537_v45 = vpop.f32.mrb[49].mxu1 }
0x1a5b   :  { %v5273_v48 = vpop.f32.mrb[50].mxu1 }
0x1a5c   :  { %2557 = vrot.lane.b32.xlu1 %v6636_v3, %s5836_s28  ;;  %v2540_v51 = vpop.f32.mrb[51].mxu1 }
0x1a5d   :  { %v6640_v54 = vpack.c.bf16 %v2540_v51, %v2537_v45 }
0x1a5f   :  { %2555 = vrot.lane.b32.xlu0 %v6640_v54, %s5836_s28  ;;  %5278 = vmatprep.mubr.msk.bf16.mxu1 %vm374_vm5, %v6640_v54 }
0x1ace   :  { %v2558_v62 = vpop.permute.xlu1 %2557 }
0x1acf   :  { %v2569_v4 = vsel %vm374_vm5, %v2558_v62, 0 }
0x1ad1   :  { %v2556_v63 = vpop.permute.xlu0 %2555 }
0x1ad2   :  { %5490 = vmatprep.subr.msk.bf16.mxu1 %vm374_vm5, %v2556_v63  ;;  %v2566_v52 = vsel %vm374_vm5, %v2556_v63, 0 }
0x1ad3   :  { %5275 = vmatpush3.bf16.xpose.msra.mxu1 %v2566_v52 }
0x1ad4   :  { %5491 = vmatprep.subr.msk.bf16.mxu1 %vm374_vm5, %v2558_v62 }
0x1adb   :  { %5277 = vmatpush3.bf16.xpose.msra.mxu1 %v2569_v4 }
0x1ae2   :  { %5279 = vmatmul.mubr.msk.bf16.vlgmr.msra.gmra.mrb[52].mxu1 %vm374_vm5, %v6636_v3 }
0x1bb5   :  { %v5280_v40 = vpop.f32.mrb[52].mxu1 }
0x1bb6   :  { %v2605_v55 = vpop.f32.mrb[53].mxu1  ;;  %v2621_v32 = vmul.f32 0.35355338, %v5280_v40 }
0x1bb7   :  { %v2619_v5 = vmul.f32 0.35355338, %v2605_v55  ;;  %v5281_v8 = vpop.f32.mrb[54].mxu1 }
0x1bb8   :  { %v2608_v61 = vpop.f32.mrb[55].mxu1  ;;  %v2628_v59 = vsel %vm445_vm6, %v2621_v32, -inf }
0x1bb9   :  { %v2620_v9 = vmul.f32 0.35355338, %v2608_v61  ;;  %v2622_v57 = vsel %vm438_vm7, %v2619_v5, -inf }
0x1bba   :  { %2623 = vmax.xlane.f32.xlu0 %v2622_v57 }
0x1bbb   :  { %v2625_v20 = vsel %vm438_vm7, %v2620_v9, -inf }
0x1bbc   :  { %2626 = vmax.xlane.f32.xlu1 %v2625_v20 }
0x1bbe   :  { %2629 = vmax.xlane.f32.xlu0 %v2628_v59 }
0x1bcd   :  { %2657 = vrot.lane.b32.xlu1 %v6640_v54, %s5838_s29 }
0x1c47   :  { %v2624_v12 = vpop.xlane.xlu0 %2623 }
0x1c48   :  { %v2631_v14 = vsub.f32 %v2619_v5, %v2624_v12 }
0x1c49   :  { %v2627_v21 = vpop.xlane.xlu1 %2626 }
0x1c4a   :  { %v2632_v53 = vsub.f32 %v2620_v9, %v2627_v21  ;;  %v2634_v37 = vmul.f32 1.442695, %v2631_v14 }
0x1c4b   :  { %v2630_v49 = vpop.xlane.xlu0 %2629 }
0x1c4c   :  { %v2636_v25 = vmul.f32 1.442695, %v2632_v53  ;;  %v2633_v15 = vsub.f32 %v2621_v32, %v2630_v49 }
0x1c4d   :  { %v2658_v38 = vpop.permute.xlu1 %2657 }
0x1c4e   :  { %5712 = vpow2.f32 %v2636_v25  ;;  %v2638_v46 = vmul.f32 1.442695, %v2633_v15  ;;  %5282 = vmatprep.subr.bf16.mxu0 %v2658_v38 }
0x1c4f   :  { %5283 = vmatpush3.bf16.msra.mxu0 %v2658_v38 }
0x1c50   :  { %5714 = vpow2.f32 %v2638_v46 }
0x1c51   :  { %5716 = vpow2.f32 %v2634_v37 }
0x1c58   :  { %v5713_v16 = vpop.eup %5712 }
0x1c59   :  { %v2643_v19 = vsel %vm438_vm7, %v5713_v16, 0.0 }
0x1c5a   :  { %v5715_v27 = vpop.eup %5714  ;;  %2644 = vadd.xlane.f32.xlu1 %v2643_v19 }
0x1c5b   :  { %v2646_v42 = vsel %vm445_vm6, %v5715_v27, 0.0  ;;  %v5717_v23 = vpop.eup %5716 }
0x1c5c   :  { %2647 = vadd.xlane.f32.xlu0 %v2646_v42  ;;  %v2640_v26 = vsel %vm438_vm7, %v5717_v23, 0.0 }
0x1c60   :  { %2641 = vadd.xlane.f32.xlu0 %v2640_v26 }
0x1c6b   :  { %2723 = vrot.lane.b32.xlu1 %v6640_v54, %s5837_s4 }
0x1c6f   :  { %2725 = vrot.lane.b32.xlu1 %v6636_v3, %s5837_s4 }
0x1c73   :  { %2721 = vrot.lane.b32.xlu1 %v6636_v3, %s5839_s30 }
0x1c76   :  { %2659 = vrot.lane.b32.xlu0 %v6636_v3, %s5838_s29 }
0x1c7a   :  { %2719 = vrot.lane.b32.xlu0 %v6640_v54, %s5839_s30 }
0x1ce7   :  { %v2645_v28 = vpop.xlane.xlu1 %2644 }
0x1ce9   :  { %v2648_v29 = vpop.xlane.xlu0 %2647 }
0x1cea   :  { %5718 = vrcp.f32 %v2648_v29 }
0x1ceb   :  { %5720 = vrcp.f32 %v2645_v28  ;;  %v2724_v34 = vpop.permute.xlu1 %2723 }
0x1cec   :  { %v2734_v11 = vsel %vm374_vm5, %v2724_v34, 0 }
0x1ced   :  { %v2642_v6 = vpop.xlane.xlu0 %2641 }
0x1cee   :  { %5722 = vrcp.f32 %v2642_v6 }
0x1cef   :  { %v2726_v48 = vpop.permute.xlu1 %2725 }
0x1cf0   :  { %v2737_v51 = vsel %vm374_vm5, %v2726_v48, 0 }
0x1cf1   :  { %v2660_v43 = vpop.permute.xlu0 %2659 }
0x1cf2   :  { %v2669_v44 = vand.u32 %v2660_v43, %v6123_v56 }
0x1cf3   :  { %v2722_v63 = vpop.permute.xlu1 %2721 }
0x1cf4   :  { %5284 = vmatprep.subr.bf16.mxu0 %v2669_v44  ;;  %v5719_v31 = vpop.eup %5718 }
0x1cf5   :  { %5285 = vmatpush3.bf16.msra.mxu0 %v2669_v44  ;;  %v5721_v35 = vpop.eup %5720  ;;  %v2654_v7 = vmul.f32 %v5719_v31, %v5715_v27  ;;  %v2720_v45 = vpop.permute.xlu0 %2719 }
0x1cf6   :  { %5492 = vmatprep.subr.msk.bf16.mxu0 %vm374_vm5, %v2724_v34  ;;  %v2653_v36 = vmul.f32 %v5721_v35, %v5713_v16 }
0x1cf7   :  { %v2656_v2 = vpack.c.bf16 %v2654_v7, %v2654_v7 }
0x1cf8   :  { %v5723_v10 = vpop.eup %5722 }
0x1cf9   :  { %v2652_v13 = vmul.f32 %v5723_v10, %v5717_v23 }
0x1cfb   :  { %v2655_v0 = vpack.c.bf16 %v2653_v36, %v2652_v13 }
0x1cfd   :  { %5286 = vmatprep.mubr.msk.bf16.mxu0 %vm438_vm7, %v2655_v0 }
0x1cfe   :  { %5287 = vmatmul.mubr.msk.bf16.vlgmr.msra.gmra.mrb[52].mxu0 %vm438_vm7, %v2656_v2 }
0x1cff   :  { %5291 = vmatpush3.bf16.xpose.msra.mxu0 %v2734_v11  ;;  %5294 = vmatprep.mubr.msk.bf16.mxu0 %vm374_vm5, %v2720_v45 }
0x1d00   :  { %5493 = vmatprep.subr.msk.bf16.mxu0 %vm374_vm5, %v2726_v48 }
0x1d07   :  { %5293 = vmatpush3.bf16.xpose.msra.mxu0 %v2737_v51 }
0x1d0e   :  { %5295 = vmatmul.mubr.msk.bf16.vlgmr.msra.gmra.mrb[56].mxu0 %vm374_vm5, %v2722_v63 }
0x1dd1   :  { %v6679_v52 = vpop.f32.mrb[52].mxu0 }
0x1dd2   :  { %v6681_v62 = vpop.f32.mrb[53].mxu0 }
0x1dd3   :  { %v5289_v4 = vpop.f32.mrb[54].mxu0 }
0x1dd4   :  { %v6683_v40 = vpop.f32.mrb[55].mxu0 }
0x1de1   :  { %v5296_v55 = vpop.f32.mrb[56].mxu0 }
0x1de2   :  { %v2773_v5 = vpop.f32.mrb[57].mxu0  ;;  %v2789_v9 = vmul.f32 0.35355338, %v5296_v55 }
0x1de3   :  { %v2787_v8 = vmul.f32 0.35355338, %v2773_v5  ;;  %v5297_v61 = vpop.f32.mrb[58].mxu0 }
0x1de4   :  { %v2776_v32 = vpop.f32.mrb[59].mxu0  ;;  %v2796_v12 = vsel %vm445_vm6, %v2789_v9, -inf }
0x1de5   :  { %v2788_v57 = vmul.f32 0.35355338, %v2776_v32  ;;  %v2790_v20 = vsel %vm438_vm7, %v2787_v8, -inf }
0x1de6   :  { %2791 = vmax.xlane.f32.xlu0 %v2790_v20 }
0x1de7   :  { %v2793_v59 = vsel %vm438_vm7, %v2788_v57, -inf }
0x1de8   :  { %2794 = vmax.xlane.f32.xlu1 %v2793_v59 }
0x1dea   :  { %2797 = vmax.xlane.f32.xlu0 %v2796_v12 }
0x1df9   :  { %2825 = vrot.lane.b32.xlu1 %v6640_v54, %s5841_s0 }
0x1e73   :  { %v2792_v21 = vpop.xlane.xlu0 %2791 }
0x1e74   :  { %v2799_v53 = vsub.f32 %v2787_v8, %v2792_v21 }
0x1e75   :  { %v2795_v14 = vpop.xlane.xlu1 %2794 }
0x1e76   :  { %v2800_v49 = vsub.f32 %v2788_v57, %v2795_v14  ;;  %v2802_v46 = vmul.f32 1.442695, %v2799_v53 }
0x1e77   :  { %v2798_v25 = vpop.xlane.xlu0 %2797 }
0x1e78   :  { %v2804_v15 = vmul.f32 1.442695, %v2800_v49  ;;  %v2801_v38 = vsub.f32 %v2789_v9, %v2798_v25 }
0x1e79   :  { %v2826_v37 = vpop.permute.xlu1 %2825 }
0x1e7a   :  { %5724 = vpow2.f32 %v2804_v15  ;;  %v2806_v16 = vmul.f32 1.442695, %v2801_v38  ;;  %5298 = vmatprep.subr.bf16.mxu1 %v2826_v37 }
0x1e7b   :  { %5299 = vmatpush3.bf16.msra.mxu1 %v2826_v37 }
0x1e7c   :  { %5726 = vpow2.f32 %v2806_v16 }
0x1e7d   :  { %5728 = vpow2.f32 %v2802_v46 }
0x1e84   :  { %v5725_v19 = vpop.eup %5724 }
0x1e85   :  { %v2811_v27 = vsel %vm438_vm7, %v5725_v19, 0.0 }
0x1e86   :  { %v5727_v42 = vpop.eup %5726  ;;  %2812 = vadd.xlane.f32.xlu1 %v2811_v27 }
0x1e87   :  { %v2814_v23 = vsel %vm445_vm6, %v5727_v42, 0.0  ;;  %v5729_v26 = vpop.eup %5728 }
0x1e88   :  { %2815 = vadd.xlane.f32.xlu0 %v2814_v23  ;;  %v2808_v28 = vsel %vm438_vm7, %v5729_v26, 0.0 }
0x1e8c   :  { %2809 = vadd.xlane.f32.xlu0 %v2808_v28 }
0x1e97   :  { %2891 = vrot.lane.b32.xlu1 %v6640_v54, %s5842_s21 }
0x1e9b   :  { %2893 = vrot.lane.b32.xlu1 %v6636_v3, %s5842_s21 }
0x1e9f   :  { %2889 = vrot.lane.b32.xlu1 %v6636_v3, %s7174_s5 }
0x1ea2   :  { %2827 = vrot.lane.b32.xlu0 %v6636_v3, %s5841_s0 }
0x1ea6   :  { %2887 = vrot.lane.b32.xlu0 %v6640_v54, %s7174_s5 }
0x1f13   :  { %v2813_v29 = vpop.xlane.xlu1 %2812 }
0x1f15   :  { %v2816_v6 = vpop.xlane.xlu0 %2815 }
0x1f16   :  { %5730 = vrcp.f32 %v2816_v6 }
0x1f17   :  { %5732 = vrcp.f32 %v2813_v29  ;;  %v2892_v35 = vpop.permute.xlu1 %2891 }
0x1f18   :  { %v2902_v45 = vsel %vm374_vm5, %v2892_v35, 0 }
0x1f19   :  { %v2810_v43 = vpop.xlane.xlu0 %2809 }
0x1f1a   :  { %5734 = vrcp.f32 %v2810_v43 }
0x1f1b   :  { %v2894_v51 = vpop.permute.xlu1 %2893 }
0x1f1c   :  { %v2905_v63 = vsel %vm374_vm5, %v2894_v51, 0 }
0x1f1d   :  { %v2828_v44 = vpop.permute.xlu0 %2827 }
0x1f1e   :  { %v2837_v31 = vand.u32 %v2828_v44, %v6123_v56 }
0x1f1f   :  { %v2890_v4 = vpop.permute.xlu1 %2889 }
0x1f20   :  { %5300 = vmatprep.subr.bf16.mxu1 %v2837_v31  ;;  %v5731_v34 = vpop.eup %5730 }
0x1f21   :  { %5301 = vmatpush3.bf16.msra.mxu1 %v2837_v31  ;;  %v5733_v10 = vpop.eup %5732  ;;  %v2822_v13 = vmul.f32 %v5731_v34, %v5727_v42  ;;  %v2888_v48 = vpop.permute.xlu0 %2887 }
0x1f22   :  { %5494 = vmatprep.subr.msk.bf16.mxu1 %vm374_vm5, %v2892_v35  ;;  %v2821_v0 = vmul.f32 %v5733_v10, %v5725_v19 }
0x1f23   :  { %v2824_v11 = vpack.c.bf16 %v2822_v13, %v2822_v13 }
0x1f24   :  { %v5735_v7 = vpop.eup %5734 }
0x1f25   :  { %v2820_v36 = vmul.f32 %v5735_v7, %v5729_v26 }
0x1f27   :  { %v2823_v2 = vpack.c.bf16 %v2821_v0, %v2820_v36 }
0x1f29   :  { %5302 = vmatprep.mubr.msk.bf16.mxu1 %vm438_vm7, %v2823_v2 }
0x1f2a   :  { %5303 = vmatmul.mubr.msk.bf16.vlgmr.msra.gmra.mrb[56].mxu1 %vm438_vm7, %v2824_v11 }
0x1f2b   :  { %5307 = vmatpush3.bf16.xpose.msra.mxu1 %v2902_v45  ;;  %5310 = vmatprep.mubr.msk.bf16.mxu1 %vm374_vm5, %v2888_v48 }
0x1f2c   :  { %5495 = vmatprep.subr.msk.bf16.mxu1 %vm374_vm5, %v2894_v51 }
0x1f33   :  { %5309 = vmatpush3.bf16.xpose.msra.mxu1 %v2905_v63 }
0x1f3a   :  { %5311 = vmatmul.mubr.msk.bf16.vlgmr.msra.gmra.mrb[60].mxu1 %vm374_vm5, %v2890_v4 }
0x1ffd   :  { %v6712_v55 = vpop.f32.mrb[56].mxu1 }
0x1ffe   :  { %v6714_v5 = vpop.f32.mrb[57].mxu1 }
0x1fff   :  { %v5305_v8 = vpop.f32.mrb[58].mxu1 }
0x2000   :  { %v6716_v61 = vpop.f32.mrb[59].mxu1 }
0x2001   :  { %v5554_v32 = vpack.i.bf16 %v6716_v61, %v6714_v5 }
0x200d   :  { %v5312_v9 = vpop.f32.mrb[60].mxu1 }
0x200e   :  { %v2941_v57 = vpop.f32.mrb[61].mxu1  ;;  %v2957_v21 = vmul.f32 0.35355338, %v5312_v9 }
0x200f   :  { %v2955_v20 = vmul.f32 0.35355338, %v2941_v57  ;;  %v5313_v59 = vpop.f32.mrb[62].mxu1 }
0x2010   :  { %v2944_v12 = vpop.f32.mrb[63].mxu1  ;;  %v2964_v25 = vsel %vm445_vm6, %v2957_v21, -inf }
0x2011   :  { %v2956_v14 = vmul.f32 0.35355338, %v2944_v12  ;;  %v2958_v53 = vsel %vm438_vm7, %v2955_v20, -inf  ;;  %v3352_v12 = vpack.c.bf16 %v6630_v24, %v6630_v24 }
0x2012   :  { %2959 = vmax.xlane.f32.xlu0 %v2958_v53 }
0x2013   :  { %v2961_v49 = vsel %vm438_vm7, %v2956_v14, -inf }
0x2014   :  { %2962 = vmax.xlane.f32.xlu1 %v2961_v49 }
0x2016   :  { %2965 = vmax.xlane.f32.xlu0 %v2964_v25 }
0x2025   :  { %2993 = vrot.lane.b32.xlu1 %v6640_v54, %s7175_s6 }
0x209f   :  { %v2960_v15 = vpop.xlane.xlu0 %2959 }
0x20a0   :  { %v2967_v37 = vsub.f32 %v2955_v20, %v2960_v15 }
0x20a1   :  { %v2963_v38 = vpop.xlane.xlu1 %2962 }
0x20a2   :  { %v2968_v46 = vsub.f32 %v2956_v14, %v2963_v38  ;;  %v2970_v23 = vmul.f32 1.442695, %v2967_v37 }
0x20a3   :  { %v2966_v16 = vpop.xlane.xlu0 %2965 }
0x20a4   :  { %v2972_v19 = vmul.f32 1.442695, %v2968_v46  ;;  %v2969_v27 = vsub.f32 %v2957_v21, %v2966_v16 }
0x20a5   :  { %v2994_v42 = vpop.permute.xlu1 %2993 }
0x20a6   :  { %5736 = vpow2.f32 %v2972_v19  ;;  %v2974_v26 = vmul.f32 1.442695, %v2969_v27  ;;  %5314 = vmatprep.subr.bf16.mxu0 %v2994_v42 }
0x20a7   :  { %5315 = vmatpush3.bf16.msra.mxu0 %v2994_v42 }
0x20a8   :  { %5738 = vpow2.f32 %v2974_v26 }
0x20a9   :  { %5740 = vpow2.f32 %v2970_v23 }
0x20b0   :  { %v5737_v28 = vpop.eup %5736 }
0x20b1   :  { %v2979_v29 = vsel %vm438_vm7, %v5737_v28, 0.0 }
0x20b2   :  { %v5739_v6 = vpop.eup %5738  ;;  %2980 = vadd.xlane.f32.xlu1 %v2979_v29 }
0x20b3   :  { %v2982_v43 = vsel %vm445_vm6, %v5739_v6, 0.0  ;;  %v5741_v44 = vpop.eup %5740 }
0x20b4   :  { %2983 = vadd.xlane.f32.xlu0 %v2982_v43  ;;  %v2976_v31 = vsel %vm438_vm7, %v5741_v44, 0.0 }
0x20b8   :  { %2977 = vadd.xlane.f32.xlu0 %v2976_v31 }
0x20c3   :  { %3059 = vrot.lane.b32.xlu1 %v6640_v54, %s7176_s22 }
0x20c7   :  { %3061 = vrot.lane.b32.xlu1 %v6636_v3, %s7176_s22 }
0x20cb   :  { %3057 = vrot.lane.b32.xlu1 %v6636_v3, %s7177_s2 }
0x20ce   :  { %2995 = vrot.lane.b32.xlu0 %v6636_v3, %s7175_s6 }
0x20d2   :  { %3055 = vrot.lane.b32.xlu0 %v6640_v54, %s7177_s2 }
0x213f   :  { %v2981_v34 = vpop.xlane.xlu1 %2980 }
0x2141   :  { %v2984_v35 = vpop.xlane.xlu0 %2983 }
0x2142   :  { %5742 = vrcp.f32 %v2984_v35 }
0x2143   :  { %5744 = vrcp.f32 %v2981_v34  ;;  %v3060_v0 = vpop.permute.xlu1 %3059 }
0x2144   :  { %v3070_v8 = vsel %vm374_vm5, %v3060_v0, 0 }
0x2145   :  { %v2978_v10 = vpop.xlane.xlu0 %2977 }
0x2146   :  { %5746 = vrcp.f32 %v2978_v10 }
0x2147   :  { %v3062_v57 = vpop.permute.xlu1 %3061 }
0x2148   :  { %v3073_v20 = vsel %vm374_vm5, %v3062_v57, 0 }
0x2149   :  { %v2996_v7 = vpop.permute.xlu0 %2995 }
0x214a   :  { %v3005_v13 = vand.u32 %v2996_v7, %v6123_v56 }
0x214b   :  { %v3058_v59 = vpop.permute.xlu1 %3057 }
0x214c   :  { %5316 = vmatprep.subr.bf16.mxu0 %v3005_v13  ;;  %v5743_v36 = vpop.eup %5742 }
0x214d   :  { %5317 = vmatpush3.bf16.msra.mxu0 %v3005_v13  ;;  %v5745_v2 = vpop.eup %5744  ;;  %v2990_v45 = vmul.f32 %v5743_v36, %v5739_v6  ;;  %v3056_v9 = vpop.permute.xlu0 %3055 }
0x214e   :  { %5496 = vmatprep.subr.msk.bf16.mxu0 %vm374_vm5, %v3060_v0  ;;  %v2989_v51 = vmul.f32 %v5745_v2, %v5737_v28 }
0x214f   :  { %v2992_v4 = vpack.c.bf16 %v2990_v45, %v2990_v45 }
0x2150   :  { %v5747_v11 = vpop.eup %5746 }
0x2151   :  { %v2988_v48 = vmul.f32 %v5747_v11, %v5741_v44 }
0x2153   :  { %v2991_v63 = vpack.c.bf16 %v2989_v51, %v2988_v48 }
0x2155   :  { %5318 = vmatprep.mubr.msk.bf16.mxu0 %vm438_vm7, %v2991_v63 }
0x2156   :  { %5319 = vmatmul.mubr.msk.bf16.vlgmr.msra.gmra.mrb[60].mxu0 %vm438_vm7, %v2992_v4 }
0x2157   :  { %5323 = vmatpush3.bf16.xpose.msra.mxu0 %v3070_v8  ;;  %5326 = vmatprep.mubr.msk.bf16.mxu0 %vm374_vm5, %v3056_v9 }
0x2158   :  { %5497 = vmatprep.subr.msk.bf16.mxu0 %vm374_vm5, %v3062_v57  ;;  %v6786_v57 = vld [vmem:[%s7129_s8 + $0x10] sm:$0xff]  }
0x215f   :  { %5325 = vmatpush3.bf16.xpose.msra.mxu0 %v3073_v20  ;;  %v6793_v20 = vld [vmem:[%s7129_s8 + $0x18] sm:$0xff]  }
0x2160   :  { %5346 = vmatprep.subr.bf16.mxu0 %v6550_v50 }
0x2166   :  { %5327 = vmatmul.mubr.msk.bf16.vlgmr.msra.gmra.mrb[64].mxu0 %vm374_vm5, %v3058_v59 }
0x2167   :  { %5347 = vmatpush3.bf16.msra.mxu0 %v6550_v50  ;;  %5350 = vmatprep.mubr.msk.bf16.mxu0 %vm218_vm3, %v3351_v18 }
0x2168   :  { %5348 = vmatprep.subr.bf16.mxu0 %v6555_v41 }
0x216b   :  { %5349 = vmatpush3.bf16.msra.mxu0 %v6555_v41 }
0x216e   :  { %5351 = vmatmul.mubr.msk.bf16.vlgmr.msra.gmra.mrb[68].mxu0 %vm218_vm3, %v3352_v12 }
0x2229   :  { %v5320_v21 = vpop.f32.mrb[60].mxu0 }
0x222a   :  { %v3041_v14 = vpop.f32.mrb[61].mxu0 }
0x222b   :  { %v5321_v53 = vpop.f32.mrb[62].mxu0 }
0x222c   :  { %v3044_v49 = vpop.f32.mrb[63].mxu0 }
0x222d   :  { %v5559_v25 = vpack.i.bf16 %v3044_v49, %v3041_v14 }
0x2239   :  { %v5328_v50 = vpop.f32.mrb[64].mxu0 }
0x223a   :  { %v3109_v15 = vpop.f32.mrb[65].mxu0  ;;  %v3125_v18 = vmul.f32 0.35355338, %v5328_v50 }
0x223b   :  { %v3123_v38 = vmul.f32 0.35355338, %v3109_v15  ;;  %v5329_v39 = vpop.f32.mrb[66].mxu0 }
0x223c   :  { %v3112_v1 = vpop.f32.mrb[67].mxu0  ;;  %v3132_v16 = vsel %vm445_vm6, %v3125_v18, -inf }
0x223d   :  { %v3124_v37 = vmul.f32 0.35355338, %v3112_v1  ;;  %v3126_v46 = vsel %vm438_vm7, %v3123_v38, -inf }
0x223e   :  { %3127 = vmax.xlane.f32.xlu0 %v3126_v46 }
0x223f   :  { %v3129_v41 = vsel %vm438_vm7, %v3124_v37, -inf }
0x2240   :  { %3130 = vmax.xlane.f32.xlu1 %v3129_v41 }
0x2241   :  { %v6760_v24 = vpop.f32.mrb[68].mxu0 }
0x2242   :  { %3133 = vmax.xlane.f32.xlu0 %v3132_v16  ;;  %v3393_v19 = vpop.f32.mrb[69].mxu0  ;;  %v6800_v14 = vpack.c.bf16 %v6760_v24, %v6760_v24 }
0x2243   :  { %v5353_v27 = vpop.f32.mrb[70].mxu0 }
0x2244   :  { %v3396_v42 = vpop.f32.mrb[71].mxu0 }
0x2245   :  { %v6763_v23 = vpack.c.bf16 %v3396_v42, %v3393_v19 }
0x22cb   :  { %v3128_v26 = vpop.xlane.xlu0 %3127 }
0x22cc   :  { %v3135_v29 = vsub.f32 %v3123_v38, %v3128_v26 }
0x22cd   :  { %v3131_v28 = vpop.xlane.xlu1 %3130 }
0x22ce   :  { %v3136_v6 = vsub.f32 %v3124_v37, %v3131_v28  ;;  %v3138_v34 = vmul.f32 1.442695, %v3135_v29 }
0x22cf   :  { %v3134_v43 = vpop.xlane.xlu0 %3133 }
0x22d0   :  { %v3140_v44 = vmul.f32 1.442695, %v3136_v6  ;;  %v3137_v31 = vsub.f32 %v3125_v18, %v3134_v43 }
0x22d2   :  { %5748 = vpow2.f32 %v3140_v44  ;;  %v3142_v35 = vmul.f32 1.442695, %v3137_v31 }
0x22d4   :  { %5750 = vpow2.f32 %v3142_v35 }
0x22d5   :  { %5752 = vpow2.f32 %v3138_v34 }
0x22dc   :  { %v5749_v10 = vpop.eup %5748 }
0x22dd   :  { %v3147_v7 = vsel %vm438_vm7, %v5749_v10, 0.0 }
0x22de   :  { %v5751_v13 = vpop.eup %5750  ;;  %3148 = vadd.xlane.f32.xlu1 %v3147_v7 }
0x22df   :  { %v3150_v36 = vsel %vm445_vm6, %v5751_v13, 0.0  ;;  %v5753_v0 = vpop.eup %5752 }
0x22e0   :  { %3151 = vadd.xlane.f32.xlu0 %v3150_v36  ;;  %v3144_v2 = vsel %vm438_vm7, %v5753_v0, 0.0 }
0x22e4   :  { %3145 = vadd.xlane.f32.xlu0 %v3144_v2 }
0x22ef   :  { %3161 = vrot.lane.b32.xlu1 %v6640_v54, %s7171_s25 }
0x22f3   :  { %5555 = vrot.lane.b32.xlu1 %v5554_v32, %s7172_s3 }
0x22f7   :  { %3230 = vrot.lane.b32.xlu1 %v6712_v55, %s7172_s3 }
0x22fa   :  { %3163 = vrot.lane.b32.xlu0 %v6636_v3, %s7171_s25 }
0x22fb   :  { %3242 = vrot.lane.b32.xlu1 %v5320_v21, %s7173_s26 }
0x22fe   :  { %5560 = vrot.lane.b32.xlu0 %v5559_v25, %s7173_s26 }
0x236b   :  { %v3149_v11 = vpop.xlane.xlu1 %3148 }
0x236d   :  { %v3152_v45 = vpop.xlane.xlu0 %3151 }
0x236e   :  { %5754 = vrcp.f32 %v3152_v45 }
0x236f   :  { %v3162_v48 = vpop.permute.xlu1 %3161  ;;  %5756 = vrcp.f32 %v3149_v11 }
0x2370   :  { %5330 = vmatprep.subr.bf16.mxu1 %v3162_v48 }
0x2371   :  { %v3146_v54 = vpop.xlane.xlu0 %3145  ;;  %5331 = vmatpush3.bf16.msra.mxu1 %v3162_v48 }
0x2372   :  { %5758 = vrcp.f32 %v3146_v54 }
0x2373   :  { %v5556_v25 = vpop.permute.xlu1 %5555 }
0x2374   :  { %v5558_v39 = vunpack.i.h.bf16 %v5556_v25  ;;  %v5557_v1 = vunpack.i.l.bf16 %v5556_v25 }
0x2375   :  { %v3164_v5 = vpop.permute.xlu0 %3163 }
0x2376   :  { %v3173_v61 = vand.u32 %v3164_v5, %v6123_v56  ;;  %v3260_v41 = vsel %vm374_vm5, %v6683_v40, %v5558_v39  ;;  %v3259_v19 = vsel %vm374_vm5, %v6681_v62, %v5557_v1 }
0x2377   :  { %v3231_v50 = vpop.permute.xlu1 %3230 }
0x2378   :  { %5332 = vmatprep.subr.bf16.mxu1 %v3173_v61  ;;  %v5755_v55 = vpop.eup %5754  ;;  %v3261_v24 = vsel %vm374_vm5, %v6679_v52, %v3231_v50 }
0x2379   :  { %5333 = vmatpush3.bf16.msra.mxu1 %v3173_v61  ;;  %v5757_v3 = vpop.eup %5756  ;;  %v3158_v51 = vmul.f32 %v5755_v55, %v5751_v13  ;;  %v5561_v15 = vpop.permute.xlu0 %5560 }
0x237a   :  { %v3157_v4 = vmul.f32 %v5757_v3, %v5749_v10  ;;  %5338 = vmatprep.subr.bf16.mxu1 %v6786_v57  ;;  %v5563_v18 = vunpack.i.h.bf16 %v5561_v15  ;;  %v5562_v37 = vunpack.i.l.bf16 %v5561_v15  ;;  %v6832_v10 = vld [vmem:[%s7130_s9 + $0x1] ss:$0 sm:$0xff] }
0x237b   :  { %v3160_v9 = vpack.c.bf16 %v3158_v51, %v3158_v51  ;;  %v3243_v38 = vpop.permute.xlu1 %3242 }
0x237c   :  { %v5759_v32 = vpop.eup %5758  ;;  %v3264_v27 = vsel %vm1082_vm8, %v3261_v24, %v3243_v38  ;;  %v3262_v28 = vsel %vm1082_vm8, %v3259_v19, %v5562_v37  ;;  %v3263_v29 = vsel %vm1082_vm8, %v3260_v41, %v5563_v18 }
0x237d   :  { %v3156_v63 = vmul.f32 %v5759_v32, %v5753_v0 }
0x237f   :  { %v3159_v8 = vpack.c.bf16 %v3157_v4, %v3156_v63 }
0x2381   :  { %5334 = vmatprep.mubr.msk.bf16.mxu1 %vm438_vm7, %v3159_v8 }
0x2382   :  { %5335 = vmatmul.mubr.msk.bf16.vlgmr.msra.gmra.mrb[64].mxu1 %vm438_vm7, %v3160_v9 }
0x2383   :  { %5339 = vmatpush3.bf16.msra.mxu1 %v6786_v57 }
0x2384   :  { %5340 = vmatprep.subr.bf16.mxu1 %v6793_v20 }
0x2387   :  { %5341 = vmatpush3.bf16.msra.mxu1 %v6793_v20 }
0x2455   :  { %v5336_v59 = vpop.f32.mrb[64].mxu1 }
0x2456   :  { %3254 = vrot.lane.b32.xlu1 %v5336_v59, %s7178_s1  ;;  %v3209_v12 = vpop.f32.mrb[65].mxu1 }
0x2457   :  { %v5337_v21 = vpop.f32.mrb[66].mxu1 }
0x2458   :  { %v3212_v53 = vpop.f32.mrb[67].mxu1 }
0x2459   :  { %v5564_v49 = vpack.i.bf16 %v3212_v53, %v3209_v12 }
0x245a   :  { %3413 = vrot.lane.b32.xlu1 %v6800_v14, %s5836_s28 }
0x245b   :  { %5565 = vrot.lane.b32.xlu0 %v5564_v49, %s7178_s1 }
0x245f   :  { %3411 = vrot.lane.b32.xlu0 %v6763_v23, %s5836_s28 }
0x24c8   :  { %v3255_v46 = vpop.permute.xlu1 %3254 }
0x24c9   :  { %v3267_v6 = vsel %vm1086_vm9, %v3264_v27, %v3255_v46 }
0x24ca   :  { %v3269_v31 = vpack.c.bf16 %v3267_v6, %v3267_v6 }
0x24cc   :  { %v3414_v62 = vpop.permute.xlu1 %3413 }
0x24cd   :  { %v5566_v16 = vpop.permute.xlu0 %5565  ;;  %v3425_v35 = vsel %vm374_vm5, %v3414_v62, 0 }
0x24ce   :  { %v5568_v42 = vunpack.i.h.bf16 %v5566_v16  ;;  %v5567_v26 = vunpack.i.l.bf16 %v5566_v16 }
0x24d0   :  { %v3265_v43 = vsel %vm1086_vm9, %v3262_v28, %v5567_v26  ;;  %v3266_v40 = vsel %vm1086_vm9, %v3263_v29, %v5568_v42 }
0x24d1   :  { %v3268_v44 = vpack.c.bf16 %v3266_v40, %v3265_v43  ;;  %v3412_v52 = vpop.permute.xlu0 %3411 }
0x24d2   :  { %v3422_v34 = vsel %vm374_vm5, %v3412_v52, 0  ;;  %5498 = vmatprep.subr.msk.bf16.mxu1 %vm374_vm5, %v3412_v52 }
0x24d3   :  { %5342 = vmatprep.mubr.msk.bf16.mxu1 %vm218_vm3, %v3268_v44 }
0x24d4   :  { %5343 = vmatmul.mubr.msk.bf16.vlgmr.msra.gmra.mrb[68].mxu1 %vm218_vm3, %v3269_v31 }
0x24d5   :  { %5355 = vmatpush3.bf16.xpose.msra.mxu1 %v3422_v34  ;;  %5358 = vmatprep.mubr.msk.bf16.mxu1 %vm374_vm5, %v6763_v23 }
0x24d6   :  { %5499 = vmatprep.subr.msk.bf16.mxu1 %vm374_vm5, %v3414_v62 }
0x24dd   :  { %5357 = vmatpush3.bf16.xpose.msra.mxu1 %v3425_v35 }
0x24e4   :  { %5359 = vmatmul.mubr.msk.bf16.vlgmr.msra.gmra.mrb[72].mxu1 %vm374_vm5, %v6800_v14 }
0x25a7   :  { %v5344_v7 = vpop.f32.mrb[68].mxu1 }
0x25a8   :  { %v3337_v13 = vadd.f32 %v5344_v7, %v6832_v10  ;;  %v3328_v36 = vpop.f32.mrb[69].mxu1 }
0x25a9   :  { %v3329_v0 = vadd.f32 %v6832_v10, %v3328_v36  ;;  %v5345_v2 = vpop.f32.mrb[70].mxu1 }
0x25aa   :  { %v3331_v11 = vpop.f32.mrb[71].mxu1  ;;  %v6837_v45 = vadd.f32 %v3337_v13, %v6565_v58 }
0x25ab   :  { %v6840_v48 = vadd.f32 %v3329_v0, %v6568_v17  ;;  %v3332_v54 = vadd.f32 %v6832_v10, %v3331_v11 }
0x25ac   :  { %v4218_v55 = vmul.f32 %v6837_v45, %v6837_v45  ;;  %v4208_v51 = vsel %vm222_vm4, %v6837_v45, 0.0 }
0x25ad   :  { %v4216_v5 = vmul.f32 %v6840_v48, %v6840_v48  ;;  %v6846_v61 = vadd.f32 %v3332_v54, %v6573_v22  ;;  %v4205_v3 = vsel %vm218_vm3, %v6840_v48, 0.0 }
0x25ae   :  { %v4222_v9 = vsel %vm222_vm4, %v4218_v55, 0.0 }
0x25af   :  { %v4206_v58 = vsel %vm218_vm3, %v6846_v61, 0.0  ;;  %v4217_v17 = vmul.f32 %v6846_v61, %v6846_v61  ;;  %v4219_v63 = vsel %vm218_vm3, %v4216_v5, 0.0 }
0x25b0   :  { %v4207_v32 = vadd.f32 %v4206_v58, %v4205_v3 }
0x25b1   :  { %v4220_v22 = vsel %vm218_vm3, %v4217_v17, 0.0 }
0x25b2   :  { %v6860_v4 = vadd.f32 %v4208_v51, %v4207_v32  ;;  %v4221_v8 = vadd.f32 %v4220_v22, %v4219_v63 }
0x25b4   :  { %v6863_v59 = vadd.f32 %v4222_v9, %v4221_v8 }
0x25b7   :  { %v5360_v12 = vpop.f32.mrb[72].mxu1 }
0x25b8   :  { %v3461_v21 = vpop.f32.mrb[73].mxu1  ;;  %v3477_v50 = vmul.f32 0.35355338, %v5360_v12 }
0x25b9   :  { %v3475_v53 = vmul.f32 0.35355338, %v3461_v21  ;;  %v5361_v49 = vpop.f32.mrb[74].mxu1 }
0x25ba   :  { %v3464_v25 = vpop.f32.mrb[75].mxu1  ;;  %v3484_v1 = vsel %vm445_vm6, %v3477_v50, -inf }
0x25bb   :  { %v3476_v15 = vmul.f32 0.35355338, %v3464_v25  ;;  %v3478_v38 = vsel %vm438_vm7, %v3475_v53, -inf }
0x25bc   :  { %3479 = vmax.xlane.f32.xlu0 %v3478_v38 }
0x25bd   :  { %v3481_v39 = vsel %vm438_vm7, %v3476_v15, -inf }
0x25be   :  { %3482 = vmax.xlane.f32.xlu1 %v3481_v39 }
0x25c0   :  { %3485 = vmax.xlane.f32.xlu0 %v3484_v1 }
0x25cf   :  { %3513 = vrot.lane.b32.xlu1 %v6763_v23, %s5838_s29 }
0x2649   :  { %v3480_v18 = vpop.xlane.xlu0 %3479 }
0x264a   :  { %v3487_v46 = vsub.f32 %v3475_v53, %v3480_v18 }
0x264b   :  { %v3483_v37 = vpop.xlane.xlu1 %3482 }
0x264c   :  { %v3488_v41 = vsub.f32 %v3476_v15, %v3483_v37  ;;  %v3490_v42 = vmul.f32 1.442695, %v3487_v46 }
0x264d   :  { %v3486_v24 = vpop.xlane.xlu0 %3485 }
0x264e   :  { %v3492_v16 = vmul.f32 1.442695, %v3488_v41  ;;  %v3489_v19 = vsub.f32 %v3477_v50, %v3486_v24 }
0x264f   :  { %v3514_v27 = vpop.permute.xlu1 %3513 }
0x2650   :  { %5760 = vpow2.f32 %v3492_v16  ;;  %v3494_v26 = vmul.f32 1.442695, %v3489_v19  ;;  %5362 = vmatprep.subr.bf16.mxu0 %v3514_v27 }
0x2651   :  { %5363 = vmatpush3.bf16.msra.mxu0 %v3514_v27 }
0x2652   :  { %5762 = vpow2.f32 %v3494_v26 }
0x2653   :  { %5764 = vpow2.f32 %v3490_v42 }
0x265a   :  { %v5761_v28 = vpop.eup %5760 }
0x265b   :  { %v3499_v29 = vsel %vm438_vm7, %v5761_v28, 0.0 }
0x265c   :  { %v5763_v6 = vpop.eup %5762  ;;  %3500 = vadd.xlane.f32.xlu1 %v3499_v29 }
0x265d   :  { %v3502_v43 = vsel %vm445_vm6, %v5763_v6, 0.0  ;;  %v5765_v40 = vpop.eup %5764 }
0x265e   :  { %3503 = vadd.xlane.f32.xlu0 %v3502_v43  ;;  %v3496_v44 = vsel %vm438_vm7, %v5765_v40, 0.0 }
0x2662   :  { %3497 = vadd.xlane.f32.xlu0 %v3496_v44 }
0x266d   :  { %3579 = vrot.lane.b32.xlu1 %v6763_v23, %s5837_s4 }
0x2671   :  { %3581 = vrot.lane.b32.xlu1 %v6800_v14, %s5837_s4 }
0x2675   :  { %3577 = vrot.lane.b32.xlu1 %v6800_v14, %s5839_s30 }
0x2678   :  { %3515 = vrot.lane.b32.xlu0 %v6800_v14, %s5838_s29 }
0x267c   :  { %3575 = vrot.lane.b32.xlu0 %v6763_v23, %s5839_s30  ;;  %s5853_s30 = smov [#allocation2]  }
0x26e9   :  { %v3501_v52 = vpop.xlane.xlu1 %3500 }
0x26eb   :  { %v3504_v31 = vpop.xlane.xlu0 %3503 }
0x26ec   :  { %5766 = vrcp.f32 %v3504_v31 }
0x26ed   :  { %5768 = vrcp.f32 %v3501_v52  ;;  %v3580_v13 = vpop.permute.xlu1 %3579 }
0x26ee   :  { %v3590_v3 = vsel %vm374_vm5, %v3580_v13, 0 }
0x26ef   :  { %v3498_v34 = vpop.xlane.xlu0 %3497 }
0x26f0   :  { %5770 = vrcp.f32 %v3498_v34 }
0x26f1   :  { %v3582_v17 = vpop.permute.xlu1 %3581 }
0x26f2   :  { %v3593_v32 = vsel %vm374_vm5, %v3582_v17, 0 }
0x26f3   :  { %v3516_v62 = vpop.permute.xlu0 %3515 }
0x26f4   :  { %v3525_v35 = vand.u32 %v3516_v62, %v6123_v56 }
0x26f5   :  { %v3578_v51 = vpop.permute.xlu1 %3577 }
0x26f6   :  { %5364 = vmatprep.subr.bf16.mxu0 %v3525_v35  ;;  %v5767_v7 = vpop.eup %5766 }
0x26f7   :  { %5365 = vmatpush3.bf16.msra.mxu0 %v3525_v35  ;;  %v5769_v36 = vpop.eup %5768  ;;  %v3510_v2 = vmul.f32 %v5767_v7, %v5763_v6  ;;  %v3576_v58 = vpop.permute.xlu0 %3575 }
0x26f8   :  { %5500 = vmatprep.subr.msk.bf16.mxu0 %vm374_vm5, %v3580_v13  ;;  %v3509_v54 = vmul.f32 %v5769_v36, %v5761_v28 }
0x26f9   :  { %v3512_v55 = vpack.c.bf16 %v3510_v2, %v3510_v2 }
0x26fa   :  { %v5771_v0 = vpop.eup %5770 }
0x26fb   :  { %v3508_v11 = vmul.f32 %v5771_v0, %v5765_v40 }
0x26fd   :  { %v3511_v5 = vpack.c.bf16 %v3509_v54, %v3508_v11 }
0x26ff   :  { %5366 = vmatprep.mubr.msk.bf16.mxu0 %vm438_vm7, %v3511_v5 }
0x2700   :  { %5367 = vmatmul.mubr.msk.bf16.vlgmr.msra.gmra.mrb[72].mxu0 %vm438_vm7, %v3512_v55 }
0x2701   :  { %5371 = vmatpush3.bf16.xpose.msra.mxu0 %v3590_v3  ;;  %5374 = vmatprep.mubr.msk.bf16.mxu0 %vm374_vm5, %v3576_v58 }
0x2702   :  { %5501 = vmatprep.subr.msk.bf16.mxu0 %vm374_vm5, %v3582_v17 }
0x2709   :  { %5373 = vmatpush3.bf16.xpose.msra.mxu0 %v3593_v32 }
0x2710   :  { %5375 = vmatmul.mubr.msk.bf16.vlgmr.msra.gmra.mrb[76].mxu0 %vm374_vm5, %v3578_v51 }
0x27d3   :  { %v6892_v63 = vpop.f32.mrb[72].mxu0 }
0x27d4   :  { %v6894_v22 = vpop.f32.mrb[73].mxu0 }
0x27d5   :  { %v5369_v8 = vpop.f32.mrb[74].mxu0 }
0x27d6   :  { %v6896_v9 = vpop.f32.mrb[75].mxu0 }
0x27e3   :  { %v5376_v12 = vpop.f32.mrb[76].mxu0 }
0x27e4   :  { %v3629_v21 = vpop.f32.mrb[77].mxu0  ;;  %v3645_v50 = vmul.f32 0.35355338, %v5376_v12 }
0x27e5   :  { %v3643_v53 = vmul.f32 0.35355338, %v3629_v21  ;;  %v5377_v49 = vpop.f32.mrb[78].mxu0 }
0x27e6   :  { %v3632_v25 = vpop.f32.mrb[79].mxu0  ;;  %v3652_v1 = vsel %vm445_vm6, %v3645_v50, -inf }
0x27e7   :  { %v3644_v15 = vmul.f32 0.35355338, %v3632_v25  ;;  %v3646_v38 = vsel %vm438_vm7, %v3643_v53, -inf }
0x27e8   :  { %3647 = vmax.xlane.f32.xlu0 %v3646_v38 }
0x27e9   :  { %v3649_v39 = vsel %vm438_vm7, %v3644_v15, -inf }
0x27ea   :  { %3650 = vmax.xlane.f32.xlu1 %v3649_v39 }
0x27ec   :  { %3653 = vmax.xlane.f32.xlu0 %v3652_v1 }
0x27fb   :  { %3681 = vrot.lane.b32.xlu1 %v6763_v23, %s5841_s0 }
0x2875   :  { %v3648_v18 = vpop.xlane.xlu0 %3647 }
0x2876   :  { %v3655_v46 = vsub.f32 %v3643_v53, %v3648_v18 }
0x2877   :  { %v3651_v37 = vpop.xlane.xlu1 %3650 }
0x2878   :  { %v3656_v41 = vsub.f32 %v3644_v15, %v3651_v37  ;;  %v3658_v42 = vmul.f32 1.442695, %v3655_v46 }
0x2879   :  { %v3654_v24 = vpop.xlane.xlu0 %3653 }
0x287a   :  { %v3660_v16 = vmul.f32 1.442695, %v3656_v41  ;;  %v3657_v19 = vsub.f32 %v3645_v50, %v3654_v24 }
0x287b   :  { %v3682_v27 = vpop.permute.xlu1 %3681 }
0x287c   :  { %5772 = vpow2.f32 %v3660_v16  ;;  %v3662_v26 = vmul.f32 1.442695, %v3657_v19  ;;  %5378 = vmatprep.subr.bf16.mxu1 %v3682_v27 }
0x287d   :  { %5379 = vmatpush3.bf16.msra.mxu1 %v3682_v27 }
0x287e   :  { %5774 = vpow2.f32 %v3662_v26 }
0x287f   :  { %5776 = vpow2.f32 %v3658_v42 }
0x2886   :  { %v5773_v28 = vpop.eup %5772 }
0x2887   :  { %v3667_v29 = vsel %vm438_vm7, %v5773_v28, 0.0 }
0x2888   :  { %v5775_v6 = vpop.eup %5774  ;;  %3668 = vadd.xlane.f32.xlu1 %v3667_v29 }
0x2889   :  { %v3670_v43 = vsel %vm445_vm6, %v5775_v6, 0.0  ;;  %v5777_v40 = vpop.eup %5776 }
0x288a   :  { %3671 = vadd.xlane.f32.xlu0 %v3670_v43  ;;  %v3664_v44 = vsel %vm438_vm7, %v5777_v40, 0.0 }
0x288e   :  { %3665 = vadd.xlane.f32.xlu0 %v3664_v44 }
0x2899   :  { %3747 = vrot.lane.b32.xlu1 %v6763_v23, %s5842_s21 }
0x289d   :  { %3749 = vrot.lane.b32.xlu1 %v6800_v14, %s5842_s21 }
0x28a1   :  { %3745 = vrot.lane.b32.xlu1 %v6800_v14, %s7174_s5 }
0x28a4   :  { %3683 = vrot.lane.b32.xlu0 %v6800_v14, %s5841_s0  ;;  %s4675_s0 = sshll.u32 %s5853_s30, 4  ;;  %s4676_s0 = int_to_ptr.vmem [resolvable:$true] %s4675_s0 }
0x28a5   :  { %p5817_p1 = scmp.lt.s32.totalorder %s4676_s0, %s4676_s0 }
0x28a8   :  { %3743 = vrot.lane.b32.xlu0 %v6763_v23, %s7174_s5 }
0x2915   :  { %v3669_v52 = vpop.xlane.xlu1 %3668 }
0x2917   :  { %v3672_v31 = vpop.xlane.xlu0 %3671 }
0x2918   :  { %5778 = vrcp.f32 %v3672_v31 }
0x2919   :  { %5780 = vrcp.f32 %v3669_v52  ;;  %v3748_v13 = vpop.permute.xlu1 %3747 }
0x291a   :  { %v3758_v3 = vsel %vm374_vm5, %v3748_v13, 0 }
0x291b   :  { %v3666_v34 = vpop.xlane.xlu0 %3665 }
0x291c   :  { %5782 = vrcp.f32 %v3666_v34 }
0x291d   :  { %v3750_v17 = vpop.permute.xlu1 %3749 }
0x291e   :  { %v3761_v32 = vsel %vm374_vm5, %v3750_v17, 0 }
0x291f   :  { %v3684_v62 = vpop.permute.xlu0 %3683 }
0x2920   :  { %v3693_v35 = vand.u32 %v3684_v62, %v6123_v56 }
0x2921   :  { %v3746_v51 = vpop.permute.xlu1 %3745 }
0x2922   :  { %5380 = vmatprep.subr.bf16.mxu1 %v3693_v35  ;;  %v5779_v7 = vpop.eup %5778 }
0x2923   :  { %5381 = vmatpush3.bf16.msra.mxu1 %v3693_v35  ;;  %v5781_v36 = vpop.eup %5780  ;;  %v3678_v2 = vmul.f32 %v5779_v7, %v5775_v6  ;;  %v3744_v58 = vpop.permute.xlu0 %3743 }
0x2924   :  { %5502 = vmatprep.subr.msk.bf16.mxu1 %vm374_vm5, %v3748_v13  ;;  %v3677_v54 = vmul.f32 %v5781_v36, %v5773_v28 }
0x2925   :  { %v3680_v55 = vpack.c.bf16 %v3678_v2, %v3678_v2 }
0x2926   :  { %v5783_v0 = vpop.eup %5782 }
0x2927   :  { %v3676_v11 = vmul.f32 %v5783_v0, %v5777_v40 }
0x2929   :  { %v3679_v5 = vpack.c.bf16 %v3677_v54, %v3676_v11 }
0x292b   :  { %5382 = vmatprep.mubr.msk.bf16.mxu1 %vm438_vm7, %v3679_v5 }
0x292c   :  { %5383 = vmatmul.mubr.msk.bf16.vlgmr.msra.gmra.mrb[76].mxu1 %vm438_vm7, %v3680_v55 }
0x292d   :  { %5387 = vmatpush3.bf16.xpose.msra.mxu1 %v3758_v3  ;;  %5390 = vmatprep.mubr.msk.bf16.mxu1 %vm374_vm5, %v3744_v58 }
0x292e   :  { %5503 = vmatprep.subr.msk.bf16.mxu1 %vm374_vm5, %v3750_v17 }
0x2935   :  { %5389 = vmatpush3.bf16.xpose.msra.mxu1 %v3761_v32 }
0x293c   :  { %5391 = vmatmul.mubr.msk.bf16.vlgmr.msra.gmra.mrb[80].mxu1 %vm374_vm5, %v3746_v51 }
0x29ff   :  { %v6925_v8 = vpop.f32.mrb[76].mxu1 }
0x2a00   :  { %v6927_v12 = vpop.f32.mrb[77].mxu1 }
0x2a01   :  { %v5385_v21 = vpop.f32.mrb[78].mxu1 }
0x2a02   :  { %v6929_v53 = vpop.f32.mrb[79].mxu1 }
0x2a03   :  { %v5569_v49 = vpack.i.bf16 %v6929_v53, %v6927_v12 }
0x2a0f   :  { %v5392_v25 = vpop.f32.mrb[80].mxu1 }
0x2a10   :  { %v3797_v50 = vpop.f32.mrb[81].mxu1  ;;  %v3813_v1 = vmul.f32 0.35355338, %v5392_v25 }
0x2a11   :  { %v3811_v15 = vmul.f32 0.35355338, %v3797_v50  ;;  %v5393_v38 = vpop.f32.mrb[82].mxu1 }
0x2a12   :  { %v3800_v39 = vpop.f32.mrb[83].mxu1  ;;  %v3820_v41 = vsel %vm445_vm6, %v3813_v1, -inf }
0x2a13   :  { %v3812_v18 = vmul.f32 0.35355338, %v3800_v39  ;;  %v3814_v37 = vsel %vm438_vm7, %v3811_v15, -inf }
0x2a14   :  { %3815 = vmax.xlane.f32.xlu0 %v3814_v37 }
0x2a15   :  { %v3817_v46 = vsel %vm438_vm7, %v3812_v18, -inf }
0x2a16   :  { %3818 = vmax.xlane.f32.xlu1 %v3817_v46 }
0x2a18   :  { %3821 = vmax.xlane.f32.xlu0 %v3820_v41 }
0x2a27   :  { %3849 = vrot.lane.b32.xlu1 %v6763_v23, %s7175_s6 }
0x2aa1   :  { %v3816_v24 = vpop.xlane.xlu0 %3815 }
0x2aa2   :  { %v3823_v19 = vsub.f32 %v3811_v15, %v3816_v24 }
0x2aa3   :  { %v3819_v16 = vpop.xlane.xlu1 %3818 }
0x2aa4   :  { %v3824_v27 = vsub.f32 %v3812_v18, %v3819_v16  ;;  %v3826_v6 = vmul.f32 1.442695, %v3823_v19 }
0x2aa5   :  { %v3822_v42 = vpop.xlane.xlu0 %3821 }
0x2aa6   :  { %v3828_v26 = vmul.f32 1.442695, %v3824_v27  ;;  %v3825_v28 = vsub.f32 %v3813_v1, %v3822_v42 }
0x2aa7   :  { %v3850_v29 = vpop.permute.xlu1 %3849 }
0x2aa8   :  { %5784 = vpow2.f32 %v3828_v26  ;;  %v3830_v43 = vmul.f32 1.442695, %v3825_v28  ;;  %5394 = vmatprep.subr.bf16.mxu0 %v3850_v29 }
0x2aa9   :  { %5395 = vmatpush3.bf16.msra.mxu0 %v3850_v29 }
0x2aaa   :  { %5786 = vpow2.f32 %v3830_v43 }
0x2aab   :  { %5788 = vpow2.f32 %v3826_v6 }
0x2ab2   :  { %v5785_v40 = vpop.eup %5784 }
0x2ab3   :  { %v3835_v44 = vsel %vm438_vm7, %v5785_v40, 0.0 }
0x2ab4   :  { %v5787_v52 = vpop.eup %5786  ;;  %3836 = vadd.xlane.f32.xlu1 %v3835_v44 }
0x2ab5   :  { %v3838_v31 = vsel %vm445_vm6, %v5787_v52, 0.0  ;;  %v5789_v34 = vpop.eup %5788 }
0x2ab6   :  { %3839 = vadd.xlane.f32.xlu0 %v3838_v31  ;;  %v3832_v62 = vsel %vm438_vm7, %v5789_v34, 0.0 }
0x2aba   :  { %3833 = vadd.xlane.f32.xlu0 %v3832_v62 }
0x2ac5   :  { %3915 = vrot.lane.b32.xlu1 %v6763_v23, %s7176_s22 }
0x2ac9   :  { %3917 = vrot.lane.b32.xlu1 %v6800_v14, %s7176_s22 }
0x2acd   :  { %3913 = vrot.lane.b32.xlu1 %v6800_v14, %s7177_s2 }
0x2ad0   :  { %3851 = vrot.lane.b32.xlu0 %v6800_v14, %s7175_s6 }
0x2ad4   :  { %3911 = vrot.lane.b32.xlu0 %v6763_v23, %s7177_s2 }
0x2b41   :  { %v3837_v35 = vpop.xlane.xlu1 %3836 }
0x2b43   :  { %v3840_v7 = vpop.xlane.xlu0 %3839 }
0x2b44   :  { %5790 = vrcp.f32 %v3840_v7 }
0x2b45   :  { %5792 = vrcp.f32 %v3837_v35  ;;  %v3916_v11 = vpop.permute.xlu1 %3915 }
0x2b46   :  { %v3926_v51 = vsel %vm374_vm5, %v3916_v11, 0 }
0x2b47   :  { %v3834_v13 = vpop.xlane.xlu0 %3833 }
0x2b48   :  { %5794 = vrcp.f32 %v3834_v13 }
0x2b49   :  { %v3918_v25 = vpop.permute.xlu1 %3917 }
0x2b4a   :  { %v3929_v50 = vsel %vm374_vm5, %v3918_v25, 0 }
0x2b4b   :  { %v3852_v36 = vpop.permute.xlu0 %3851 }
0x2b4c   :  { %v3861_v0 = vand.u32 %v3852_v36, %v6123_v56 }
0x2b4d   :  { %v3914_v15 = vpop.permute.xlu1 %3913 }
0x2b4e   :  { %5396 = vmatprep.subr.bf16.mxu0 %v3861_v0  ;;  %v5791_v2 = vpop.eup %5790 }
0x2b4f   :  { %5397 = vmatpush3.bf16.msra.mxu0 %v3861_v0  ;;  %v5793_v54 = vpop.eup %5792  ;;  %v3846_v55 = vmul.f32 %v5791_v2, %v5787_v52  ;;  %v3912_v21 = vpop.permute.xlu0 %3911 }
0x2b50   :  { %5504 = vmatprep.subr.msk.bf16.mxu0 %vm374_vm5, %v3916_v11  ;;  %v3845_v58 = vmul.f32 %v5793_v54, %v5785_v40 }
0x2b51   :  { %v3848_v32 = vpack.c.bf16 %v3846_v55, %v3846_v55 }
0x2b52   :  { %v5795_v5 = vpop.eup %5794 }
0x2b53   :  { %v3844_v3 = vmul.f32 %v5795_v5, %v5789_v34 }
0x2b55   :  { %v3847_v17 = vpack.c.bf16 %v3845_v58, %v3844_v3 }
0x2b57   :  { %5398 = vmatprep.mubr.msk.bf16.mxu0 %vm438_vm7, %v3847_v17 }
0x2b58   :  { %5399 = vmatmul.mubr.msk.bf16.vlgmr.msra.gmra.mrb[80].mxu0 %vm438_vm7, %v3848_v32 }
0x2b59   :  { %5403 = vmatpush3.bf16.xpose.msra.mxu0 %v3926_v51  ;;  %5406 = vmatprep.mubr.msk.bf16.mxu0 %vm374_vm5, %v3912_v21 }
0x2b5a   :  { %5505 = vmatprep.subr.msk.bf16.mxu0 %vm374_vm5, %v3918_v25 }
0x2b61   :  { %5405 = vmatpush3.bf16.xpose.msra.mxu0 %v3929_v50 }
0x2b68   :  { %5407 = vmatmul.mubr.msk.bf16.vlgmr.msra.gmra.mrb[84].mxu0 %vm374_vm5, %v3914_v15 }
0x2c2b   :  { %v5400_v38 = vpop.f32.mrb[80].mxu0 }
0x2c2c   :  { %v3897_v39 = vpop.f32.mrb[81].mxu0 }
0x2c2d   :  { %v5401_v1 = vpop.f32.mrb[82].mxu0 }
0x2c2e   :  { %v3900_v18 = vpop.f32.mrb[83].mxu0 }
0x2c2f   :  { %v5574_v37 = vpack.i.bf16 %v3900_v18, %v3897_v39 }
0x2c3b   :  { %v5408_v46 = vpop.f32.mrb[84].mxu0 }
0x2c3c   :  { %v3965_v41 = vpop.f32.mrb[85].mxu0  ;;  %v3981_v27 = vmul.f32 0.35355338, %v5408_v46 }
0x2c3d   :  { %v3979_v24 = vmul.f32 0.35355338, %v3965_v41  ;;  %v5409_v16 = vpop.f32.mrb[86].mxu0 }
0x2c3e   :  { %v3968_v19 = vpop.f32.mrb[87].mxu0  ;;  %v3988_v29 = vsel %vm445_vm6, %v3981_v27, -inf }
0x2c3f   :  { %v3980_v42 = vmul.f32 0.35355338, %v3968_v19  ;;  %v3982_v26 = vsel %vm438_vm7, %v3979_v24, -inf }
0x2c40   :  { %3983 = vmax.xlane.f32.xlu0 %v3982_v26 }
0x2c41   :  { %v3985_v28 = vsel %vm438_vm7, %v3980_v42, -inf }
0x2c42   :  { %3986 = vmax.xlane.f32.xlu1 %v3985_v28 }
0x2c44   :  { %3989 = vmax.xlane.f32.xlu0 %v3988_v29 }
0x2ccd   :  { %v3984_v6 = vpop.xlane.xlu0 %3983 }
0x2cce   :  { %v3991_v40 = vsub.f32 %v3979_v24, %v3984_v6 }
0x2ccf   :  { %v3987_v43 = vpop.xlane.xlu1 %3986 }
0x2cd0   :  { %v3992_v44 = vsub.f32 %v3980_v42, %v3987_v43  ;;  %v3994_v62 = vmul.f32 1.442695, %v3991_v40 }
0x2cd1   :  { %v3990_v52 = vpop.xlane.xlu0 %3989 }
0x2cd2   :  { %v3996_v31 = vmul.f32 1.442695, %v3992_v44  ;;  %v3993_v34 = vsub.f32 %v3981_v27, %v3990_v52  ;;  %v7011_v52 = vld [vmem:[%s7133_s12 + $0x18] sm:$0xff]  }
0x2cd4   :  { %5796 = vpow2.f32 %v3996_v31  ;;  %v3998_v35 = vmul.f32 1.442695, %v3993_v34  ;;  %v7019_v31 = vld [vmem:[%s7135_s14 + $0x20] sm:$0xff]   ;;  %v7024_v34 = vld [vmem:[%s7135_s14 + $0x28] sm:$0xff]  }
0x2cd6   :  { %5798 = vpow2.f32 %v3998_v35 }
0x2cd7   :  { %5800 = vpow2.f32 %v3994_v62 }
0x2cde   :  { %v5797_v7 = vpop.eup %5796 }
0x2cdf   :  { %v4003_v13 = vsel %vm438_vm7, %v5797_v7, 0.0 }
0x2ce0   :  { %v5799_v36 = vpop.eup %5798  ;;  %4004 = vadd.xlane.f32.xlu1 %v4003_v13 }
0x2ce1   :  { %v4006_v0 = vsel %vm445_vm6, %v5799_v36, 0.0  ;;  %v5801_v2 = vpop.eup %5800 }
0x2ce2   :  { %4007 = vadd.xlane.f32.xlu0 %v4006_v0  ;;  %v4000_v11 = vsel %vm438_vm7, %v5801_v2, 0.0  ;;  %v4210_v0 = vrot.slane %v6860_v4, 4 }
0x2ce6   :  { %4001 = vadd.xlane.f32.xlu0 %v4000_v11 }
0x2cf1   :  { %4017 = vrot.lane.b32.xlu1 %v6763_v23, %s7171_s25 }
0x2cf5   :  { %5570 = vrot.lane.b32.xlu1 %v5569_v49, %s7172_s3 }
0x2cf9   :  { %4086 = vrot.lane.b32.xlu1 %v6925_v8, %s7172_s3 }
0x2cfc   :  { %4019 = vrot.lane.b32.xlu0 %v6800_v14, %s7171_s25 }
0x2cfd   :  { %4098 = vrot.lane.b32.xlu1 %v5400_v38, %s7173_s26 }
0x2d00   :  { %5575 = vrot.lane.b32.xlu0 %v5574_v37, %s7173_s26 }
0x2d6d   :  { %v4005_v54 = vpop.xlane.xlu1 %4004 }
0x2d6f   :  { %v4008_v5 = vpop.xlane.xlu0 %4007 }
0x2d70   :  { %5802 = vrcp.f32 %v4008_v5 }
0x2d71   :  { %v4018_v55 = vpop.permute.xlu1 %4017  ;;  %5804 = vrcp.f32 %v4005_v54 }
0x2d72   :  { %5410 = vmatprep.subr.bf16.mxu1 %v4018_v55 }
0x2d73   :  { %v4002_v23 = vpop.xlane.xlu0 %4001  ;;  %5411 = vmatpush3.bf16.msra.mxu1 %v4018_v55  ;;  %v4224_v55 = vrot.slane %v6863_v59, 4 }
0x2d74   :  { %5806 = vrcp.f32 %v4002_v23 }
0x2d75   :  { %v5571_v38 = vpop.permute.xlu1 %5570 }
0x2d76   :  { %v5573_v37 = vunpack.i.h.bf16 %v5571_v38  ;;  %v5572_v46 = vunpack.i.l.bf16 %v5571_v38 }
0x2d77   :  { %v4020_v12 = vpop.permute.xlu0 %4019 }
0x2d78   :  { %v4029_v53 = vand.u32 %v4020_v12, %v6123_v56  ;;  %v4115_v27 = vsel %vm374_vm5, %v6894_v22, %v5572_v46  ;;  %v7004_v22 = vld [vmem:[%s7133_s12 + $0x10] sm:$0xff]  }
0x2d79   :  { %v4087_v39 = vpop.permute.xlu1 %4086  ;;  %5426 = vmatprep.subr.bf16.mxu0 %v7004_v22 }
0x2d7a   :  { %5412 = vmatprep.subr.bf16.mxu1 %v4029_v53  ;;  %v5803_v8 = vpop.eup %5802  ;;  %v4117_v16 = vsel %vm374_vm5, %v6892_v63, %v4087_v39  ;;  %5427 = vmatpush3.bf16.msra.mxu0 %v7004_v22 }
0x2d7b   :  { %5413 = vmatpush3.bf16.msra.mxu1 %v4029_v53  ;;  %v5805_v14 = vpop.eup %5804  ;;  %v4014_v3 = vmul.f32 %v5803_v8, %v5799_v36  ;;  %v5576_v1 = vpop.permute.xlu0 %5575  ;;  %5428 = vmatprep.subr.bf16.mxu0 %v7011_v52  ;;  %v4211_v53 = vadd.f32 %v4210_v0, %v6860_v4 }
0x2d7c   :  { %5418 = vmatprep.subr.bf16.mxu1 %v6786_v57  ;;  %v4013_v17 = vmul.f32 %v5805_v14, %v5797_v7  ;;  %v5577_v41 = vunpack.i.l.bf16 %v5576_v1 }
0x2d7d   :  { %v4016_v51 = vpack.c.bf16 %v4014_v3, %v4014_v3  ;;  %v4099_v18 = vpop.permute.xlu1 %4098 }
0x2d7e   :  { %v5807_v49 = vpop.eup %5806  ;;  %v4120_v42 = vsel %vm1082_vm8, %v4117_v16, %v4099_v18  ;;  %v4118_v29 = vsel %vm1082_vm8, %v4115_v27, %v5577_v41  ;;  %5429 = vmatpush3.bf16.msra.mxu0 %v7011_v52 }
0x2d7f   :  { %v4012_v58 = vmul.f32 %v5807_v49, %v5801_v2  ;;  %5446 = vmatprep.subr.bf16.mxu0 %v7004_v22 }
0x2d81   :  { %v4015_v32 = vpack.c.bf16 %v4013_v17, %v4012_v58 }
0x2d83   :  { %5414 = vmatprep.mubr.msk.bf16.mxu1 %vm438_vm7, %v4015_v32  ;;  %v4212_v32 = vrot.slane %v4211_v53, 2 }
0x2d84   :  { %5415 = vmatmul.mubr.msk.bf16.vlgmr.msra.gmra.mrb[84].mxu1 %vm438_vm7, %v4016_v51 }
0x2d85   :  { %5419 = vmatpush3.bf16.msra.mxu1 %v6786_v57  ;;  %v5578_v57 = vunpack.i.h.bf16 %v5576_v1 }
0x2d86   :  { %5420 = vmatprep.subr.bf16.mxu1 %v6793_v20 }
0x2d89   :  { %5421 = vmatpush3.bf16.msra.mxu1 %v6793_v20  ;;  %v4116_v20 = vsel %vm374_vm5, %v6896_v9, %v5573_v37 }
0x2d8a   :  { %v4119_v6 = vsel %vm1082_vm8, %v4116_v20, %v5578_v57  ;;  %5434 = vmatprep.subr.bf16.mxu1 %v7019_v31 }
0x2e57   :  { %v5416_v56 = vpop.f32.mrb[84].mxu1 }
0x2e58   :  { %4110 = vrot.lane.b32.xlu1 %v5416_v56, %s7178_s1  ;;  %v4065_v21 = vpop.f32.mrb[85].mxu1 }
0x2e59   :  { %v5417_v25 = vpop.f32.mrb[86].mxu1 }
0x2e5a   :  { %v4068_v50 = vpop.f32.mrb[87].mxu1 }
0x2e5b   :  { %v5579_v15 = vpack.i.bf16 %v4068_v50, %v4065_v21  ;;  %v4213_v50 = vadd.f32 %v4212_v32, %v4211_v53 }
0x2e5d   :  { %5580 = vrot.lane.b32.xlu0 %v5579_v15, %s7178_s1  ;;  %v4214_v18 = vrot.slane %v4213_v50, 1 }
0x2e5f   :  { %v4215_v20 = vadd.f32 %v4214_v18, %v4213_v50 }
0x2eca   :  { %v4111_v24 = vpop.permute.xlu1 %4110 }
0x2ecb   :  { %v4123_v43 = vsel %vm1086_vm9, %v4120_v42, %v4111_v24 }
0x2ecc   :  { %v4125_v63 = vpack.c.bf16 %v4123_v43, %v4123_v43 }
0x2ecf   :  { %v5581_v19 = vpop.permute.xlu0 %5580 }
0x2ed0   :  { %v5583_v26 = vunpack.i.h.bf16 %v5581_v19  ;;  %v5582_v28 = vunpack.i.l.bf16 %v5581_v19 }
0x2ed2   :  { %v4121_v40 = vsel %vm1086_vm9, %v4118_v29, %v5582_v28  ;;  %v4122_v9 = vsel %vm1086_vm9, %v4119_v6, %v5583_v26 }
0x2ed3   :  { %v4124_v44 = vpack.c.bf16 %v4122_v9, %v4121_v40 }
0x2ed5   :  { %5422 = vmatprep.mubr.msk.bf16.mxu1 %vm218_vm3, %v4124_v44 }
0x2ed6   :  { %5423 = vmatmul.mubr.msk.bf16.vlgmr.msra.gmra.mrb[88].mxu1 %vm218_vm3, %v4125_v63  ;;  %v4821_v63 = vld [vmem:[%s7131_s10 + $0x1] sm:$0x1] }
0x2ed7   :  { %5435 = vmatpush3.bf16.msra.mxu1 %v7019_v31 }
0x2ed8   :  { %5436 = vmatprep.subr.bf16.mxu1 %v7024_v34 }
0x2edb   :  { %5437 = vmatpush3.bf16.msra.mxu1 %v7024_v34 }
0x2fa9   :  { %v5424_v62 = vpop.f32.mrb[88].mxu1 }
0x2faa   :  { %v4175_v35 = vadd.f32 %v5424_v62, %v6832_v10  ;;  %v4166_v7 = vpop.f32.mrb[89].mxu1 }
0x2fab   :  { %v4167_v13 = vadd.f32 %v6832_v10, %v4166_v7  ;;  %v5425_v36 = vpop.f32.mrb[90].mxu1  ;;  %v4822_v7 = vld [vmem:[%s7132_s11 + $0x1] sm:$0x1] }
0x2fac   :  { %v4169_v2 = vpop.f32.mrb[91].mxu1  ;;  %v4182_v11 = vadd.f32 %v4175_v35, %v6589_v30 }
0x2fad   :  { %v7035_v54 = vadd.f32 %v4167_v13, %v6592_v60  ;;  %v4170_v5 = vadd.f32 %v6832_v10, %v4169_v2  ;;  %v4225_v60 = vadd.f32 %v4224_v55, %v6863_v59 }
0x2fae   :  { %v4244_v8 = vmul.f32 %v4182_v11, %v4182_v11  ;;  %v4233_v10 = vsel %vm222_vm4, %v4182_v11, 0.0 }
0x2faf   :  { %v4242_v23 = vmul.f32 %v7035_v54, %v7035_v54  ;;  %v4181_v12 = vadd.f32 %v4170_v5, %v6597_v33  ;;  %v4230_v14 = vsel %vm218_vm3, %v7035_v54, 0.0  ;;  %v4226_v56 = vrot.slane %v4225_v60, 2 }
0x2fb0   :  { %v4248_v4 = vsel %vm222_vm4, %v4244_v8, 0.0 }
0x2fb1   :  { %v4231_v30 = vsel %vm218_vm3, %v4181_v12, 0.0  ;;  %v4243_v49 = vmul.f32 %v4181_v12, %v4181_v12  ;;  %v4245_v58 = vsel %vm218_vm3, %v4242_v23, 0.0  ;;  %v4227_v39 = vadd.f32 %v4226_v56, %v4225_v60 }
0x2fb2   :  { %v4232_v3 = vadd.f32 %v4231_v30, %v4230_v14 }
0x2fb3   :  { %v4246_v17 = vsel %vm218_vm3, %v4243_v49, 0.0  ;;  %v4228_v57 = vrot.slane %v4227_v39, 1 }
0x2fb4   :  { %v4234_v33 = vadd.f32 %v4233_v10, %v4232_v3  ;;  %v4247_v51 = vadd.f32 %v4246_v17, %v4245_v58 }
0x2fb5   :  { %v4229_v27 = vadd.f32 %v4228_v57, %v4227_v39 }
0x2fb6   :  { %v4235_v21 = vrot.slane %v4234_v33, 4  ;;  %v4249_v25 = vadd.f32 %v4248_v4, %v4247_v51 }
0x2fb8   :  { %v4236_v15 = vadd.f32 %v4235_v21, %v4234_v33  ;;  %v4250_v38 = vrot.slane %v4249_v25, 4 }
0x2fba   :  { %v4237_v59 = vrot.slane %v4236_v15, 2  ;;  %v4251_v1 = vadd.f32 %v4250_v38, %v4249_v25 }
0x2fbc   :  { %v4238_v37 = vadd.f32 %v4237_v59, %v4236_v15  ;;  %v4252_v46 = vrot.slane %v4251_v1, 2 }
0x2fbe   :  { %v4239_v41 = vrot.slane %v4238_v37, 1  ;;  %v4253_v24 = vadd.f32 %v4252_v46, %v4251_v1 }
0x2fc0   :  { %v4240_v16 = vadd.f32 %v4239_v41, %v4238_v37  ;;  %v4254_v19 = vrot.slane %v4253_v24, 1 }
0x2fc2   :  { %v4241_v42 = vadd.f32 %v4240_v16, %v4215_v20  ;;  %v4255_v26 = vadd.f32 %v4254_v19, %v4253_v24 }
0x2fc4   :  { %v4256_v28 = vadd.f32 %v4255_v26, %v4229_v27  ;;  %v4257_v29 = vmul.f32 0.029411765, %v4241_v42 }
0x2fc6   :  { %v4258_v6 = vmul.f32 0.029411765, %v4256_v28  ;;  %v4259_v43 = vmul.f32 %v4257_v29, %v4257_v29  ;;  %v4828_v28 = vld [vmem:[%s7136_s15 + $0x1] ss:$0 sm:$0xff] }
0x2fc8   :  { %v4260_v40 = vsub.f32 %v4258_v6, %v4259_v43 }
0x2fca   :  { %v4261_v9 = vmax.f32 %v4260_v40, 0.0 }
0x2fcc   :  { %v4262_v44 = vadd.f32 1e-05, %v4261_v9 }
0x2fce   :  { %5808 = vrsqrt.f32 %v4262_v44 }
0x2fd8   :  { %v5809_v62 = vpop.eup %5808 }
0x2fd9   :  { %v4264_v35 = vmul.f32 %v5809_v62, %v4821_v63 }
0x2fdb   :  { %v4265_v13 = vmul.f32 %v4264_v35, %v4257_v29  ;;  %v4270_v36 = vrot.slane %v4264_v35, %v6065_v47 }
0x2fdd   :  { %v4266_v0 = vsub.f32 %v4822_v7, %v4265_v13  ;;  %v4446_v2 = vmul.f32 %v4270_v36, %v4181_v12  ;;  %v4272_v5 = vmul.f32 %v4270_v36, %v6846_v61  ;;  %v4273_v55 = vmul.f32 %v4270_v36, %v6837_v45  ;;  %v5606_v45 = vld [vmem:[%s7135_s14 + $0x30] sm:$0xff]   ;;  %v5607_v61 = vld [vmem:[%s7135_s14 + $0x38] sm:$0xff]  }
0x2fde   :  { %v4447_v23 = vmul.f32 %v4270_v36, %v4182_v11  ;;  %v4271_v8 = vmul.f32 %v4270_v36, %v6840_v48  ;;  %v4445_v14 = vmul.f32 %v4270_v36, %v7035_v54  ;;  %5438 = vmatprep.subr.bf16.mxu1 %v5606_v45 }
0x2fdf   :  { %v4278_v53 = vrot.slane %v4266_v0, %v6065_v47  ;;  %5439 = vmatpush3.bf16.msra.mxu1 %v5606_v45 }
0x2fe0   :  { %5440 = vmatprep.subr.bf16.mxu1 %v5607_v61 }
0x2fe1   :  { %v4449_v30 = vadd.f32 %v4446_v2, %v4278_v53  ;;  %v4280_v49 = vadd.f32 %v4278_v53, %v4271_v8  ;;  %v4281_v60 = vadd.f32 %v4278_v53, %v4272_v5  ;;  %v4282_v3 = vadd.f32 %v4278_v53, %v4273_v55 }
0x2fe2   :  { %v4448_v10 = vadd.f32 %v4445_v14, %v4278_v53  ;;  %v4450_v58 = vadd.f32 %v4447_v23, %v4278_v53  ;;  %v5608_v23 = vld [vmem:[%s7139_s18] sm:$0xff]   ;;  %v5851_v53 = vmov 0.0  }
0x2fe3   :  { %v4283_v17 = vpack.c.bf16 %v4281_v60, %v4280_v49  ;;  %v4284_v32 = vpack.c.bf16 %v4282_v3, %v4282_v3  ;;  %5441 = vmatpush3.bf16.msra.mxu1 %v5607_v61  ;;  %v4839_v49 = vld [vmem:[%s7137_s16] ss:$0 sm:$0xff]  ;;  %s5812_s16 = scalar_lea.vmem %s4676_s0, 32 }
0x2fe4   :  { %v4451_v12 = vpack.c.bf16 %v4449_v30, %v4448_v10  ;;  %v4452_v47 = vpack.c.bf16 %v4450_v58, %v4450_v58  ;;  %5466 = vmatprep.subr.bf16.mxu1 %v5851_v53  ;;  %v4840_v3 = vld [vmem:[%s7138_s17] ss:$0 sm:$0xff]  ;;  %p5813_p0 = scmp.ne.s32.totalorder %s4676_s0, %s5812_s16  ;;  %p5818_p2 = scmp.lt.s32.totalorder %s5812_s16, %s5812_s16 }
0x2fe5   :  { %5430 = vmatprep.mubr.msk.bf16.mxu0 %vm218_vm3, %v4283_v17 }
0x2fe6   :  { %5431 = vmatmul.mubr.msk.bf16.vlgmr.msra.gmra.mrb[88].mxu0 %vm218_vm3, %v4284_v32  ;;  %v4841_v32 = vld [vmem:[%s7140_s19] ss:$0 sm:$0xff]  ;;  %p5819_p3 = por %p5818_p2, %p5817_p1 }
0x2fe7   :  { %5447 = vmatpush3.bf16.msra.mxu0 %v7004_v22  ;;  %5450 = vmatprep.mubr.msk.bf16.mxu0 %vm218_vm3, %v4451_v12  ;;  %v4823_v22 = vld [vmem:[%s7134_s13 + $0x1] ss:$0 sm:$0xff] }
0x2fe8   :  { %5448 = vmatprep.subr.bf16.mxu0 %v7011_v52  ;;  %p5820_p4 = pnand %p5819_p3, %p5813_p0 }
0x2feb   :  { %5449 = vmatpush3.bf16.msra.mxu0 %v7011_v52 }
0x2fec   :  { %5454 = vmatprep.subr.bf16.mxu0 %v7019_v31 }
0x2fee   :  { %5451 = vmatmul.mubr.msk.bf16.vlgmr.msra.gmra.mrb[92].mxu0 %vm218_vm3, %v4452_v47 }
0x2fef   :  { %5455 = vmatpush3.bf16.msra.mxu0 %v7019_v31 }
0x2ff0   :  { %5456 = vmatprep.subr.bf16.mxu0 %v7024_v34 }
0x2ff3   :  { %5457 = vmatpush3.bf16.msra.mxu0 %v7024_v34 }
0x2ff4   :  { %5458 = vmatprep.subr.bf16.mxu0 %v5606_v45 }
0x2ff7   :  { %5459 = vmatpush3.bf16.msra.mxu0 %v5606_v45 }
0x2ff8   :  { %5460 = vmatprep.subr.bf16.mxu0 %v5607_v61 }
0x2ffb   :  { %5461 = vmatpush3.bf16.msra.mxu0 %v5607_v61 }
0x30b9   :  { %v5432_v52 = vpop.f32.mrb[88].mxu0 }
0x30ba   :  { %v4352_v31 = vadd.f32 %v5432_v52, %v4823_v22  ;;  %v4343_v34 = vpop.f32.mrb[89].mxu0 }
0x30bb   :  { %v4344_v11 = vadd.f32 %v4823_v22, %v4343_v34  ;;  %v5433_v33 = vpop.f32.mrb[90].mxu0 }
0x30bc   :  { %v4346_v51 = vpop.f32.mrb[91].mxu0  ;;  %v4359_v56 = vmax.f32 %v4352_v31, 0.0 }
0x30bd   :  { %v4347_v4 = vadd.f32 %v4823_v22, %v4346_v51  ;;  %v4357_v21 = vmax.f32 %v4344_v11, 0.0 }
0x30be   :  { %v4361_v38 = vpack.c.bf16 %v4359_v56, %v4359_v56 }
0x30bf   :  { %v4358_v25 = vmax.f32 %v4347_v4, 0.0 }
0x30c1   :  { %v4360_v50 = vpack.c.bf16 %v4358_v25, %v4357_v21  ;;  %v5452_v15 = vpop.f32.mrb[92].mxu0 }
0x30c2   :  { %v4502_v39 = vadd.f32 %v5452_v15, %v4823_v22  ;;  %v4493_v59 = vpop.f32.mrb[93].mxu0 }
0x30c3   :  { %v4494_v1 = vadd.f32 %v4823_v22, %v4493_v59  ;;  %5442 = vmatprep.mubr.msk.bf16.mxu1 %vm112_vm0, %v4360_v50  ;;  %v5453_v18 = vpop.f32.mrb[94].mxu0 }
0x30c4   :  { %5443 = vmatmul.mubr.msk.bf16.vlgmr.msra.gmra.mrb[92].mxu1 %vm112_vm0, %v4361_v38  ;;  %v4496_v37 = vpop.f32.mrb[95].mxu0  ;;  %v4509_v57 = vmax.f32 %v4502_v39, 0.0 }
0x30c5   :  { %v4497_v46 = vadd.f32 %v4823_v22, %v4496_v37  ;;  %v4507_v41 = vmax.f32 %v4494_v1, 0.0  ;;  %5467 = vmatpush3.bf16.msra.mxu1 %v5608_v23  ;;  %5470 = vmatprep.mubr.msk.bf16.mxu1 %vm5852_vm11, %v5851_v53 }
0x30c6   :  { %v4511_v16 = vpack.c.bf16 %v4509_v57, %v4509_v57  ;;  %5468 = vmatprep.subr.bf16.mxu1 %v5851_v53 }
0x30c7   :  { %v4508_v24 = vmax.f32 %v4497_v46, 0.0 }
0x30c9   :  { %v4510_v20 = vpack.c.bf16 %v4508_v24, %v4507_v41 }
0x30cb   :  { %5462 = vmatprep.mubr.msk.bf16.mxu0 %vm112_vm0, %v4510_v20 }
0x30cc   :  { %5463 = vmatmul.mubr.msk.bf16.vlgmr.msra.gmra.mrb[96].mxu0 %vm112_vm0, %v4511_v16 }
0x3197   :  { %v5444_v19 = vpop.f32.mrb[92].mxu1 }
0x3198   :  { %v4432_v27 = vpop.f32.mrb[93].mxu1 }
0x3199   :  { %v5445_v42 = vpop.f32.mrb[94].mxu1  ;;  %v4433_v43 = vadd.f32 %v4828_v28, %v4432_v27 }
0x319a   :  { %v4435_v26 = vpop.f32.mrb[95].mxu1 }
0x319b   :  { %v4444_v62 = vadd.f32 %v4433_v43, %v6840_v48  ;;  %v5609_v48 = vld [vmem:[%s7139_s18 + $0x8] sm:$0xff]  }
0x319c   :  { %5469 = vmatpush3.bf16.msra.mxu1 %v5609_v48 }
0x319f   :  { %v5464_v29 = vpop.f32.mrb[96].mxu0 }
0x31a0   :  { %v4552_v6 = vpop.f32.mrb[97].mxu0 }
0x31a1   :  { %v4553_v40 = vadd.f32 %v4828_v28, %v4552_v6  ;;  %v5465_v9 = vpop.f32.mrb[98].mxu0 }
0x31a2   :  { %v4555_v44 = vpop.f32.mrb[99].mxu0 }
0x31a3   :  { %v4564_v63 = vadd.f32 %v4553_v40, %v7035_v54 }
0x31a5   :  { %v4566_v35 = vrot.slane %v4564_v63, 7 }
0x31a7   :  { %v4568_v7 = vsel %vm188_vm2, %v4444_v62, %v4566_v35 }
0x31a8   :  { %v4570_v13 = vsel %vm4569_vm10, %v4568_v7, 0.0 }
0x31a9   :  { %4571 = vadd.xlane.f32.xlu0 %v4570_v13 }
0x3236   :  { %v4572_v36 = vpop.xlane.xlu0 %4571 }
0x3237   :  { %v4574_v0 = vmul.f32 0.03125, %v4572_v36 }
0x3239   :  { %v4575_v2 = vsub.f32 %v4568_v7, %v4574_v0 }
0x323b   :  { %v4576_v5 = vmul.f32 %v4575_v2, %v4575_v2 }
0x323d   :  { %v4577_v55 = vsel %vm4569_vm10, %v4576_v5, 0.0 }
0x323e   :  { %4578 = vadd.xlane.f32.xlu1 %v4577_v55 }
0x32cb   :  { %v4579_v54 = vpop.xlane.xlu1 %4578 }
0x32cc   :  { %v4580_v8 = vmul.f32 0.03125, %v4579_v54 }
0x32ce   :  { %v4581_v14 = vadd.f32 1e-05, %v4580_v8 }
0x32d0   :  { %5810 = vrsqrt.f32 %v4581_v14 }
0x32da   :  { %v5811_v30 = vpop.eup %5810 }
0x32db   :  { %v4583_v60 = vmul.f32 %v5811_v30, %v4575_v2 }
0x32dd   :  { %v4591_v10 = vmul.f32 %v4839_v49, %v4583_v60 }
0x32df   :  { %v4599_v58 = vadd.f32 %v4840_v3, %v4591_v10 }
0x32e1   :  { %v4600_v17 = vpack.c.bf16 %v4599_v58, %v4599_v58 }
0x32e3   :  { %5471 = vmatmul.mubr.msk.bf16.vlgmr.msra.gmra.mrb[96].mxu1 %vm218_vm3, %v4600_v17 }
0x33b6   :  { %v4661_v12 = vpop.f32.mrb[96].mxu1 }
0x33b7   :  { %v4662_v47 = vadd.f32 %v4841_v32, %v4661_v12  ;;  %v5472_v45 = vpop.f32.mrb[97].mxu1 }
0x33b8   :  { %v4664_v61 = vpop.f32.mrb[98].mxu1 }
0x33b9   :  { %v5473_v22 = vpop.f32.mrb[99].mxu1  ;;  %4668 = vst.msk [vmem:[#allocation2] sm:$0x3] %vm4667_vm12, %v4662_v47 }
0x33ba   :  { %5823 = shalt.err (!%p5820_p4)
}
0x33bb   :  { %s5824_s19 = scalar_lea.hbm %s7141_s20, 32 }
0x33bc   :  { %p5825_p5 = scmp.ne.s32.totalorder %s7141_s20, %s5824_s19  ;;  %p5828_p6 = scmp.lt.u32.totalorder %s5824_s19, %s7141_s20 }
0x33be   :  { %p5830_p7 = pnand %p5828_p6, %p5825_p5 }
0x33c0   :  { %5833 = shalt.err (!%p5830_p7)
}
0x33c1   :  { %4678 = dma.vmem_to_hbm [thread:$0]  %s4676_s0, 32, %s7141_s20, [#allocation3]  }
0x33c2   :  { %5834 = dma.done.wait [#allocation3], 32  }
0x33c3   :  { %5835 = vsyncadd [#allocation3], 4294967264 }
0x33c4   :  { %4682 = vsyncpa [#allocation3], 1 }

</bundles_post_ra>
